<compile_context>
chip_gen: v7x
topology: tpu7x:2x2x1
jax: 0.10.0
libtpu: 0.0.40
codegen_flags: <defaults>
</compile_context>

<pallas_src>
import functools

import jax
import jax.numpy as jnp
import numpy as np
from jax import lax
from jax.experimental import pallas as pl
from jax.experimental.pallas import tpu as pltpu


# -----------------------------------------------------------------------------
# In-kernel KAN layer (operates on one (1, in) activation row)
# -----------------------------------------------------------------------------
def _kan_eval(x, g, rsp, wb, wsp, *, k):
    """x: (1, in); g: (G, in) knots (in on lanes);
    rsp: (k, G, in) reciprocal knot spacings 1/(g[i+kk]-g[i]);
    wb: (out, in) = scale_base^T; wsp: (n_basis, out, in) = (scale_sp*coef)^T."""
    G = g.shape[0]
    # order-0 basis, then Cox-de Boor recursion (k small & static -> unrolled)
    bsp = jnp.where(jnp.logical_and(x >= g[:G - 1, :], x < g[1:, :]), 1.0, 0.0)
    for kk in range(1, k + 1):
        nb = G - 1 - kk
        rd = rsp[kk - 1]                                       # (G, in)
        left = (x - g[0:nb, :]) * rd[0:nb, :]
        right = (g[kk + 1:kk + 1 + nb, :] - x) * rd[1:nb + 1, :]
        bsp = left * bsp[0:nb, :] + right * bsp[1:nb + 1, :]
    # bsp: (n_basis, in)

    base = x * (1.0 / (1.0 + jnp.exp(-x)))                     # SiLU base path
    dn = (((1,), (1,)), ((), ()))                              # contract lane dims
    out = lax.dot_general(base, wb, dn, preferred_element_type=jnp.float32)
    for n in range(bsp.shape[0]):                              # n_basis = 8, static
        out = out + lax.dot_general(bsp[n:n + 1, :], wsp[n], dn,
                                    preferred_element_type=jnp.float32)
    return out                                                 # (1, out)


# -----------------------------------------------------------------------------
# Fused forward kernel: one batch element per grid step
# -----------------------------------------------------------------------------
def _fckan_kernel(x_ref, w1_ref, c1_ref, w2_ref, c2_ref, w3_ref, c3_ref,
                  g0_ref, r0_ref, wb0_ref, wsp0_ref,
                  g1_ref, r1_ref, wb1_ref, wsp1_ref,
                  o_ref, *, kan_k):
    x = x_ref[0]                                               # (L, 1) channels-last

    # ---- block1: Conv1d(1->128, k=8) + folded BN + ReLU (Cin=1 -> broadcast) --
    w1 = w1_ref[...]                                           # (K1, 128), BN-scaled
    K1 = w1.shape[0]
    L1 = x.shape[0] - K1 + 1
    acc = x[0:L1, :] * w1[0:1, :]
    for k in range(1, K1):
        acc = acc + x[k:k + L1, :] * w1[k:k + 1, :]
    h1 = jnp.maximum(acc + c1_ref[...], 0.0)                   # (L1, 128)

    # ---- block2: Conv1d(128->256, k=5) + folded BN + ReLU ----
    K2 = w2_ref.shape[0]
    L2 = L1 - K2 + 1
    acc = jnp.dot(h1[0:L2, :], w2_ref[0], preferred_element_type=jnp.float32)
    for k in range(1, K2):
        acc = acc + jnp.dot(h1[k:k + L2, :], w2_ref[k],
                            preferred_element_type=jnp.float32)
    h2 = jnp.maximum(acc + c2_ref[...], 0.0)                   # (L2, 256)

    # ---- block3: Conv1d(256->128, k=3) + BN + ReLU + global average pool ----
    K3 = w3_ref.shape[0]
    L3 = L2 - K3 + 1
    acc = jnp.dot(h2[0:L3, :], w3_ref[0], preferred_element_type=jnp.float32)
    for k in range(1, K3):
        acc = acc + jnp.dot(h2[k:k + L3, :], w3_ref[k],
                            preferred_element_type=jnp.float32)
    h3 = jnp.maximum(acc + c3_ref[...], 0.0)                   # (L3, 128)
    feat = jnp.mean(h3, axis=0, keepdims=True)                 # (1, 128)

    # ---- KAN(width=[128, 5, n_classes], grid=5, k=3) ----
    z0 = _kan_eval(feat, g0_ref[...], r0_ref[...], wb0_ref[...], wsp0_ref[...],
                   k=kan_k)                                    # (1, 5)
    z1 = _kan_eval(z0, g1_ref[...], r1_ref[...], wb1_ref[...], wsp1_ref[...],
                   k=kan_k)                                    # (1, n_classes)
    o_ref[0] = z1


def fckan_forward(x_cl, params, *, kan_k=3):
    """x_cl: (B, L, 1) channels-last input; params: kernel-layout arrays."""
    B, L, _ = x_cl.shape
    n_classes = params[-2].shape[0]                            # wb1: (n_classes, 5)

    def full_spec(a):                                          # whole-array block
        nd = a.ndim
        return pl.BlockSpec(a.shape, lambda b, _nd=nd: (0,) * _nd)

    out = pl.pallas_call(
        functools.partial(_fckan_kernel, kan_k=kan_k),
        out_shape=jax.ShapeDtypeStruct((B, 1, n_classes), jnp.float32),
        grid=(B,),
        in_specs=[pl.BlockSpec((1, L, 1), lambda b: (b, 0, 0))]
                + [full_spec(a) for a in params],
        out_specs=pl.BlockSpec((1, 1, n_classes), lambda b: (b, 0, 0)),
        compiler_params=pltpu.CompilerParams(
            dimension_semantics=("parallel",),                 # v7x: 2 TCs share B
            vmem_limit_bytes=32 * 1024 * 1024),
    )(x_cl, *params)
    return out[:, 0, :]


# -----------------------------------------------------------------------------
# Host-side parameter preparation
# -----------------------------------------------------------------------------
def fold_bn(gamma, beta, mean, var, conv_bias, eps=1e-5):
    a = gamma / jnp.sqrt(var + eps)
    c = a * (conv_bias - mean) + beta
    return a.astype(jnp.float32), c.astype(jnp.float32)


def make_kan_grid(in_dim, num=5, k=3, lo=-1.0, hi=1.0):
    h = (hi - lo) / num
    pts = lo + h * jnp.arange(-k, num + k + 1, dtype=jnp.float32)
    return jnp.tile(pts[None, :], (in_dim, 1))                 # (in, num+2k+1)


def make_recip_spacings(grid, k):
    """rsp[kk-1, i, :] = 1/(g[i+kk]-g[i]); zero in the unused padded tail."""
    g = np.asarray(grid, np.float64)                           # (in, G)
    in_dim, G = g.shape
    rsp = np.zeros((k, G, in_dim), np.float64)
    for kk in range(1, k + 1):
        rsp[kk - 1, :G - kk, :] = (1.0 / (g[:, kk:] - g[:, :-kk])).T
    return jnp.asarray(rsp, jnp.float32)


def conv_params_channels_last(w_kcoci, a_vec, c_vec):
    """(K, Cout, Cin) -> (K, Cin, Cout) with BN scale folded; shift as (1, Cout)."""
    w = jnp.transpose(w_kcoci, (0, 2, 1)) * a_vec[None, None, :]
    return w, c_vec[None, :]


def kan_params_lane_dense(grid, coef, sb, sp, k):
    g_t = jnp.asarray(grid.T)                                  # (G, in)
    rsp = make_recip_spacings(grid, k)                         # (k, G, in)
    wb = jnp.asarray(sb.T)                                     # (out, in)
    wsp = jnp.transpose(sp[:, :, None] * coef, (2, 1, 0))      # (n_basis, out, in)
    return g_t, rsp, wb, wsp


# -----------------------------------------------------------------------------
# Pure-JAX reference (correctness check)
# -----------------------------------------------------------------------------
def ref_conv_bn_relu(x, w_kcoci, a, c):
    w = jnp.transpose(w_kcoci, (1, 2, 0))                      # (Cout, Cin, K)
    y = lax.conv_general_dilated(
        x, w, window_strides=(1,), padding="VALID",
        dimension_numbers=("NCH", "OIH", "NCH"))
    return jnp.maximum(a[None, :, None] * y + c[None, :, None], 0.0)


def ref_kan_layer(x, grid, coef, sb, sp, k=3):
    xe = x[:, :, None]
    ge = grid[None, :, :]
    Bb = jnp.where(jnp.logical_and(xe >= ge[:, :, :-1], xe < ge[:, :, 1:]),
                   1.0, 0.0)
    for kk in range(1, k + 1):
        Bb = ((xe - ge[:, :, :-(kk + 1)]) /
              (ge[:, :, kk:-1] - ge[:, :, :-(kk + 1)]) * Bb[:, :, :-1] +
              (ge[:, :, kk + 1:] - xe) /
              (ge[:, :, kk + 1:] - ge[:, :, 1:-kk]) * Bb[:, :, 1:])
    spline = jnp.einsum("bin,ion->bio", Bb, coef)
    base = x * jax.nn.sigmoid(x)
    y = sb[None] * base[:, :, None] + sp[None] * spline
    return y.sum(axis=1)


# -----------------------------------------------------------------------------
if __name__ == "__main__":
    key = jax.random.PRNGKey(0)
    ks = jax.random.split(key, 24)

    B, L, n_classes = 2, 64, 3

    # ---- input (PyTorch NCW: (batch, 1, length)) ----
    x = jax.random.normal(ks[0], (B, 1, L), dtype=jnp.float32)

    # ---- block1: Conv1d(1->128, k=8) + BN(128) ----
    w1 = jax.random.normal(ks[1], (8, 128, 1), jnp.float32) / np.sqrt(1 * 8)
    b1 = 0.01 * jax.random.normal(ks[2], (128,), jnp.float32)
    g1 = 1.0 + 0.1 * jax.random.normal(ks[3], (128,), jnp.float32)
    be1 = 0.1 * jax.random.normal(ks[4], (128,), jnp.float32)
    m1 = 0.05 * jax.random.normal(ks[5], (128,), jnp.float32)
    v1 = 0.9 + 0.2 * jax.random.uniform(ks[6], (128,), jnp.float32)
    a1, c1 = fold_bn(g1, be1, m1, v1, b1)

    # ---- block2: Conv1d(128->256, k=5) + BN(256) ----
    w2 = jax.random.normal(ks[7], (5, 256, 128), jnp.float32) / np.sqrt(128 * 5)
    b2 = 0.01 * jax.random.normal(ks[8], (256,), jnp.float32)
    g2 = 1.0 + 0.1 * jax.random.normal(ks[9], (256,), jnp.float32)
    be2 = 0.1 * jax.random.normal(ks[10], (256,), jnp.float32)
    m2 = 0.05 * jax.random.normal(ks[11], (256,), jnp.float32)
    v2 = 0.9 + 0.2 * jax.random.uniform(ks[12], (256,), jnp.float32)
    a2, c2 = fold_bn(g2, be2, m2, v2, b2)

    # ---- block3: Conv1d(256->128, k=3) + BN(128) ----
    w3 = jax.random.normal(ks[13], (3, 128, 256), jnp.float32) / np.sqrt(256 * 3)
    b3 = 0.01 * jax.random.normal(ks[14], (128,), jnp.float32)
    g3 = 1.0 + 0.1 * jax.random.normal(ks[15], (128,), jnp.float32)
    be3 = 0.1 * jax.random.normal(ks[16], (128,), jnp.float32)
    m3 = 0.05 * jax.random.normal(ks[17], (128,), jnp.float32)
    v3 = 0.9 + 0.2 * jax.random.uniform(ks[18], (128,), jnp.float32)
    a3, c3 = fold_bn(g3, be3, m3, v3, b3)

    # ---- KAN(width=[128, 5, n_classes], grid=5, k=3) ----
    KAN_K, KAN_G = 3, 5
    n_basis = KAN_G + KAN_K                                    # 8
    grid0 = make_kan_grid(128, KAN_G, KAN_K)                   # (128, 12)
    coef0 = 0.1 * jax.random.normal(ks[19], (128, 5, n_basis), jnp.float32)
    sb0 = (1.0 / np.sqrt(128)) * (
        1.0 + 0.3 * jax.random.normal(ks[20], (128, 5), jnp.float32))
    sp0 = jnp.ones((128, 5), jnp.float32)
    grid1 = make_kan_grid(5, KAN_G, KAN_K)                     # (5, 12)
    coef1 = 0.1 * jax.random.normal(ks[21], (5, n_classes, n_basis), jnp.float32)
    sb1 = (1.0 / np.sqrt(5)) * (
        1.0 + 0.3 * jax.random.normal(ks[22], (5, n_classes), jnp.float32))
    sp1 = jnp.ones((5, n_classes), jnp.float32)

    # ---- kernel-layout parameters (channels-last, BN folded, lane-dense) ----
    x_cl = jnp.transpose(x, (0, 2, 1))                         # (B, L, 1)
    w1_k = w1[:, :, 0] * a1[None, :]                           # (8, 128)
    c1_k = c1[None, :]                                         # (1, 128)
    w2_k, c2_k = conv_params_channels_last(w2, a2, c2)         # (5,128,256),(1,256)
    w3_k, c3_k = conv_params_channels_last(w3, a3, c3)         # (3,256,128),(1,128)
    g0_k, r0_k, wb0_k, wsp0_k = kan_params_lane_dense(grid0, coef0, sb0, sp0, KAN_K)
    g1_k, r1_k, wb1_k, wsp1_k = kan_params_lane_dense(grid1, coef1, sb1, sp1, KAN_K)

    params = (w1_k, c1_k, w2_k, c2_k, w3_k, c3_k,
              g0_k, r0_k, wb0_k, wsp0_k, g1_k, r1_k, wb1_k, wsp1_k)

    # ---- fused Pallas forward ----
    out = fckan_forward(x_cl, params, kan_k=KAN_K)             # (B, n_classes)
    out = jax.block_until_ready(out)

    # ---- pure-JAX reference check ----
    r1 = ref_conv_bn_relu(x, w1, a1, c1)
    r2 = ref_conv_bn_relu(r1, w2, a2, c2)
    r3 = ref_conv_bn_relu(r2, w3, a3, c3)
    rfeat = jnp.mean(r3, axis=-1)
    rz0 = ref_kan_layer(rfeat, grid0, coef0, sb0, sp0, k=KAN_K)
    rout = ref_kan_layer(rz0, grid1, coef1, sb1, sp1, k=KAN_K)

    np.testing.assert_allclose(np.asarray(out), np.asarray(rout),
                               rtol=2e-4, atol=2e-4)
    # TODO(synk): B-spline boundary handling (half-open intervals, inputs outside
    # the grid) matches the JAX reference, not necessarily pykan's exact behavior.
    print("KERNEL_OK")
</pallas_src>

<mosaic_0001>
module attributes {stable_mosaic.version = 11 : i64} {
  func.func @_fckan_kernel(%arg0: i32, %arg1: memref<1x64x1xf32, #tpu.memory_space<vmem>>, %arg2: memref<8x128xf32, #tpu.memory_space<vmem>>, %arg3: memref<1x128xf32, #tpu.memory_space<vmem>>, %arg4: memref<5x128x256xf32, #tpu.memory_space<vmem>>, %arg5: memref<1x256xf32, #tpu.memory_space<vmem>>, %arg6: memref<3x256x128xf32, #tpu.memory_space<vmem>>, %arg7: memref<1x128xf32, #tpu.memory_space<vmem>>, %arg8: memref<12x128xf32, #tpu.memory_space<vmem>>, %arg9: memref<3x12x128xf32, #tpu.memory_space<vmem>>, %arg10: memref<5x128xf32, #tpu.memory_space<vmem>>, %arg11: memref<8x5x128xf32, #tpu.memory_space<vmem>>, %arg12: memref<12x5xf32, #tpu.memory_space<vmem>>, %arg13: memref<3x12x5xf32, #tpu.memory_space<vmem>>, %arg14: memref<3x5xf32, #tpu.memory_space<vmem>>, %arg15: memref<8x3x5xf32, #tpu.memory_space<vmem>>, %arg16: memref<1x1x3xf32, #tpu.memory_space<vmem>>) attributes {dimension_semantics = [#tpu.dimension_semantics<parallel>], iteration_bounds = array<i64: 2>, scalar_prefetch = 0 : i64, scratch_operands = 0 : i64, tpu.core_type = #tpu.core_type<tc>, window_params = [{transform_indices = @transform_0, window_bounds = array<i64: 1, 64, 1>}, {pipeline_mode = #tpu.pipeline_mode<synchronous>, transform_indices = @transform_1, window_bounds = array<i64: 8, 128>}, {pipeline_mode = #tpu.pipeline_mode<synchronous>, transform_indices = @transform_2, window_bounds = array<i64: 1, 128>}, {pipeline_mode = #tpu.pipeline_mode<synchronous>, transform_indices = @transform_3, window_bounds = array<i64: 5, 128, 256>}, {pipeline_mode = #tpu.pipeline_mode<synchronous>, transform_indices = @transform_4, window_bounds = array<i64: 1, 256>}, {pipeline_mode = #tpu.pipeline_mode<synchronous>, transform_indices = @transform_5, window_bounds = array<i64: 3, 256, 128>}, {pipeline_mode = #tpu.pipeline_mode<synchronous>, transform_indices = @transform_6, window_bounds = array<i64: 1, 128>}, {pipeline_mode = #tpu.pipeline_mode<synchronous>, transform_indices = @transform_7, window_bounds = array<i64: 12, 128>}, {pipeline_mode = #tpu.pipeline_mode<synchronous>, transform_indices = @transform_8, window_bounds = array<i64: 3, 12, 128>}, {pipeline_mode = #tpu.pipeline_mode<synchronous>, transform_indices = @transform_9, window_bounds = array<i64: 5, 128>}, {pipeline_mode = #tpu.pipeline_mode<synchronous>, transform_indices = @transform_10, window_bounds = array<i64: 8, 5, 128>}, {pipeline_mode = #tpu.pipeline_mode<synchronous>, transform_indices = @transform_11, window_bounds = array<i64: 12, 5>}, {pipeline_mode = #tpu.pipeline_mode<synchronous>, transform_indices = @transform_12, window_bounds = array<i64: 3, 12, 5>}, {pipeline_mode = #tpu.pipeline_mode<synchronous>, transform_indices = @transform_13, window_bounds = array<i64: 3, 5>}, {pipeline_mode = #tpu.pipeline_mode<synchronous>, transform_indices = @transform_14, window_bounds = array<i64: 8, 3, 5>}, {transform_indices = @transform_15, window_bounds = array<i64: 1, 1, 3>}]} {
    %c0 = arith.constant 0 : index
    %c0_0 = arith.constant 0 : index
    %c0_1 = arith.constant 0 : index
    %0 = vector.load %arg1[%c0, %c0_0, %c0_1] : memref<1x64x1xf32, #tpu.memory_space<vmem>>, vector<1x64x1xf32>
    %1 = vector.shape_cast %0 : vector<1x64x1xf32> to vector<64x1xf32>
    %c0_2 = arith.constant 0 : index
    %c0_3 = arith.constant 0 : index
    %2 = vector.load %arg2[%c0_2, %c0_3] : memref<8x128xf32, #tpu.memory_space<vmem>>, vector<8x128xf32>
    %3 = vector.extract_strided_slice %1 {offsets = [0, 0], sizes = [57, 1], strides = [1, 1]} : vector<64x1xf32> to vector<57x1xf32>
    %4 = vector.extract_strided_slice %2 {offsets = [0, 0], sizes = [1, 128], strides = [1, 1]} : vector<8x128xf32> to vector<1x128xf32>
    %5 = vector.broadcast %3 : vector<57x1xf32> to vector<57x128xf32>
    %6 = vector.broadcast %4 : vector<1x128xf32> to vector<57x128xf32>
    %7 = arith.mulf %5, %6 : vector<57x128xf32>
    %8 = vector.extract_strided_slice %1 {offsets = [1, 0], sizes = [57, 1], strides = [1, 1]} : vector<64x1xf32> to vector<57x1xf32>
    %9 = vector.extract_strided_slice %2 {offsets = [1, 0], sizes = [1, 128], strides = [1, 1]} : vector<8x128xf32> to vector<1x128xf32>
    %10 = vector.broadcast %8 : vector<57x1xf32> to vector<57x128xf32>
    %11 = vector.broadcast %9 : vector<1x128xf32> to vector<57x128xf32>
    %12 = arith.mulf %10, %11 : vector<57x128xf32>
    %13 = arith.addf %7, %12 : vector<57x128xf32>
    %14 = vector.extract_strided_slice %1 {offsets = [2, 0], sizes = [57, 1], strides = [1, 1]} : vector<64x1xf32> to vector<57x1xf32>
    %15 = vector.extract_strided_slice %2 {offsets = [2, 0], sizes = [1, 128], strides = [1, 1]} : vector<8x128xf32> to vector<1x128xf32>
    %16 = vector.broadcast %14 : vector<57x1xf32> to vector<57x128xf32>
    %17 = vector.broadcast %15 : vector<1x128xf32> to vector<57x128xf32>
    %18 = arith.mulf %16, %17 : vector<57x128xf32>
    %19 = arith.addf %13, %18 : vector<57x128xf32>
    %20 = vector.extract_strided_slice %1 {offsets = [3, 0], sizes = [57, 1], strides = [1, 1]} : vector<64x1xf32> to vector<57x1xf32>
    %21 = vector.extract_strided_slice %2 {offsets = [3, 0], sizes = [1, 128], strides = [1, 1]} : vector<8x128xf32> to vector<1x128xf32>
    %22 = vector.broadcast %20 : vector<57x1xf32> to vector<57x128xf32>
    %23 = vector.broadcast %21 : vector<1x128xf32> to vector<57x128xf32>
    %24 = arith.mulf %22, %23 : vector<57x128xf32>
    %25 = arith.addf %19, %24 : vector<57x128xf32>
    %26 = vector.extract_strided_slice %1 {offsets = [4, 0], sizes = [57, 1], strides = [1, 1]} : vector<64x1xf32> to vector<57x1xf32>
    %27 = vector.extract_strided_slice %2 {offsets = [4, 0], sizes = [1, 128], strides = [1, 1]} : vector<8x128xf32> to vector<1x128xf32>
    %28 = vector.broadcast %26 : vector<57x1xf32> to vector<57x128xf32>
    %29 = vector.broadcast %27 : vector<1x128xf32> to vector<57x128xf32>
    %30 = arith.mulf %28, %29 : vector<57x128xf32>
    %31 = arith.addf %25, %30 : vector<57x128xf32>
    %32 = vector.extract_strided_slice %1 {offsets = [5, 0], sizes = [57, 1], strides = [1, 1]} : vector<64x1xf32> to vector<57x1xf32>
    %33 = vector.extract_strided_slice %2 {offsets = [5, 0], sizes = [1, 128], strides = [1, 1]} : vector<8x128xf32> to vector<1x128xf32>
    %34 = vector.broadcast %32 : vector<57x1xf32> to vector<57x128xf32>
    %35 = vector.broadcast %33 : vector<1x128xf32> to vector<57x128xf32>
    %36 = arith.mulf %34, %35 : vector<57x128xf32>
    %37 = arith.addf %31, %36 : vector<57x128xf32>
    %38 = vector.extract_strided_slice %1 {offsets = [6, 0], sizes = [57, 1], strides = [1, 1]} : vector<64x1xf32> to vector<57x1xf32>
    %39 = vector.extract_strided_slice %2 {offsets = [6, 0], sizes = [1, 128], strides = [1, 1]} : vector<8x128xf32> to vector<1x128xf32>
    %40 = vector.broadcast %38 : vector<57x1xf32> to vector<57x128xf32>
    %41 = vector.broadcast %39 : vector<1x128xf32> to vector<57x128xf32>
    %42 = arith.mulf %40, %41 : vector<57x128xf32>
    %43 = arith.addf %37, %42 : vector<57x128xf32>
    %44 = vector.extract_strided_slice %1 {offsets = [7, 0], sizes = [57, 1], strides = [1, 1]} : vector<64x1xf32> to vector<57x1xf32>
    %45 = vector.extract_strided_slice %2 {offsets = [7, 0], sizes = [1, 128], strides = [1, 1]} : vector<8x128xf32> to vector<1x128xf32>
    %46 = vector.broadcast %44 : vector<57x1xf32> to vector<57x128xf32>
    %47 = vector.broadcast %45 : vector<1x128xf32> to vector<57x128xf32>
    %48 = arith.mulf %46, %47 : vector<57x128xf32>
    %49 = arith.addf %43, %48 : vector<57x128xf32>
    %c0_4 = arith.constant 0 : index
    %c0_5 = arith.constant 0 : index
    %50 = vector.load %arg3[%c0_4, %c0_5] : memref<1x128xf32, #tpu.memory_space<vmem>>, vector<1x128xf32>
    %51 = vector.broadcast %50 : vector<1x128xf32> to vector<57x128xf32>
    %52 = arith.addf %49, %51 : vector<57x128xf32>
    %cst = arith.constant 0.000000e+00 : f32
    %53 = vector.broadcast %cst : f32 to vector<57x128xf32>
    %54 = arith.maximumf %52, %53 : vector<57x128xf32>
    %55 = vector.extract_strided_slice %54 {offsets = [0, 0], sizes = [53, 128], strides = [1, 1]} : vector<57x128xf32> to vector<53x128xf32>
    %c0_6 = arith.constant 0 : index
    %c0_7 = arith.constant 0 : index
    %c0_8 = arith.constant 0 : index
    %56 = vector.load %arg4[%c0_6, %c0_7, %c0_8] : memref<5x128x256xf32, #tpu.memory_space<vmem>>, vector<1x128x256xf32>
    %57 = vector.shape_cast %56 : vector<1x128x256xf32> to vector<128x256xf32>
    %cst_9 = arith.constant dense<0.000000e+00> : vector<53x256xf32>
    %58 = tpu.matmul %55, %57, %cst_9 {dimension_numbers = #tpu.dot_dimension_numbers<[1], [0], [0], [1], [0, 0, 1, 1], [], []>} : vector<53x128xf32>, vector<128x256xf32>, vector<53x256xf32> -> vector<53x256xf32>
    %59 = vector.extract_strided_slice %54 {offsets = [1, 0], sizes = [53, 128], strides = [1, 1]} : vector<57x128xf32> to vector<53x128xf32>
    %c1 = arith.constant 1 : index
    %c0_10 = arith.constant 0 : index
    %c0_11 = arith.constant 0 : index
    %60 = vector.load %arg4[%c1, %c0_10, %c0_11] : memref<5x128x256xf32, #tpu.memory_space<vmem>>, vector<1x128x256xf32>
    %61 = vector.shape_cast %60 : vector<1x128x256xf32> to vector<128x256xf32>
    %cst_12 = arith.constant dense<0.000000e+00> : vector<53x256xf32>
    %62 = tpu.matmul %59, %61, %cst_12 {dimension_numbers = #tpu.dot_dimension_numbers<[1], [0], [0], [1], [0, 0, 1, 1], [], []>} : vector<53x128xf32>, vector<128x256xf32>, vector<53x256xf32> -> vector<53x256xf32>
    %63 = arith.addf %58, %62 : vector<53x256xf32>
    %64 = vector.extract_strided_slice %54 {offsets = [2, 0], sizes = [53, 128], strides = [1, 1]} : vector<57x128xf32> to vector<53x128xf32>
    %c2 = arith.constant 2 : index
    %c0_13 = arith.constant 0 : index
    %c0_14 = arith.constant 0 : index
    %65 = vector.load %arg4[%c2, %c0_13, %c0_14] : memref<5x128x256xf32, #tpu.memory_space<vmem>>, vector<1x128x256xf32>
    %66 = vector.shape_cast %65 : vector<1x128x256xf32> to vector<128x256xf32>
    %cst_15 = arith.constant dense<0.000000e+00> : vector<53x256xf32>
    %67 = tpu.matmul %64, %66, %cst_15 {dimension_numbers = #tpu.dot_dimension_numbers<[1], [0], [0], [1], [0, 0, 1, 1], [], []>} : vector<53x128xf32>, vector<128x256xf32>, vector<53x256xf32> -> vector<53x256xf32>
    %68 = arith.addf %63, %67 : vector<53x256xf32>
    %69 = vector.extract_strided_slice %54 {offsets = [3, 0], sizes = [53, 128], strides = [1, 1]} : vector<57x128xf32> to vector<53x128xf32>
    %c3 = arith.constant 3 : index
    %c0_16 = arith.constant 0 : index
    %c0_17 = arith.constant 0 : index
    %70 = vector.load %arg4[%c3, %c0_16, %c0_17] : memref<5x128x256xf32, #tpu.memory_space<vmem>>, vector<1x128x256xf32>
    %71 = vector.shape_cast %70 : vector<1x128x256xf32> to vector<128x256xf32>
    %cst_18 = arith.constant dense<0.000000e+00> : vector<53x256xf32>
    %72 = tpu.matmul %69, %71, %cst_18 {dimension_numbers = #tpu.dot_dimension_numbers<[1], [0], [0], [1], [0, 0, 1, 1], [], []>} : vector<53x128xf32>, vector<128x256xf32>, vector<53x256xf32> -> vector<53x256xf32>
    %73 = arith.addf %68, %72 : vector<53x256xf32>
    %74 = vector.extract_strided_slice %54 {offsets = [4, 0], sizes = [53, 128], strides = [1, 1]} : vector<57x128xf32> to vector<53x128xf32>
    %c4 = arith.constant 4 : index
    %c0_19 = arith.constant 0 : index
    %c0_20 = arith.constant 0 : index
    %75 = vector.load %arg4[%c4, %c0_19, %c0_20] : memref<5x128x256xf32, #tpu.memory_space<vmem>>, vector<1x128x256xf32>
    %76 = vector.shape_cast %75 : vector<1x128x256xf32> to vector<128x256xf32>
    %cst_21 = arith.constant dense<0.000000e+00> : vector<53x256xf32>
    %77 = tpu.matmul %74, %76, %cst_21 {dimension_numbers = #tpu.dot_dimension_numbers<[1], [0], [0], [1], [0, 0, 1, 1], [], []>} : vector<53x128xf32>, vector<128x256xf32>, vector<53x256xf32> -> vector<53x256xf32>
    %78 = arith.addf %73, %77 : vector<53x256xf32>
    %c0_22 = arith.constant 0 : index
    %c0_23 = arith.constant 0 : index
    %79 = vector.load %arg5[%c0_22, %c0_23] : memref<1x256xf32, #tpu.memory_space<vmem>>, vector<1x256xf32>
    %80 = vector.broadcast %79 : vector<1x256xf32> to vector<53x256xf32>
    %81 = arith.addf %78, %80 : vector<53x256xf32>
    %cst_24 = arith.constant 0.000000e+00 : f32
    %82 = vector.broadcast %cst_24 : f32 to vector<53x256xf32>
    %83 = arith.maximumf %81, %82 : vector<53x256xf32>
    %84 = vector.extract_strided_slice %83 {offsets = [0, 0], sizes = [51, 256], strides = [1, 1]} : vector<53x256xf32> to vector<51x256xf32>
    %c0_25 = arith.constant 0 : index
    %c0_26 = arith.constant 0 : index
    %c0_27 = arith.constant 0 : index
    %85 = vector.load %arg6[%c0_25, %c0_26, %c0_27] : memref<3x256x128xf32, #tpu.memory_space<vmem>>, vector<1x256x128xf32>
    %86 = vector.shape_cast %85 : vector<1x256x128xf32> to vector<256x128xf32>
    %cst_28 = arith.constant dense<0.000000e+00> : vector<51x128xf32>
    %87 = tpu.matmul %84, %86, %cst_28 {dimension_numbers = #tpu.dot_dimension_numbers<[1], [0], [0], [1], [0, 0, 1, 1], [], []>} : vector<51x256xf32>, vector<256x128xf32>, vector<51x128xf32> -> vector<51x128xf32>
    %88 = vector.extract_strided_slice %83 {offsets = [1, 0], sizes = [51, 256], strides = [1, 1]} : vector<53x256xf32> to vector<51x256xf32>
    %c1_29 = arith.constant 1 : index
    %c0_30 = arith.constant 0 : index
    %c0_31 = arith.constant 0 : index
    %89 = vector.load %arg6[%c1_29, %c0_30, %c0_31] : memref<3x256x128xf32, #tpu.memory_space<vmem>>, vector<1x256x128xf32>
    %90 = vector.shape_cast %89 : vector<1x256x128xf32> to vector<256x128xf32>
    %cst_32 = arith.constant dense<0.000000e+00> : vector<51x128xf32>
    %91 = tpu.matmul %88, %90, %cst_32 {dimension_numbers = #tpu.dot_dimension_numbers<[1], [0], [0], [1], [0, 0, 1, 1], [], []>} : vector<51x256xf32>, vector<256x128xf32>, vector<51x128xf32> -> vector<51x128xf32>
    %92 = arith.addf %87, %91 : vector<51x128xf32>
    %93 = vector.extract_strided_slice %83 {offsets = [2, 0], sizes = [51, 256], strides = [1, 1]} : vector<53x256xf32> to vector<51x256xf32>
    %c2_33 = arith.constant 2 : index
    %c0_34 = arith.constant 0 : index
    %c0_35 = arith.constant 0 : index
    %94 = vector.load %arg6[%c2_33, %c0_34, %c0_35] : memref<3x256x128xf32, #tpu.memory_space<vmem>>, vector<1x256x128xf32>
    %95 = vector.shape_cast %94 : vector<1x256x128xf32> to vector<256x128xf32>
    %cst_36 = arith.constant dense<0.000000e+00> : vector<51x128xf32>
    %96 = tpu.matmul %93, %95, %cst_36 {dimension_numbers = #tpu.dot_dimension_numbers<[1], [0], [0], [1], [0, 0, 1, 1], [], []>} : vector<51x256xf32>, vector<256x128xf32>, vector<51x128xf32> -> vector<51x128xf32>
    %97 = arith.addf %92, %96 : vector<51x128xf32>
    %c0_37 = arith.constant 0 : index
    %c0_38 = arith.constant 0 : index
    %98 = vector.load %arg7[%c0_37, %c0_38] : memref<1x128xf32, #tpu.memory_space<vmem>>, vector<1x128xf32>
    %99 = vector.broadcast %98 : vector<1x128xf32> to vector<51x128xf32>
    %100 = arith.addf %97, %99 : vector<51x128xf32>
    %cst_39 = arith.constant 0.000000e+00 : f32
    %101 = vector.broadcast %cst_39 : f32 to vector<51x128xf32>
    %102 = arith.maximumf %100, %101 : vector<51x128xf32>
    %cst_40 = arith.constant dense<0.000000e+00> : vector<128xf32>
    %103 = vector.multi_reduction <add>, %102, %cst_40 [0] : vector<51x128xf32> to vector<128xf32>
    %104 = vector.shape_cast %103 : vector<128xf32> to vector<1x128xf32>
    %cst_41 = arith.constant 5.100000e+01 : f32
    %105 = vector.broadcast %cst_41 : f32 to vector<1x128xf32>
    %106 = arith.divf %104, %105 : vector<1x128xf32>
    %c0_42 = arith.constant 0 : index
    %c0_43 = arith.constant 0 : index
    %107 = vector.load %arg8[%c0_42, %c0_43] : memref<12x128xf32, #tpu.memory_space<vmem>>, vector<12x128xf32>
    %c0_44 = arith.constant 0 : index
    %c0_45 = arith.constant 0 : index
    %c0_46 = arith.constant 0 : index
    %108 = vector.load %arg9[%c0_44, %c0_45, %c0_46] : memref<3x12x128xf32, #tpu.memory_space<vmem>>, vector<3x12x128xf32>
    %c0_47 = arith.constant 0 : index
    %c0_48 = arith.constant 0 : index
    %109 = vector.load %arg10[%c0_47, %c0_48] : memref<5x128xf32, #tpu.memory_space<vmem>>, vector<5x128xf32>
    %c0_49 = arith.constant 0 : index
    %c0_50 = arith.constant 0 : index
    %c0_51 = arith.constant 0 : index
    %110 = vector.load %arg11[%c0_49, %c0_50, %c0_51] : memref<8x5x128xf32, #tpu.memory_space<vmem>>, vector<8x5x128xf32>
    %111 = vector.extract_strided_slice %107 {offsets = [0, 0], sizes = [11, 128], strides = [1, 1]} : vector<12x128xf32> to vector<11x128xf32>
    %112 = vector.broadcast %106 : vector<1x128xf32> to vector<11x128xf32>
    %113 = arith.cmpf oge, %112, %111 : vector<11x128xf32>
    %114 = vector.extract_strided_slice %107 {offsets = [1, 0], sizes = [11, 128], strides = [1, 1]} : vector<12x128xf32> to vector<11x128xf32>
    %115 = vector.broadcast %106 : vector<1x128xf32> to vector<11x128xf32>
    %116 = arith.cmpf olt, %115, %114 : vector<11x128xf32>
    %117 = arith.andi %113, %116 : vector<11x128xi1>
    %cst_52 = arith.constant 1.000000e+00 : f32
    %cst_53 = arith.constant 0.000000e+00 : f32
    %118 = vector.broadcast %cst_52 : f32 to vector<11x128xf32>
    %119 = vector.broadcast %cst_53 : f32 to vector<11x128xf32>
    %120 = arith.select %117, %118, %119 : vector<11x128xi1>, vector<11x128xf32>
    %121 = vector.extract_strided_slice %108 {offsets = [0, 0, 0], sizes = [1, 12, 128], strides = [1, 1, 1]} : vector<3x12x128xf32> to vector<1x12x128xf32>
    %122 = vector.shape_cast %121 : vector<1x12x128xf32> to vector<12x128xf32>
    %123 = vector.extract_strided_slice %107 {offsets = [0, 0], sizes = [10, 128], strides = [1, 1]} : vector<12x128xf32> to vector<10x128xf32>
    %124 = vector.broadcast %106 : vector<1x128xf32> to vector<10x128xf32>
    %125 = arith.subf %124, %123 : vector<10x128xf32>
    %126 = vector.extract_strided_slice %122 {offsets = [0, 0], sizes = [10, 128], strides = [1, 1]} : vector<12x128xf32> to vector<10x128xf32>
    %127 = arith.mulf %125, %126 : vector<10x128xf32>
    %128 = vector.extract_strided_slice %107 {offsets = [2, 0], sizes = [10, 128], strides = [1, 1]} : vector<12x128xf32> to vector<10x128xf32>
    %129 = vector.broadcast %106 : vector<1x128xf32> to vector<10x128xf32>
    %130 = arith.subf %128, %129 : vector<10x128xf32>
    %131 = vector.extract_strided_slice %122 {offsets = [1, 0], sizes = [10, 128], strides = [1, 1]} : vector<12x128xf32> to vector<10x128xf32>
    %132 = arith.mulf %130, %131 : vector<10x128xf32>
    %133 = vector.extract_strided_slice %120 {offsets = [0, 0], sizes = [10, 128], strides = [1, 1]} : vector<11x128xf32> to vector<10x128xf32>
    %134 = arith.mulf %127, %133 : vector<10x128xf32>
    %135 = vector.extract_strided_slice %120 {offsets = [1, 0], sizes = [10, 128], strides = [1, 1]} : vector<11x128xf32> to vector<10x128xf32>
    %136 = arith.mulf %132, %135 : vector<10x128xf32>
    %137 = arith.addf %134, %136 : vector<10x128xf32>
    %138 = vector.extract_strided_slice %108 {offsets = [1, 0, 0], sizes = [1, 12, 128], strides = [1, 1, 1]} : vector<3x12x128xf32> to vector<1x12x128xf32>
    %139 = vector.shape_cast %138 : vector<1x12x128xf32> to vector<12x128xf32>
    %140 = vector.extract_strided_slice %107 {offsets = [0, 0], sizes = [9, 128], strides = [1, 1]} : vector<12x128xf32> to vector<9x128xf32>
    %141 = vector.broadcast %106 : vector<1x128xf32> to vector<9x128xf32>
    %142 = arith.subf %141, %140 : vector<9x128xf32>
    %143 = vector.extract_strided_slice %139 {offsets = [0, 0], sizes = [9, 128], strides = [1, 1]} : vector<12x128xf32> to vector<9x128xf32>
    %144 = arith.mulf %142, %143 : vector<9x128xf32>
    %145 = vector.extract_strided_slice %107 {offsets = [3, 0], sizes = [9, 128], strides = [1, 1]} : vector<12x128xf32> to vector<9x128xf32>
    %146 = vector.broadcast %106 : vector<1x128xf32> to vector<9x128xf32>
    %147 = arith.subf %145, %146 : vector<9x128xf32>
    %148 = vector.extract_strided_slice %139 {offsets = [1, 0], sizes = [9, 128], strides = [1, 1]} : vector<12x128xf32> to vector<9x128xf32>
    %149 = arith.mulf %147, %148 : vector<9x128xf32>
    %150 = vector.extract_strided_slice %137 {offsets = [0, 0], sizes = [9, 128], strides = [1, 1]} : vector<10x128xf32> to vector<9x128xf32>
    %151 = arith.mulf %144, %150 : vector<9x128xf32>
    %152 = vector.extract_strided_slice %137 {offsets = [1, 0], sizes = [9, 128], strides = [1, 1]} : vector<10x128xf32> to vector<9x128xf32>
    %153 = arith.mulf %149, %152 : vector<9x128xf32>
    %154 = arith.addf %151, %153 : vector<9x128xf32>
    %155 = vector.extract_strided_slice %108 {offsets = [2, 0, 0], sizes = [1, 12, 128], strides = [1, 1, 1]} : vector<3x12x128xf32> to vector<1x12x128xf32>
    %156 = vector.shape_cast %155 : vector<1x12x128xf32> to vector<12x128xf32>
    %157 = vector.extract_strided_slice %107 {offsets = [0, 0], sizes = [8, 128], strides = [1, 1]} : vector<12x128xf32> to vector<8x128xf32>
    %158 = vector.broadcast %106 : vector<1x128xf32> to vector<8x128xf32>
    %159 = arith.subf %158, %157 : vector<8x128xf32>
    %160 = vector.extract_strided_slice %156 {offsets = [0, 0], sizes = [8, 128], strides = [1, 1]} : vector<12x128xf32> to vector<8x128xf32>
    %161 = arith.mulf %159, %160 : vector<8x128xf32>
    %162 = vector.extract_strided_slice %107 {offsets = [4, 0], sizes = [8, 128], strides = [1, 1]} : vector<12x128xf32> to vector<8x128xf32>
    %163 = vector.broadcast %106 : vector<1x128xf32> to vector<8x128xf32>
    %164 = arith.subf %162, %163 : vector<8x128xf32>
    %165 = vector.extract_strided_slice %156 {offsets = [1, 0], sizes = [8, 128], strides = [1, 1]} : vector<12x128xf32> to vector<8x128xf32>
    %166 = arith.mulf %164, %165 : vector<8x128xf32>
    %167 = vector.extract_strided_slice %154 {offsets = [0, 0], sizes = [8, 128], strides = [1, 1]} : vector<9x128xf32> to vector<8x128xf32>
    %168 = arith.mulf %161, %167 : vector<8x128xf32>
    %169 = vector.extract_strided_slice %154 {offsets = [1, 0], sizes = [8, 128], strides = [1, 1]} : vector<9x128xf32> to vector<8x128xf32>
    %170 = arith.mulf %166, %169 : vector<8x128xf32>
    %171 = arith.addf %168, %170 : vector<8x128xf32>
    %cst_54 = arith.constant 0.000000e+00 : f32
    %172 = vector.broadcast %cst_54 : f32 to vector<1x128xf32>
    %173 = arith.subf %172, %106 : vector<1x128xf32>
    %174 = math.exp %173 : vector<1x128xf32>
    %cst_55 = arith.constant 1.000000e+00 : f32
    %175 = vector.broadcast %cst_55 : f32 to vector<1x128xf32>
    %176 = arith.addf %175, %174 : vector<1x128xf32>
    %cst_56 = arith.constant 1.000000e+00 : f32
    %177 = vector.broadcast %cst_56 : f32 to vector<1x128xf32>
    %178 = arith.divf %177, %176 : vector<1x128xf32>
    %179 = arith.mulf %106, %178 : vector<1x128xf32>
    %cst_57 = arith.constant dense<0.000000e+00> : vector<1x5xf32>
    %180 = tpu.matmul %179, %109, %cst_57 {dimension_numbers = #tpu.dot_dimension_numbers<[1], [1], [0], [0], [0, 0, 1, 0], [], []>} : vector<1x128xf32>, vector<5x128xf32>, vector<1x5xf32> -> vector<1x5xf32>
    %181 = vector.extract_strided_slice %171 {offsets = [0, 0], sizes = [1, 128], strides = [1, 1]} : vector<8x128xf32> to vector<1x128xf32>
    %182 = vector.extract_strided_slice %110 {offsets = [0, 0, 0], sizes = [1, 5, 128], strides = [1, 1, 1]} : vector<8x5x128xf32> to vector<1x5x128xf32>
    %183 = vector.shape_cast %182 : vector<1x5x128xf32> to vector<5x128xf32>
    %cst_58 = arith.constant dense<0.000000e+00> : vector<1x5xf32>
    %184 = tpu.matmul %181, %183, %cst_58 {dimension_numbers = #tpu.dot_dimension_numbers<[1], [1], [0], [0], [0, 0, 1, 0], [], []>} : vector<1x128xf32>, vector<5x128xf32>, vector<1x5xf32> -> vector<1x5xf32>
    %185 = arith.addf %180, %184 : vector<1x5xf32>
    %186 = vector.extract_strided_slice %171 {offsets = [1, 0], sizes = [1, 128], strides = [1, 1]} : vector<8x128xf32> to vector<1x128xf32>
    %187 = vector.extract_strided_slice %110 {offsets = [1, 0, 0], sizes = [1, 5, 128], strides = [1, 1, 1]} : vector<8x5x128xf32> to vector<1x5x128xf32>
    %188 = vector.shape_cast %187 : vector<1x5x128xf32> to vector<5x128xf32>
    %cst_59 = arith.constant dense<0.000000e+00> : vector<1x5xf32>
    %189 = tpu.matmul %186, %188, %cst_59 {dimension_numbers = #tpu.dot_dimension_numbers<[1], [1], [0], [0], [0, 0, 1, 0], [], []>} : vector<1x128xf32>, vector<5x128xf32>, vector<1x5xf32> -> vector<1x5xf32>
    %190 = arith.addf %185, %189 : vector<1x5xf32>
    %191 = vector.extract_strided_slice %171 {offsets = [2, 0], sizes = [1, 128], strides = [1, 1]} : vector<8x128xf32> to vector<1x128xf32>
    %192 = vector.extract_strided_slice %110 {offsets = [2, 0, 0], sizes = [1, 5, 128], strides = [1, 1, 1]} : vector<8x5x128xf32> to vector<1x5x128xf32>
    %193 = vector.shape_cast %192 : vector<1x5x128xf32> to vector<5x128xf32>
    %cst_60 = arith.constant dense<0.000000e+00> : vector<1x5xf32>
    %194 = tpu.matmul %191, %193, %cst_60 {dimension_numbers = #tpu.dot_dimension_numbers<[1], [1], [0], [0], [0, 0, 1, 0], [], []>} : vector<1x128xf32>, vector<5x128xf32>, vector<1x5xf32> -> vector<1x5xf32>
    %195 = arith.addf %190, %194 : vector<1x5xf32>
    %196 = vector.extract_strided_slice %171 {offsets = [3, 0], sizes = [1, 128], strides = [1, 1]} : vector<8x128xf32> to vector<1x128xf32>
    %197 = vector.extract_strided_slice %110 {offsets = [3, 0, 0], sizes = [1, 5, 128], strides = [1, 1, 1]} : vector<8x5x128xf32> to vector<1x5x128xf32>
    %198 = vector.shape_cast %197 : vector<1x5x128xf32> to vector<5x128xf32>
    %cst_61 = arith.constant dense<0.000000e+00> : vector<1x5xf32>
    %199 = tpu.matmul %196, %198, %cst_61 {dimension_numbers = #tpu.dot_dimension_numbers<[1], [1], [0], [0], [0, 0, 1, 0], [], []>} : vector<1x128xf32>, vector<5x128xf32>, vector<1x5xf32> -> vector<1x5xf32>
    %200 = arith.addf %195, %199 : vector<1x5xf32>
    %201 = vector.extract_strided_slice %171 {offsets = [4, 0], sizes = [1, 128], strides = [1, 1]} : vector<8x128xf32> to vector<1x128xf32>
    %202 = vector.extract_strided_slice %110 {offsets = [4, 0, 0], sizes = [1, 5, 128], strides = [1, 1, 1]} : vector<8x5x128xf32> to vector<1x5x128xf32>
    %203 = vector.shape_cast %202 : vector<1x5x128xf32> to vector<5x128xf32>
    %cst_62 = arith.constant dense<0.000000e+00> : vector<1x5xf32>
    %204 = tpu.matmul %201, %203, %cst_62 {dimension_numbers = #tpu.dot_dimension_numbers<[1], [1], [0], [0], [0, 0, 1, 0], [], []>} : vector<1x128xf32>, vector<5x128xf32>, vector<1x5xf32> -> vector<1x5xf32>
    %205 = arith.addf %200, %204 : vector<1x5xf32>
    %206 = vector.extract_strided_slice %171 {offsets = [5, 0], sizes = [1, 128], strides = [1, 1]} : vector<8x128xf32> to vector<1x128xf32>
    %207 = vector.extract_strided_slice %110 {offsets = [5, 0, 0], sizes = [1, 5, 128], strides = [1, 1, 1]} : vector<8x5x128xf32> to vector<1x5x128xf32>
    %208 = vector.shape_cast %207 : vector<1x5x128xf32> to vector<5x128xf32>
    %cst_63 = arith.constant dense<0.000000e+00> : vector<1x5xf32>
    %209 = tpu.matmul %206, %208, %cst_63 {dimension_numbers = #tpu.dot_dimension_numbers<[1], [1], [0], [0], [0, 0, 1, 0], [], []>} : vector<1x128xf32>, vector<5x128xf32>, vector<1x5xf32> -> vector<1x5xf32>
    %210 = arith.addf %205, %209 : vector<1x5xf32>
    %211 = vector.extract_strided_slice %171 {offsets = [6, 0], sizes = [1, 128], strides = [1, 1]} : vector<8x128xf32> to vector<1x128xf32>
    %212 = vector.extract_strided_slice %110 {offsets = [6, 0, 0], sizes = [1, 5, 128], strides = [1, 1, 1]} : vector<8x5x128xf32> to vector<1x5x128xf32>
    %213 = vector.shape_cast %212 : vector<1x5x128xf32> to vector<5x128xf32>
    %cst_64 = arith.constant dense<0.000000e+00> : vector<1x5xf32>
    %214 = tpu.matmul %211, %213, %cst_64 {dimension_numbers = #tpu.dot_dimension_numbers<[1], [1], [0], [0], [0, 0, 1, 0], [], []>} : vector<1x128xf32>, vector<5x128xf32>, vector<1x5xf32> -> vector<1x5xf32>
    %215 = arith.addf %210, %214 : vector<1x5xf32>
    %216 = vector.extract_strided_slice %171 {offsets = [7, 0], sizes = [1, 128], strides = [1, 1]} : vector<8x128xf32> to vector<1x128xf32>
    %217 = vector.extract_strided_slice %110 {offsets = [7, 0, 0], sizes = [1, 5, 128], strides = [1, 1, 1]} : vector<8x5x128xf32> to vector<1x5x128xf32>
    %218 = vector.shape_cast %217 : vector<1x5x128xf32> to vector<5x128xf32>
    %cst_65 = arith.constant dense<0.000000e+00> : vector<1x5xf32>
    %219 = tpu.matmul %216, %218, %cst_65 {dimension_numbers = #tpu.dot_dimension_numbers<[1], [1], [0], [0], [0, 0, 1, 0], [], []>} : vector<1x128xf32>, vector<5x128xf32>, vector<1x5xf32> -> vector<1x5xf32>
    %220 = arith.addf %215, %219 : vector<1x5xf32>
    %c0_66 = arith.constant 0 : index
    %c0_67 = arith.constant 0 : index
    %221 = vector.load %arg12[%c0_66, %c0_67] : memref<12x5xf32, #tpu.memory_space<vmem>>, vector<12x5xf32>
    %c0_68 = arith.constant 0 : index
    %c0_69 = arith.constant 0 : index
    %c0_70 = arith.constant 0 : index
    %222 = vector.load %arg13[%c0_68, %c0_69, %c0_70] : memref<3x12x5xf32, #tpu.memory_space<vmem>>, vector<3x12x5xf32>
    %c0_71 = arith.constant 0 : index
    %c0_72 = arith.constant 0 : index
    %223 = vector.load %arg14[%c0_71, %c0_72] : memref<3x5xf32, #tpu.memory_space<vmem>>, vector<3x5xf32>
    %c0_73 = arith.constant 0 : index
    %c0_74 = arith.constant 0 : index
    %c0_75 = arith.constant 0 : index
    %224 = vector.load %arg15[%c0_73, %c0_74, %c0_75] : memref<8x3x5xf32, #tpu.memory_space<vmem>>, vector<8x3x5xf32>
    %225 = vector.extract_strided_slice %221 {offsets = [0, 0], sizes = [11, 5], strides = [1, 1]} : vector<12x5xf32> to vector<11x5xf32>
    %226 = vector.broadcast %220 : vector<1x5xf32> to vector<11x5xf32>
    %227 = arith.cmpf oge, %226, %225 : vector<11x5xf32>
    %228 = vector.extract_strided_slice %221 {offsets = [1, 0], sizes = [11, 5], strides = [1, 1]} : vector<12x5xf32> to vector<11x5xf32>
    %229 = vector.broadcast %220 : vector<1x5xf32> to vector<11x5xf32>
    %230 = arith.cmpf olt, %229, %228 : vector<11x5xf32>
    %231 = arith.andi %227, %230 : vector<11x5xi1>
    %cst_76 = arith.constant 1.000000e+00 : f32
    %cst_77 = arith.constant 0.000000e+00 : f32
    %232 = vector.broadcast %cst_76 : f32 to vector<11x5xf32>
    %233 = vector.broadcast %cst_77 : f32 to vector<11x5xf32>
    %234 = arith.select %231, %232, %233 : vector<11x5xi1>, vector<11x5xf32>
    %235 = vector.extract_strided_slice %222 {offsets = [0, 0, 0], sizes = [1, 12, 5], strides = [1, 1, 1]} : vector<3x12x5xf32> to vector<1x12x5xf32>
    %236 = vector.shape_cast %235 : vector<1x12x5xf32> to vector<12x5xf32>
    %237 = vector.extract_strided_slice %221 {offsets = [0, 0], sizes = [10, 5], strides = [1, 1]} : vector<12x5xf32> to vector<10x5xf32>
    %238 = vector.broadcast %220 : vector<1x5xf32> to vector<10x5xf32>
    %239 = arith.subf %238, %237 : vector<10x5xf32>
    %240 = vector.extract_strided_slice %236 {offsets = [0, 0], sizes = [10, 5], strides = [1, 1]} : vector<12x5xf32> to vector<10x5xf32>
    %241 = arith.mulf %239, %240 : vector<10x5xf32>
    %242 = vector.extract_strided_slice %221 {offsets = [2, 0], sizes = [10, 5], strides = [1, 1]} : vector<12x5xf32> to vector<10x5xf32>
    %243 = vector.broadcast %220 : vector<1x5xf32> to vector<10x5xf32>
    %244 = arith.subf %242, %243 : vector<10x5xf32>
    %245 = vector.extract_strided_slice %236 {offsets = [1, 0], sizes = [10, 5], strides = [1, 1]} : vector<12x5xf32> to vector<10x5xf32>
    %246 = arith.mulf %244, %245 : vector<10x5xf32>
    %247 = vector.extract_strided_slice %234 {offsets = [0, 0], sizes = [10, 5], strides = [1, 1]} : vector<11x5xf32> to vector<10x5xf32>
    %248 = arith.mulf %241, %247 : vector<10x5xf32>
    %249 = vector.extract_strided_slice %234 {offsets = [1, 0], sizes = [10, 5], strides = [1, 1]} : vector<11x5xf32> to vector<10x5xf32>
    %250 = arith.mulf %246, %249 : vector<10x5xf32>
    %251 = arith.addf %248, %250 : vector<10x5xf32>
    %252 = vector.extract_strided_slice %222 {offsets = [1, 0, 0], sizes = [1, 12, 5], strides = [1, 1, 1]} : vector<3x12x5xf32> to vector<1x12x5xf32>
    %253 = vector.shape_cast %252 : vector<1x12x5xf32> to vector<12x5xf32>
    %254 = vector.extract_strided_slice %221 {offsets = [0, 0], sizes = [9, 5], strides = [1, 1]} : vector<12x5xf32> to vector<9x5xf32>
    %255 = vector.broadcast %220 : vector<1x5xf32> to vector<9x5xf32>
    %256 = arith.subf %255, %254 : vector<9x5xf32>
    %257 = vector.extract_strided_slice %253 {offsets = [0, 0], sizes = [9, 5], strides = [1, 1]} : vector<12x5xf32> to vector<9x5xf32>
    %258 = arith.mulf %256, %257 : vector<9x5xf32>
    %259 = vector.extract_strided_slice %221 {offsets = [3, 0], sizes = [9, 5], strides = [1, 1]} : vector<12x5xf32> to vector<9x5xf32>
    %260 = vector.broadcast %220 : vector<1x5xf32> to vector<9x5xf32>
    %261 = arith.subf %259, %260 : vector<9x5xf32>
    %262 = vector.extract_strided_slice %253 {offsets = [1, 0], sizes = [9, 5], strides = [1, 1]} : vector<12x5xf32> to vector<9x5xf32>
    %263 = arith.mulf %261, %262 : vector<9x5xf32>
    %264 = vector.extract_strided_slice %251 {offsets = [0, 0], sizes = [9, 5], strides = [1, 1]} : vector<10x5xf32> to vector<9x5xf32>
    %265 = arith.mulf %258, %264 : vector<9x5xf32>
    %266 = vector.extract_strided_slice %251 {offsets = [1, 0], sizes = [9, 5], strides = [1, 1]} : vector<10x5xf32> to vector<9x5xf32>
    %267 = arith.mulf %263, %266 : vector<9x5xf32>
    %268 = arith.addf %265, %267 : vector<9x5xf32>
    %269 = vector.extract_strided_slice %222 {offsets = [2, 0, 0], sizes = [1, 12, 5], strides = [1, 1, 1]} : vector<3x12x5xf32> to vector<1x12x5xf32>
    %270 = vector.shape_cast %269 : vector<1x12x5xf32> to vector<12x5xf32>
    %271 = vector.extract_strided_slice %221 {offsets = [0, 0], sizes = [8, 5], strides = [1, 1]} : vector<12x5xf32> to vector<8x5xf32>
    %272 = vector.broadcast %220 : vector<1x5xf32> to vector<8x5xf32>
    %273 = arith.subf %272, %271 : vector<8x5xf32>
    %274 = vector.extract_strided_slice %270 {offsets = [0, 0], sizes = [8, 5], strides = [1, 1]} : vector<12x5xf32> to vector<8x5xf32>
    %275 = arith.mulf %273, %274 : vector<8x5xf32>
    %276 = vector.extract_strided_slice %221 {offsets = [4, 0], sizes = [8, 5], strides = [1, 1]} : vector<12x5xf32> to vector<8x5xf32>
    %277 = vector.broadcast %220 : vector<1x5xf32> to vector<8x5xf32>
    %278 = arith.subf %276, %277 : vector<8x5xf32>
    %279 = vector.extract_strided_slice %270 {offsets = [1, 0], sizes = [8, 5], strides = [1, 1]} : vector<12x5xf32> to vector<8x5xf32>
    %280 = arith.mulf %278, %279 : vector<8x5xf32>
    %281 = vector.extract_strided_slice %268 {offsets = [0, 0], sizes = [8, 5], strides = [1, 1]} : vector<9x5xf32> to vector<8x5xf32>
    %282 = arith.mulf %275, %281 : vector<8x5xf32>
    %283 = vector.extract_strided_slice %268 {offsets = [1, 0], sizes = [8, 5], strides = [1, 1]} : vector<9x5xf32> to vector<8x5xf32>
    %284 = arith.mulf %280, %283 : vector<8x5xf32>
    %285 = arith.addf %282, %284 : vector<8x5xf32>
    %cst_78 = arith.constant 0.000000e+00 : f32
    %286 = vector.broadcast %cst_78 : f32 to vector<1x5xf32>
    %287 = arith.subf %286, %220 : vector<1x5xf32>
    %288 = math.exp %287 : vector<1x5xf32>
    %cst_79 = arith.constant 1.000000e+00 : f32
    %289 = vector.broadcast %cst_79 : f32 to vector<1x5xf32>
    %290 = arith.addf %289, %288 : vector<1x5xf32>
    %cst_80 = arith.constant 1.000000e+00 : f32
    %291 = vector.broadcast %cst_80 : f32 to vector<1x5xf32>
    %292 = arith.divf %291, %290 : vector<1x5xf32>
    %293 = arith.mulf %220, %292 : vector<1x5xf32>
    %cst_81 = arith.constant dense<0.000000e+00> : vector<1x3xf32>
    %294 = tpu.matmul %293, %223, %cst_81 {dimension_numbers = #tpu.dot_dimension_numbers<[1], [1], [0], [0], [0, 0, 1, 0], [], []>} : vector<1x5xf32>, vector<3x5xf32>, vector<1x3xf32> -> vector<1x3xf32>
    %295 = vector.extract_strided_slice %285 {offsets = [0, 0], sizes = [1, 5], strides = [1, 1]} : vector<8x5xf32> to vector<1x5xf32>
    %296 = vector.extract_strided_slice %224 {offsets = [0, 0, 0], sizes = [1, 3, 5], strides = [1, 1, 1]} : vector<8x3x5xf32> to vector<1x3x5xf32>
    %297 = vector.shape_cast %296 : vector<1x3x5xf32> to vector<3x5xf32>
    %cst_82 = arith.constant dense<0.000000e+00> : vector<1x3xf32>
    %298 = tpu.matmul %295, %297, %cst_82 {dimension_numbers = #tpu.dot_dimension_numbers<[1], [1], [0], [0], [0, 0, 1, 0], [], []>} : vector<1x5xf32>, vector<3x5xf32>, vector<1x3xf32> -> vector<1x3xf32>
    %299 = arith.addf %294, %298 : vector<1x3xf32>
    %300 = vector.extract_strided_slice %285 {offsets = [1, 0], sizes = [1, 5], strides = [1, 1]} : vector<8x5xf32> to vector<1x5xf32>
    %301 = vector.extract_strided_slice %224 {offsets = [1, 0, 0], sizes = [1, 3, 5], strides = [1, 1, 1]} : vector<8x3x5xf32> to vector<1x3x5xf32>
    %302 = vector.shape_cast %301 : vector<1x3x5xf32> to vector<3x5xf32>
    %cst_83 = arith.constant dense<0.000000e+00> : vector<1x3xf32>
    %303 = tpu.matmul %300, %302, %cst_83 {dimension_numbers = #tpu.dot_dimension_numbers<[1], [1], [0], [0], [0, 0, 1, 0], [], []>} : vector<1x5xf32>, vector<3x5xf32>, vector<1x3xf32> -> vector<1x3xf32>
    %304 = arith.addf %299, %303 : vector<1x3xf32>
    %305 = vector.extract_strided_slice %285 {offsets = [2, 0], sizes = [1, 5], strides = [1, 1]} : vector<8x5xf32> to vector<1x5xf32>
    %306 = vector.extract_strided_slice %224 {offsets = [2, 0, 0], sizes = [1, 3, 5], strides = [1, 1, 1]} : vector<8x3x5xf32> to vector<1x3x5xf32>
    %307 = vector.shape_cast %306 : vector<1x3x5xf32> to vector<3x5xf32>
    %cst_84 = arith.constant dense<0.000000e+00> : vector<1x3xf32>
    %308 = tpu.matmul %305, %307, %cst_84 {dimension_numbers = #tpu.dot_dimension_numbers<[1], [1], [0], [0], [0, 0, 1, 0], [], []>} : vector<1x5xf32>, vector<3x5xf32>, vector<1x3xf32> -> vector<1x3xf32>
    %309 = arith.addf %304, %308 : vector<1x3xf32>
    %310 = vector.extract_strided_slice %285 {offsets = [3, 0], sizes = [1, 5], strides = [1, 1]} : vector<8x5xf32> to vector<1x5xf32>
    %311 = vector.extract_strided_slice %224 {offsets = [3, 0, 0], sizes = [1, 3, 5], strides = [1, 1, 1]} : vector<8x3x5xf32> to vector<1x3x5xf32>
    %312 = vector.shape_cast %311 : vector<1x3x5xf32> to vector<3x5xf32>
    %cst_85 = arith.constant dense<0.000000e+00> : vector<1x3xf32>
    %313 = tpu.matmul %310, %312, %cst_85 {dimension_numbers = #tpu.dot_dimension_numbers<[1], [1], [0], [0], [0, 0, 1, 0], [], []>} : vector<1x5xf32>, vector<3x5xf32>, vector<1x3xf32> -> vector<1x3xf32>
    %314 = arith.addf %309, %313 : vector<1x3xf32>
    %315 = vector.extract_strided_slice %285 {offsets = [4, 0], sizes = [1, 5], strides = [1, 1]} : vector<8x5xf32> to vector<1x5xf32>
    %316 = vector.extract_strided_slice %224 {offsets = [4, 0, 0], sizes = [1, 3, 5], strides = [1, 1, 1]} : vector<8x3x5xf32> to vector<1x3x5xf32>
    %317 = vector.shape_cast %316 : vector<1x3x5xf32> to vector<3x5xf32>
    %cst_86 = arith.constant dense<0.000000e+00> : vector<1x3xf32>
    %318 = tpu.matmul %315, %317, %cst_86 {dimension_numbers = #tpu.dot_dimension_numbers<[1], [1], [0], [0], [0, 0, 1, 0], [], []>} : vector<1x5xf32>, vector<3x5xf32>, vector<1x3xf32> -> vector<1x3xf32>
    %319 = arith.addf %314, %318 : vector<1x3xf32>
    %320 = vector.extract_strided_slice %285 {offsets = [5, 0], sizes = [1, 5], strides = [1, 1]} : vector<8x5xf32> to vector<1x5xf32>
    %321 = vector.extract_strided_slice %224 {offsets = [5, 0, 0], sizes = [1, 3, 5], strides = [1, 1, 1]} : vector<8x3x5xf32> to vector<1x3x5xf32>
    %322 = vector.shape_cast %321 : vector<1x3x5xf32> to vector<3x5xf32>
    %cst_87 = arith.constant dense<0.000000e+00> : vector<1x3xf32>
    %323 = tpu.matmul %320, %322, %cst_87 {dimension_numbers = #tpu.dot_dimension_numbers<[1], [1], [0], [0], [0, 0, 1, 0], [], []>} : vector<1x5xf32>, vector<3x5xf32>, vector<1x3xf32> -> vector<1x3xf32>
    %324 = arith.addf %319, %323 : vector<1x3xf32>
    %325 = vector.extract_strided_slice %285 {offsets = [6, 0], sizes = [1, 5], strides = [1, 1]} : vector<8x5xf32> to vector<1x5xf32>
    %326 = vector.extract_strided_slice %224 {offsets = [6, 0, 0], sizes = [1, 3, 5], strides = [1, 1, 1]} : vector<8x3x5xf32> to vector<1x3x5xf32>
    %327 = vector.shape_cast %326 : vector<1x3x5xf32> to vector<3x5xf32>
    %cst_88 = arith.constant dense<0.000000e+00> : vector<1x3xf32>
    %328 = tpu.matmul %325, %327, %cst_88 {dimension_numbers = #tpu.dot_dimension_numbers<[1], [1], [0], [0], [0, 0, 1, 0], [], []>} : vector<1x5xf32>, vector<3x5xf32>, vector<1x3xf32> -> vector<1x3xf32>
    %329 = arith.addf %324, %328 : vector<1x3xf32>
    %330 = vector.extract_strided_slice %285 {offsets = [7, 0], sizes = [1, 5], strides = [1, 1]} : vector<8x5xf32> to vector<1x5xf32>
    %331 = vector.extract_strided_slice %224 {offsets = [7, 0, 0], sizes = [1, 3, 5], strides = [1, 1, 1]} : vector<8x3x5xf32> to vector<1x3x5xf32>
    %332 = vector.shape_cast %331 : vector<1x3x5xf32> to vector<3x5xf32>
    %cst_89 = arith.constant dense<0.000000e+00> : vector<1x3xf32>
    %333 = tpu.matmul %330, %332, %cst_89 {dimension_numbers = #tpu.dot_dimension_numbers<[1], [1], [0], [0], [0, 0, 1, 0], [], []>} : vector<1x5xf32>, vector<3x5xf32>, vector<1x3xf32> -> vector<1x3xf32>
    %334 = arith.addf %329, %333 : vector<1x3xf32>
    %c0_90 = arith.constant 0 : index
    %c0_91 = arith.constant 0 : index
    %c0_92 = arith.constant 0 : index
    %335 = vector.load %arg16[%c0_90, %c0_91, %c0_92] : memref<1x1x3xf32, #tpu.memory_space<vmem>>, vector<1x1x3xf32>
    %336 = vector.shape_cast %335 : vector<1x1x3xf32> to vector<1x3xf32>
    %337 = vector.shape_cast %334 : vector<1x3xf32> to vector<1x1x3xf32>
    tpu.vector_store %arg16[%c0_90, %c0_91, %c0_92], %337 {strides = array<i32>} : memref<1x1x3xf32, #tpu.memory_space<vmem>>, vector<1x1x3xf32>,
    return
  }
  func.func @transform_0(%arg0: i32) -> (i32, i32, i32) {
    %c0_i32 = arith.constant 0 : i32
    %c0_i32_0 = arith.constant 0 : i32
    %c0_i32_1 = arith.constant 0 : i32
    return %arg0, %c0_i32, %c0_i32_0 : i32, i32, i32
  }
  func.func @transform_1(%arg0: i32) -> (i32, i32) {
    %c0_i32 = arith.constant 0 : i32
    %c0_i32_0 = arith.constant 0 : i32
    %c0_i32_1 = arith.constant 0 : i32
    return %c0_i32, %c0_i32_0 : i32, i32
  }
  func.func @transform_2(%arg0: i32) -> (i32, i32) {
    %c0_i32 = arith.constant 0 : i32
    %c0_i32_0 = arith.constant 0 : i32
    %c0_i32_1 = arith.constant 0 : i32
    return %c0_i32, %c0_i32_0 : i32, i32
  }
  func.func @transform_3(%arg0: i32) -> (i32, i32, i32) {
    %c0_i32 = arith.constant 0 : i32
    %c0_i32_0 = arith.constant 0 : i32
    %c0_i32_1 = arith.constant 0 : i32
    %c0_i32_2 = arith.constant 0 : i32
    return %c0_i32, %c0_i32_0, %c0_i32_1 : i32, i32, i32
  }
  func.func @transform_4(%arg0: i32) -> (i32, i32) {
    %c0_i32 = arith.constant 0 : i32
    %c0_i32_0 = arith.constant 0 : i32
    %c0_i32_1 = arith.constant 0 : i32
    return %c0_i32, %c0_i32_0 : i32, i32
  }
  func.func @transform_5(%arg0: i32) -> (i32, i32, i32) {
    %c0_i32 = arith.constant 0 : i32
    %c0_i32_0 = arith.constant 0 : i32
    %c0_i32_1 = arith.constant 0 : i32
    %c0_i32_2 = arith.constant 0 : i32
    return %c0_i32, %c0_i32_0, %c0_i32_1 : i32, i32, i32
  }
  func.func @transform_6(%arg0: i32) -> (i32, i32) {
    %c0_i32 = arith.constant 0 : i32
    %c0_i32_0 = arith.constant 0 : i32
    %c0_i32_1 = arith.constant 0 : i32
    return %c0_i32, %c0_i32_0 : i32, i32
  }
  func.func @transform_7(%arg0: i32) -> (i32, i32) {
    %c0_i32 = arith.constant 0 : i32
    %c0_i32_0 = arith.constant 0 : i32
    %c0_i32_1 = arith.constant 0 : i32
    return %c0_i32, %c0_i32_0 : i32, i32
  }
  func.func @transform_8(%arg0: i32) -> (i32, i32, i32) {
    %c0_i32 = arith.constant 0 : i32
    %c0_i32_0 = arith.constant 0 : i32
    %c0_i32_1 = arith.constant 0 : i32
    %c0_i32_2 = arith.constant 0 : i32
    return %c0_i32, %c0_i32_0, %c0_i32_1 : i32, i32, i32
  }
  func.func @transform_9(%arg0: i32) -> (i32, i32) {
    %c0_i32 = arith.constant 0 : i32
    %c0_i32_0 = arith.constant 0 : i32
    %c0_i32_1 = arith.constant 0 : i32
    return %c0_i32, %c0_i32_0 : i32, i32
  }
  func.func @transform_10(%arg0: i32) -> (i32, i32, i32) {
    %c0_i32 = arith.constant 0 : i32
    %c0_i32_0 = arith.constant 0 : i32
    %c0_i32_1 = arith.constant 0 : i32
    %c0_i32_2 = arith.constant 0 : i32
    return %c0_i32, %c0_i32_0, %c0_i32_1 : i32, i32, i32
  }
  func.func @transform_11(%arg0: i32) -> (i32, i32) {
    %c0_i32 = arith.constant 0 : i32
    %c0_i32_0 = arith.constant 0 : i32
    %c0_i32_1 = arith.constant 0 : i32
    return %c0_i32, %c0_i32_0 : i32, i32
  }
  func.func @transform_12(%arg0: i32) -> (i32, i32, i32) {
    %c0_i32 = arith.constant 0 : i32
    %c0_i32_0 = arith.constant 0 : i32
    %c0_i32_1 = arith.constant 0 : i32
    %c0_i32_2 = arith.constant 0 : i32
    return %c0_i32, %c0_i32_0, %c0_i32_1 : i32, i32, i32
  }
  func.func @transform_13(%arg0: i32) -> (i32, i32) {
    %c0_i32 = arith.constant 0 : i32
    %c0_i32_0 = arith.constant 0 : i32
    %c0_i32_1 = arith.constant 0 : i32
    return %c0_i32, %c0_i32_0 : i32, i32
  }
  func.func @transform_14(%arg0: i32) -> (i32, i32, i32) {
    %c0_i32 = arith.constant 0 : i32
    %c0_i32_0 = arith.constant 0 : i32
    %c0_i32_1 = arith.constant 0 : i32
    %c0_i32_2 = arith.constant 0 : i32
    return %c0_i32, %c0_i32_0, %c0_i32_1 : i32, i32, i32
  }
  func.func @transform_15(%arg0: i32) -> (i32, i32, i32) {
    %c0_i32 = arith.constant 0 : i32
    %c0_i32_0 = arith.constant 0 : i32
    %c0_i32_1 = arith.constant 0 : i32
    return %arg0, %c0_i32, %c0_i32_0 : i32, i32, i32
  }
}

</mosaic_0001>

<bundles_post_ra>
// kernel: tpu_custom_call.1
= control target key start
LH: loop header
LB: loop body
LE: loop exit
PB: predicated region body
PF: predicated region fallthrough
CT: control target
= control target key end

     0   :  { %s6211_s0 = inlined_call_operand.vmem [shape: f32[2,64,1], index: 0, kind: input, shape index: {}]   ;;  %s6212_s1 = inlined_call_operand.vmem [shape: f32[8,128], index: 1, kind: input, shape index: {}]   ;;  %s6213_s2 = inlined_call_operand.vmem [shape: f32[1,128], index: 2, kind: input, shape index: {}]   ;;  %s6214_s3 = inlined_call_operand.hbm [shape: f32[5,128,256], index: 3, kind: input, shape index: {}]   ;;  %s6215_s4 = inlined_call_operand.vmem [shape: f32[1,256], index: 4, kind: input, shape index: {}]   ;;  %s6216_s5 = inlined_call_operand.hbm [shape: f32[3,256,128], index: 5, kind: input, shape index: {}]   ;;  %s6217_s6 = inlined_call_operand.vmem [shape: f32[1,128], index: 6, kind: input, shape index: {}]   ;;  %s6218_s7 = inlined_call_operand.vmem [shape: f32[12,128], index: 7, kind: input, shape index: {}]   ;;  %s6219_s8 = inlined_call_operand.vmem [shape: f32[3,12,128], index: 8, kind: input, shape index: {}]   ;;  %s6220_s9 = inlined_call_operand.vmem [shape: f32[5,128], index: 9, kind: input, shape index: {}]   ;;  %s6221_s10 = inlined_call_operand.vmem [shape: f32[8,5,128], index: 10, kind: input, shape index: {}]   ;;  %s6222_s11 = inlined_call_operand.vmem [shape: f32[12,5], index: 11, kind: input, shape index: {}]   ;;  %s6223_s12 = inlined_call_operand.vmem [shape: f32[3,12,5], index: 12, kind: input, shape index: {}]   ;;  %s6224_s13 = inlined_call_operand.vmem [shape: f32[3,5], index: 13, kind: input, shape index: {}]   ;;  %s6225_s14 = inlined_call_operand.vmem [shape: f32[8,3,5], index: 14, kind: input, shape index: {}]   ;;  %s6226_s15 = inlined_call_operand.hbm [shape: f32[2,1,3], index: 15, kind: output, shape index: {}]  }
   0x1   :  { %6255 = sst [smem:[#allocation19_spill]] %s6226_s15 }
   0x2   :  { %20 = vsyncpa [#allocation3], 0 }
   0x3   :  { %21 = vsyncpa [#allocation6], 0 }
   0x4   :  { %22 = vsyncpa [#allocation4], 0 }
   0x5   :  { %24 = vsyncpa [#allocation4 + $0x1], 0  ;;  %s5037_s18 = smov 0   ;;  %s5039_s19 = smov 0  }
   0x6   :  { %s5041_s20 = smov 0   ;;  %s5043_s21 = smov 0  }
   0x7 LB: > { %6256 = sst [smem:[#allocation11_spill]] %s4933_s18  ;;  %s5058_s22 = sadd.s32 4294967295, %s4945_s21   ;;  %s4945_s21 = sphi %s5043_s21, %s6329_s21   ;;  %s4941_s20 = sphi %s5041_s20, %s6332_s20   ;;  %s4937_s19 = sphi %s5039_s19, %s6331_s19   ;;  %s4933_s18 = sphi %s5037_s18, %s6330_s18  }
   0x8   : > { %6257 = sst [smem:[#allocation12_spill]] %s4937_s19  ;;  %s4080_s23 = sadd.s32 4294967294, %s4945_s21  }
   0x9   : > { %6258 = sst [smem:[#allocation13_spill]] %s4941_s20  ;;  %s5062_s24 = sadd.s32 1, %s4945_s21  }
   0xa   : > { %6259 = sst [smem:[#allocation14_spill]] %s4945_s21  ;;  %s357_s25 = sadd.s32 1, %s4941_s20 }
   0xb   : > { %6260 = sst [smem:[#allocation15_spill]] %s5062_s24  ;;  %s354_s26 = ssub.s32 %s4945_s21, %s5062_s24 }
   0xc   : > { %p367_p0 = scmp.ne.s32.totalorder %s4941_s20, %s4937_s19  ;;  %p355_p1 = scmp.eq.s32.totalorder %s354_s26, 0 }
   0xd   : > { %p368_p2 = scmp.eq.s32.totalorder %s5058_s22, 1  ;;  %p373_p3 = scmp.ne.s32.totalorder %s4937_s19, %s4933_s18 }
   0xe   : > { %p374_p4 = scmp.eq.s32.totalorder %s4080_s23, 1  ;;  %p4081_p7 = scmp.ge.s32.totalorder %s4945_s21, 1 }
   0xf   : > { %s5073_s27 = scalar_select %p355_p1, %s4941_s20, %s357_s25  }
  0x10   : > { %p5075_p5 = por %p368_p2, %p367_p0  ;;  %p5079_p6 = por %p374_p4, %p373_p3 }
  0x11   : > { %6261 = sst [smem:[#allocation16_spill]] %s5073_s27  ;;  %p381_p8 = scmp.lt.s32.totalorder %s4945_s21, 3 }
  0x12   : > { %s6262_s28 = scalar_select %p5075_p5, 1, 0 }
  0x13   : > { %s6264_s29 = scalar_select %p5079_p6, 1, 0 }
  0x14   : > { %6263 = sst [smem:[#allocation17_spill]] %s6262_s28  ;;  %p6233_p9 = scmp.eq.s32.totalorder %s5058_s22, 0 }
  0x15   : > { %6265 = sst [smem:[#allocation18_spill]] %s6264_s29  ;;  %p5086_p10 = pnand %p4081_p7, %p381_p8 }
  0x16   : > { %s4947_s16 = smov [#allocation2]   ;;  %s4948_s25 = smov [#allocation5]  }
  0x17   : > { %s6266_s30 = scalar_select %p5086_p10, 1, 0 }
  0x18   : > { %s399_s17 = sshll.u32 %s4947_s16, 4  ;;  %p4752_p11 = pneg %p5086_p10  ;;  %s400_s17 = int_to_ptr.vmem [resolvable:$true] %s399_s17 }
  0x19   : > { %s415_s26 = sshll.u32 %s4948_s25, 4  ;;  %s4819_s24 = scalar_lea.hbm %s6214_s3, 20480  ;;  %s5098_s26 = int_to_ptr.vmem [resolvable:$true] %s415_s26 }
  0x1a   : > { %p5094_p12 = pnand %p6233_p9, %p4752_p11  ;;  %p4820_p13 = scmp.ne.s32.totalorder %s6214_s3, %s4819_s24 }
  0x1b   : > { %p4826_p3 = scmp.lt.u32.totalorder %s4819_s24, %s6214_s3 }
  0x1c   : > { %p4821_p0 = pneg %p5094_p12 }
  0x1e   : > { %p4822_p1 = pnand %p4821_p0, %p4820_p13 }
  0x20   : > { %p4823_p2 = pneg %p4822_p1 }
  0x22   : > { %p4828_p4 = pnand %p4826_p3, %p4823_p2 }
  0x24   : > { %4831 = shalt.err (!%p4828_p4)
}
  0x25   : > { %s4832_s25 = scalar_lea.vmem %s400_s17, 20480  ;;  %p4840_p9 = scmp.lt.s32.totalorder %s400_s17, %s400_s17 }
  0x26   : > { %p4833_p7 = scmp.ne.s32.totalorder %s400_s17, %s4832_s25  ;;  %p4841_p6 = scmp.lt.s32.totalorder %s4832_s25, %s4832_s25 }
  0x28   : > { %p4835_p8 = pnand %p4833_p7, %p4821_p0  ;;  %p4842_p5 = por %p4841_p6, %p4840_p9 }
  0x2a   : > { %p4836_p11 = pneg %p4835_p8 }
  0x2c   : > { %p4843_p10 = pnand %p4842_p5, %p4836_p11 }
  0x2e   : > { %4846 = shalt.err (!%p4843_p10)
}
  0x2f   : > { %s4949_s20 = smov 256   ;;  %s4950_s27 = smov 16  }
  0x30   : > { %4755 = dma.hbm_to_vmem [thread:$0]  (!%p5094_p12), %s6214_s3, 20480, %s400_s17, [#allocation3], %s4949_s20, %s4949_s20, %s4950_s27  }
  0x31   : > { %s4847_s16 = scalar_lea.hbm %s6216_s5, 12288 }
  0x32   : > { %p4848_p13 = scmp.ne.s32.totalorder %s6216_s5, %s4847_s16  ;;  %p4854_p9 = scmp.lt.u32.totalorder %s4847_s16, %s6216_s5 }
  0x34   : > { %p4850_p5 = pnand %p4848_p13, %p4821_p0 }
  0x36   : > { %p4851_p6 = pneg %p4850_p5 }
  0x38   : > { %p4856_p10 = pnand %p4854_p9, %p4851_p6 }
  0x3a   : > { %4859 = shalt.err (!%p4856_p10)
}
  0x3b   : > { %s4860_s17 = scalar_lea.vmem %s5098_s26, 12288  ;;  %p4868_p4 = scmp.lt.s32.totalorder %s5098_s26, %s5098_s26 }
  0x3c   : > { %p4861_p1 = scmp.ne.s32.totalorder %s5098_s26, %s4860_s17  ;;  %p4869_p7 = scmp.lt.s32.totalorder %s4860_s17, %s4860_s17 }
  0x3e   : > { %p4863_p2 = pnand %p4861_p1, %p4821_p0  ;;  %p4870_p8 = por %p4869_p7, %p4868_p4 }
  0x40   : > { %p4864_p3 = pneg %p4863_p2 }
  0x42   : > { %p4871_p11 = pnand %p4870_p8, %p4864_p3 }
  0x44   : > { %4874 = shalt.err (!%p4871_p11)
}
  0x45   : > { %s4951_s15 = smov 128   ;;  %s4952_s19 = smov 8  }
  0x46   : > { %4758 = dma.hbm_to_vmem [thread:$0]  (!%p5094_p12), %s6216_s5, 12288, %s5098_s26, [#allocation6], %s4951_s15, %s4951_s15, %s4952_s19  }
  0x47   : > { %p6268_p13 = scmp.ne.s32.totalorder %s6266_s30, 0 }
  0x48   : > { %p6269_p0 = scmp.eq.s32.totalorder (!%p6268_p13), %s5058_s22, 0 }
  0x49   : > { %466 = sbr.rel (%p6268_p13) target bundleno = 1594 (0x63a), region = 80 }
  0x50   : > { %4920 = dma.done.wait (%p6269_p0), [#allocation3], 20480   ;;  %p6270_p5 = pmov %p6269_p0 }
  0x51   : > { %p6271_p6 = pmov %p6269_p0 }
  0x52   : > { %4922 = vsyncadd (%p6270_p5), [#allocation3], 4294946816 }
  0x53   : > { %4924 = dma.done.wait (%p6271_p6), [#allocation6], 12288   ;;  %p6272_p9 = pmov %p6269_p0 }
  0x54   : > { %p517_p10 = scmp.lt.s32.totalorder %s5058_s22, 1  ;;  %v6240_v0 = vmov 0   ;;  %v1004_v5 = vld [vmem:[#allocation2 + $0x108] sm:$0xff]  ;;  %v1006_v6 = vld [vmem:[#allocation2 + $0x118] sm:$0xff]  ;;  %v1003_v7 = vld [vmem:[#allocation2 + $0x100] sm:$0xff]  ;;  %v6243_v56 = vmov 0.0   ;;  %v571_v61 = vlaneseq }
  0x55   : > { %4926 = vsyncadd (%p6272_p9), [#allocation6], 4294955008  ;;  %4810 = vset.pattern.permute.xlu1 %v6240_v0  ;;  %4809 = vset.pattern.permute.xlu0 %v6240_v0  ;;  %v1005_v8 = vld [vmem:[#allocation2 + $0x110] sm:$0xff]  ;;  %v4399_v9 = vpack.c.bf16 %v1006_v6, %v1004_v5  ;;  %v1008_v11 = vld [vmem:[#allocation2 + $0x128] sm:$0xff]  ;;  %vm603_vm0 = vcmask 1046528   ;;  %vm655_vm1 = vcmask 1045504  }
  0x56   : > { %s518_s30 = scalar_select %p517_p10, %s5058_s22, 1  ;;  %v4401_v10 = vpack.c.bf16 %v1005_v8, %v1003_v7  ;;  %v1010_v12 = vld [vmem:[#allocation2 + $0x138] sm:$0xff]  ;;  %v1007_v13 = vld [vmem:[#allocation2 + $0x120] sm:$0xff]  ;;  %v1009_v14 = vld [vmem:[#allocation2 + $0x130] sm:$0xff]  ;;  %1126 = vmatprep.mubr.f32.mxu0 %v6243_v56  ;;  %v5165_v62 = vshrl.u32 %v571_v61, 7  ;;  %vm707_vm2 = vcmask 1044480  }
  0x57   : > { %4400 = vmatprep.subr.bf16.mxu0 %v4399_v9  ;;  %v4403_v17 = vpack.c.bf16 %v1010_v12, %v1008_v11  ;;  %v4405_v18 = vpack.c.bf16 %v1009_v14, %v1007_v13  ;;  %v1012_v21 = vld [vmem:[#allocation2 + $0x148] sm:$0xff]  ;;  %v1014_v22 = vld [vmem:[#allocation2 + $0x158] sm:$0xff]  ;;  %v1011_v24 = vld [vmem:[#allocation2 + $0x140] sm:$0xff]  ;;  %vm759_vm3 = vcmask 1043456   ;;  %vm811_vm4 = vcmask 1042432   ;;  %s6320_s26 = sld [smem:[#allocation12_spill]] }
  0x58   : > { %s4113_s23 = sshll.u32 %s518_s30, 6  ;;  %4402 = vmatpush1.bf16.msra.mxu0 %v4401_v10  ;;  %v4407_v23 = vpack.c.bf16 %v1014_v22, %v1012_v21  ;;  %v1013_v25 = vld [vmem:[#allocation2 + $0x150] sm:$0xff]  ;;  %v1016_v27 = vld [vmem:[#allocation2 + $0x168] sm:$0xff]  ;;  %v1018_v28 = vld [vmem:[#allocation2 + $0x178] sm:$0xff]  ;;  %v5168_v63 = vsub.s32 0, %v5165_v62  ;;  %v741_v5 = vsub.s32 4, %v5165_v62 }
  0x59   : > { %s521_s18 = scalar_lea.vmem %s6211_s0, %s4113_s23  ;;  %4404 = vmatprep.subr.bf16.mxu0 %v4403_v17  ;;  %v4409_v26 = vpack.c.bf16 %v1013_v25, %v1011_v24  ;;  %v4411_v29 = vpack.c.bf16 %v1018_v28, %v1016_v27  ;;  %v1015_v30 = vld [vmem:[#allocation2 + $0x160] sm:$0xff]  ;;  %v1017_v31 = vld [vmem:[#allocation2 + $0x170] sm:$0xff]  ;;  %v1020_v33 = vld [vmem:[#allocation2 + $0x188] sm:$0xff]  ;;  %v793_v6 = vsub.s32 5, %v5165_v62  ;;  %v845_v7 = vsub.s32 6, %v5165_v62  ;;  %s6321_s29 = sld [smem:[#allocation17_spill]] }
  0x5a   : > { %v524_v1 = vld [vmem:[%s521_s18 + $0x10] sm:$0xff]  ;;  %v522_v2 = vld [vmem:[%s521_s18] sm:$0xff]  ;;  %v525_v3 = vld [vmem:[%s521_s18 + $0x18] sm:$0xff]  ;;  %v4413_v32 = vpack.c.bf16 %v1017_v31, %v1015_v30  ;;  %v897_v8 = vsub.s32 7, %v5165_v62  ;;  %vm863_vm5 = vcmask 1041408   ;;  %vm915_vm6 = vcmask 1040384  }
  0x5b   : > { %543 = vperm.xlu1 %4810, %v524_v1   ;;  %533 = vperm.xlu0 %4809, %v522_v2   ;;  %v523_v4 = vld [vmem:[%s521_s18 + $0x8] sm:$0xff]  ;;  %v526_v16 = vld [vmem:[%s521_s18 + $0x20] sm:$0xff]  ;;  %v529_v19 = vld [vmem:[%s521_s18 + $0x38] sm:$0xff]  ;;  %v6242_v1 = vsub.s32 1, %v5165_v62  ;;  %vm6253_vm7 = vmmov 0   ;;  %s4110_s25 = sshll.u32 %s5058_s22, 4 }
  0x5c   : > { %v527_v15 = vld [vmem:[%s521_s18 + $0x28] sm:$0xff]  ;;  %v528_v20 = vld [vmem:[%s521_s18 + $0x30] sm:$0xff]  ;;  %4406 = vmatpush1.bf16.msra.mxu0 %v4405_v18  ;;  %v1022_v34 = vld [vmem:[#allocation2 + $0x198] sm:$0xff]  ;;  %s6322_s20 = sld [smem:[#allocation19_spill]]  ;;  %s4956_s22 = smov [#allocation7]  }
  0x5d   : > { %4408 = vmatprep.subr.bf16.mxu0 %v4407_v23  ;;  %v4415_v35 = vpack.c.bf16 %v1022_v34, %v1020_v33  ;;  %v1019_v36 = vld [vmem:[#allocation2 + $0x180] sm:$0xff]  ;;  %v1021_v37 = vld [vmem:[#allocation2 + $0x190] sm:$0xff]  ;;  %v1024_v39 = vld [vmem:[#allocation2 + $0x1a8] sm:$0xff]  ;;  %s515_s16 = sand.u32 1, %s6320_s26   ;;  %s4879_s26 = sshll.u32 %s4956_s22, 4  ;;  %s4880_s26 = int_to_ptr.vmem [resolvable:$false] %s4879_s26 }
  0x5e   : > { %v4417_v38 = vpack.c.bf16 %v1021_v37, %v1019_v36  ;;  %v1026_v40 = vld [vmem:[#allocation2 + $0x1b8] sm:$0xff]  ;;  %v1023_v42 = vld [vmem:[#allocation2 + $0x1a0] sm:$0xff]  ;;  %v1025_v43 = vld [vmem:[#allocation2 + $0x1b0] sm:$0xff]  ;;  %s516_s17 = scalar_lea.vmem [#allocation7], %s515_s16  ;;  %s3991_s27 = scalar_lea.sflag [#allocation4], %s515_s16 }
  0x5f   : > { %548 = vperm.xlu1 %4810, %v525_v3   ;;  %538 = vperm.xlu0 %4809, %v523_v4   ;;  %v4419_v41 = vpack.c.bf16 %v1026_v40, %v1024_v39  ;;  %v4421_v44 = vpack.c.bf16 %v1025_v43, %v1023_v42  ;;  %v1028_v45 = vld [vmem:[#allocation2 + $0x1c8] sm:$0xff]  ;;  %v1030_v46 = vld [vmem:[#allocation2 + $0x1d8] sm:$0xff]  ;;  %v1027_v48 = vld [vmem:[#allocation2 + $0x1c0] sm:$0xff]  ;;  %v637_v3 = vsub.s32 2, %v5165_v62  ;;  %v689_v4 = vsub.s32 3, %v5165_v62  ;;  %s4003_s15 = sshll.u32 %s516_s17, 4  ;;  %s6171_s15 = int_to_ptr.vmem [resolvable:$true] %s4003_s15 }
  0x60   : > { %4410 = vmatpush1.bf16.msra.mxu0 %v4409_v26  ;;  %v4423_v47 = vpack.c.bf16 %v1030_v46, %v1028_v45  ;;  %v1029_v49 = vld [vmem:[#allocation2 + $0x1d0] sm:$0xff]  ;;  %v1032_v51 = vld [vmem:[#allocation2 + $0x1e8] sm:$0xff]  ;;  %v1034_v52 = vld [vmem:[#allocation2 + $0x1f8] sm:$0xff]  ;;  %s4875_s18 = scalar_lea.vmem %s6171_s15, 16  ;;  %p6324_p1 = scmp.ne.s32.totalorder %s6321_s29, 0 }
  0x61   : > { %4412 = vmatprep.subr.bf16.mxu0 %v4411_v29  ;;  %v4425_v50 = vpack.c.bf16 %v1029_v49, %v1027_v48  ;;  %v1031_v53 = vld [vmem:[#allocation2 + $0x1e0] sm:$0xff]  ;;  %v4427_v54 = vpack.c.bf16 %v1034_v52, %v1032_v51  ;;  %v1033_v55 = vld [vmem:[#allocation2 + $0x1f0] sm:$0xff]  ;;  %v971_v57 = vld [vmem:[#allocation2 + $0x8] sm:$0xff]  ;;  %p4876_p12 = scmp.ne.s32.totalorder %s6171_s15, %s4875_s18  ;;  %s4881_s21 = scalar_lea.vmem %s4880_s26, 32 }
  0x62   : > { %v973_v58 = vld [vmem:[#allocation2 + $0x18] sm:$0xff]  ;;  %v4429_v59 = vpack.c.bf16 %v1033_v55, %v1031_v53  ;;  %v530_v2 = vld [vmem:[%s6212_s1] sm:$0xff]  ;;  %v5182_v10 = vld [vmem:[#allocation2 + $0x10] sm:$0xff]  ;;  %s6323_s30 = smov %s6322_s20  ;;  %s6169_s23 = scalar_lea.hbm %s6322_s20, %s4110_s25 }
  0x63   : > { %558 = vperm.xlu1 %4810, %v527_v15   ;;  %553 = vperm.xlu0 %4809, %v526_v16   ;;  %v4431_v60 = vpack.c.bf16 %v973_v58, %v971_v57  ;;  %v5180_v9 = vld [vmem:[#allocation2] sm:$0xff]  ;;  %v5184_v11 = vld [vmem:[#allocation2 + $0x28] sm:$0xff]  ;;  %v5186_v12 = vld [vmem:[#allocation2 + $0x38] sm:$0xff]  ;;  %v5189_v13 = vrot.slane %v530_v2, %v5168_v63  ;;  %v5193_v14 = vrot.slane %v530_v2, %v6242_v1  ;;  %p4877_p2 = pnand %p4876_p12, %p6324_p1  ;;  %p4882_p4 = scmp.lt.s32.totalorder %s6171_s15, %s4880_s26 }
  0x64   : > { %4414 = vmatpush1.bf16.msra.mxu0 %v4413_v32  ;;  %v5195_v15 = vrot.slane %v530_v2, %v637_v3  ;;  %v5197_v16 = vrot.slane %v530_v2, %v689_v4  ;;  %v5199_v17 = vrot.slane %v530_v2, %v741_v5  ;;  %v5201_v18 = vrot.slane %v530_v2, %v793_v6  ;;  %p4883_p7 = scmp.lt.s32.totalorder %s4881_s21, %s4875_s18 }
  0x65   : > { %4416 = vmatprep.subr.bf16.mxu0 %v4415_v35  ;;  %p4878_p3 = pneg %p4877_p2 }
  0x66   : > { %p4884_p8 = por %p4883_p7, %p4882_p4 }
  0x67   : > { %568 = vperm.xlu1 %4810, %v529_v19   ;;  %563 = vperm.xlu0 %4809, %v528_v20   ;;  %v5203_v19 = vrot.slane %v530_v2, %v845_v7  ;;  %v5205_v20 = vrot.slane %v530_v2, %v897_v8 }
  0x68   : > { %4418 = vmatpush1.bf16.msra.mxu0 %v4417_v38  ;;  %p4885_p11 = pnand %p4884_p8, %p4878_p3 }
  0x69   : > { %4420 = vmatprep.subr.bf16.mxu0 %v4419_v41 }
  0x6c   : > { %4422 = vmatpush1.bf16.msra.mxu0 %v4421_v44 }
  0x6d   : > { %4424 = vmatprep.subr.bf16.mxu0 %v4423_v47 }
  0x70   : > { %4426 = vmatpush1.bf16.msra.mxu0 %v4425_v50 }
  0x71   : > { %4428 = vmatprep.subr.bf16.mxu0 %v4427_v54 }
  0x74   : > { %4430 = vmatpush1.bf16.msra.mxu0 %v4429_v59 }
  0x75   : > { %4432 = vmatprep.subr.bf16.mxu0 %v4431_v60 }
  0xda   : > { %v544_v21 = vpop.permute.xlu1 %543  ;;  %v534_v22 = vpop.permute.xlu0 %533 }
  0xdb   : > { %v577_v25 = vmul.f32 %v5189_v13, %v544_v21  ;;  %v5213_v26 = vmul.f32 %v5193_v14, %v544_v21  ;;  %v5216_v27 = vmul.f32 %v5195_v15, %v544_v21  ;;  %v5219_v28 = vmul.f32 %v5197_v16, %v544_v21 }
  0xdc   : > { %v5222_v29 = vmul.f32 %v5199_v17, %v544_v21  ;;  %v5225_v30 = vmul.f32 %v5201_v18, %v544_v21  ;;  %v5228_v31 = vmul.f32 %v5203_v19, %v544_v21  ;;  %v5231_v32 = vmul.f32 %v5205_v20, %v544_v21 }
  0xdd   : > { %v607_v33 = vrot.slane %v5213_v26, 1  ;;  %v659_v34 = vrot.slane %v5216_v27, 2  ;;  %v711_v35 = vrot.slane %v5219_v28, 3  ;;  %v575_v36 = vmul.f32 %v5189_v13, %v534_v22 }
  0xde   : > { %v763_v37 = vrot.slane %v5222_v29, 4  ;;  %v6250_v38 = vrot.slane %v5225_v30, 5  ;;  %v549_v41 = vpop.permute.xlu1 %548  ;;  %v587_v42 = vmul.f32 %v5193_v14, %v534_v22  ;;  %v639_v43 = vmul.f32 %v5195_v15, %v534_v22  ;;  %v539_v54 = vpop.permute.xlu0 %538 }
  0xdf   : > { %v691_v44 = vmul.f32 %v5197_v16, %v534_v22  ;;  %v743_v45 = vmul.f32 %v5199_v17, %v534_v22  ;;  %v5246_v46 = vmul.f32 %v5201_v18, %v534_v22  ;;  %v5249_v47 = vmul.f32 %v5203_v19, %v534_v22 }
  0xe0   : > { %v5252_v48 = vmul.f32 %v5205_v20, %v534_v22  ;;  %v5255_v49 = vmul.f32 %v5189_v13, %v549_v41  ;;  %v604_v50 = vrot.slane %v587_v42, 1  ;;  %v656_v51 = vrot.slane %v639_v43, 2 }
  0xe1   : > { %v708_v52 = vrot.slane %v691_v44, 3  ;;  %v760_v53 = vrot.slane %v743_v45, 4  ;;  %v812_v55 = vrot.slane %v5246_v46, 5  ;;  %v5261_v59 = vmul.f32 %v5193_v14, %v549_v41 }
  0xe2   : > { %v5264_v60 = vmul.f32 %v5195_v15, %v549_v41  ;;  %v5267_v61 = vmul.f32 %v5197_v16, %v549_v41  ;;  %v5270_v2 = vmul.f32 %v5199_v17, %v549_v41  ;;  %v5273_v3 = vmul.f32 %v5201_v18, %v549_v41 }
  0xe3   : > { %v6249_v4 = vrot.slane %v5261_v59, 1  ;;  %v5277_v5 = vmul.f32 %v5203_v19, %v549_v41  ;;  %v5280_v6 = vmul.f32 %v5205_v20, %v549_v41  ;;  %v576_v7 = vmul.f32 %v5189_v13, %v539_v54 }
  0xe4   : > { %v6248_v8 = vrot.slane %v5264_v60, 2  ;;  %v6247_v21 = vrot.slane %v5267_v61, 3  ;;  %v6246_v22 = vrot.slane %v5270_v2, 4  ;;  %v6245_v26 = vrot.slane %v5273_v3, 5 }
  0xe5   : > { %v610_v42 = vsel %vm603_vm0, %v607_v33, %v6249_v4  ;;  %v588_v41 = vmul.f32 %v5193_v14, %v539_v54  ;;  %v640_v24 = vmul.f32 %v5195_v15, %v539_v54  ;;  %v692_v56 = vmul.f32 %v5197_v16, %v539_v54 }
  0xe6   : > { %v629_v45 = vadd.f32 %v610_v42, %v577_v25  ;;  %v662_v46 = vsel %vm655_vm1, %v659_v34, %v6248_v8  ;;  %v714_v0 = vsel %vm707_vm2, %v711_v35, %v6247_v21  ;;  %v766_v1 = vsel %vm759_vm3, %v763_v37, %v6246_v22 }
  0xe7   : > { %v5313_v25 = vsel %vm811_vm4, %v6250_v38, %v6245_v26  ;;  %v605_v42 = vrot.slane %v588_v41, 1  ;;  %v744_v44 = vmul.f32 %v5199_v17, %v539_v54  ;;  %v796_v43 = vmul.f32 %v5201_v18, %v539_v54  ;;  %v559_v38 = vpop.permute.xlu1 %558 }
  0xe8   : > { %v681_v23 = vadd.f32 %v662_v46, %v629_v45  ;;  %v5320_v40 = vmul.f32 %v5203_v19, %v539_v54  ;;  %v657_v57 = vrot.slane %v640_v24, 2  ;;  %v709_v26 = vrot.slane %v692_v56, 3 }
  0xe9   : > { %v606_v58 = vsel %vm603_vm0, %v604_v50, %v605_v42  ;;  %v608_v39 = vsel %vm603_vm0, %v605_v42, %v607_v33  ;;  %v761_v8 = vrot.slane %v744_v44, 4  ;;  %v813_v27 = vrot.slane %v796_v43, 5 }
  0xea   : > { %v733_v22 = vadd.f32 %v714_v0, %v681_v23  ;;  %v627_v41 = vadd.f32 %v606_v58, %v575_v36  ;;  %v628_v21 = vadd.f32 %v608_v39, %v576_v7  ;;  %v658_v4 = vsel %vm655_vm1, %v656_v51, %v657_v57 }
  0xeb   : > { %v660_v45 = vsel %vm655_vm1, %v657_v57, %v659_v34  ;;  %v710_v46 = vsel %vm707_vm2, %v708_v52, %v709_v26  ;;  %v712_v50 = vsel %vm707_vm2, %v709_v26, %v711_v35  ;;  %v762_v23 = vsel %vm759_vm3, %v760_v53, %v761_v8 }
  0xec   : > { %v5332_v33 = vadd.f32 %v766_v1, %v733_v22  ;;  %v679_v56 = vadd.f32 %v658_v4, %v627_v41  ;;  %v680_v0 = vadd.f32 %v660_v45, %v628_v21  ;;  %v764_v24 = vsel %vm759_vm3, %v761_v8, %v763_v37 }
  0xed   : > { %v5340_v36 = vmul.f32 %v5205_v20, %v539_v54  ;;  %v5343_v35 = vmul.f32 %v5189_v13, %v559_v38  ;;  %v5346_v1 = vmul.f32 %v5193_v14, %v559_v38  ;;  %v5349_v51 = vsel %vm811_vm4, %v812_v55, %v813_v27  ;;  %v554_v54 = vpop.permute.xlu0 %553 }
  0xee   : > { %v731_v28 = vadd.f32 %v710_v46, %v679_v56  ;;  %v732_v39 = vadd.f32 %v712_v50, %v680_v0  ;;  %v6273_v29 = vrot.slane %v5225_v30, 5  ;;  %v5358_v53 = vmul.f32 %v5195_v15, %v559_v38 }
  0xef   : > { %v613_v4 = vrot.slane %v5346_v1, 1  ;;  %v5366_v55 = vmul.f32 %v5197_v16, %v559_v38  ;;  %v5370_v7 = vmul.f32 %v5199_v17, %v559_v38  ;;  %v5373_v8 = vmul.f32 %v5201_v18, %v559_v38 }
  0xf0   : > { %v5354_v37 = vsel %vm811_vm4, %v813_v27, %v6273_v29  ;;  %v5360_v57 = vadd.f32 %v762_v23, %v731_v28  ;;  %v5362_v58 = vadd.f32 %v764_v24, %v732_v39  ;;  %v6252_v30 = vrot.slane %v5358_v53, 2 }
  0xf1   : > { %v5376_v21 = vmul.f32 %v5203_v19, %v559_v38  ;;  %v6251_v22 = vrot.slane %v5366_v55, 3  ;;  %v5380_v26 = vmul.f32 %v5205_v20, %v559_v38  ;;  %v579_v43 = vmul.f32 %v5189_v13, %v554_v54 }
  0xf2   : > { %v591_v44 = vmul.f32 %v5193_v14, %v554_v54  ;;  %v643_v46 = vmul.f32 %v5195_v15, %v554_v54  ;;  %v695_v0 = vmul.f32 %v5197_v16, %v554_v54  ;;  %v747_v38 = vmul.f32 %v5199_v17, %v554_v54 }
  0xf3   : > { %v799_v24 = vmul.f32 %v5201_v18, %v554_v54  ;;  %v5393_v27 = vmul.f32 %v5203_v19, %v554_v54  ;;  %v5396_v28 = vmul.f32 %v5205_v20, %v554_v54  ;;  %v6274_v39 = vrot.slane %v5261_v59, 1  ;;  %v569_v59 = vpop.permute.xlu1 %568 }
  0xf4   : > { %v611_v56 = vrot.slane %v591_v44, 1  ;;  %v663_v23 = vrot.slane %v643_v46, 2  ;;  %v715_v52 = vrot.slane %v695_v0, 3  ;;  %v767_v50 = vrot.slane %v747_v38, 4 }
  0xf5   : > { %v6275_v34 = vrot.slane %v5264_v60, 2  ;;  %v6278_v60 = vrot.slane %v5370_v7, 4 }
  0xf6   : > { %v612_v29 = vsel %vm603_vm0, %v6274_v39, %v611_v56  ;;  %v614_v44 = vsel %vm603_vm0, %v611_v56, %v613_v4  ;;  %v666_v54 = vsel %vm655_vm1, %v663_v23, %v6252_v30  ;;  %v6276_v39 = vrot.slane %v5267_v61, 3 }
  0xf7   : > { %v630_v46 = vadd.f32 %v612_v29, %v5255_v49  ;;  %v631_v45 = vadd.f32 %v614_v44, %v579_v43  ;;  %v664_v41 = vsel %vm655_vm1, %v6275_v34, %v663_v23  ;;  %v718_v56 = vsel %vm707_vm2, %v715_v52, %v6251_v22 }
  0xf8   : > { %v716_v42 = vsel %vm707_vm2, %v6276_v39, %v715_v52  ;;  %v6277_v49 = vrot.slane %v5270_v2, 4  ;;  %v770_v34 = vsel %vm759_vm3, %v767_v50, %v6278_v60  ;;  %v819_v23 = vrot.slane %v799_v24, 5 }
  0xf9   : > { %v682_v0 = vadd.f32 %v664_v41, %v630_v46  ;;  %v683_v38 = vadd.f32 %v666_v54, %v631_v45  ;;  %v582_v44 = vmul.f32 %v5189_v13, %v569_v59  ;;  %v594_v39 = vmul.f32 %v5193_v14, %v569_v59 }
  0xfa   : > { %v768_v43 = vsel %vm759_vm3, %v6277_v49, %v767_v50  ;;  %v646_v52 = vmul.f32 %v5195_v15, %v569_v59  ;;  %v6279_v49 = vrot.slane %v5273_v3, 5  ;;  %v6280_v41 = vrot.slane %v5373_v8, 5 }
  0xfb   : > { %v734_v2 = vadd.f32 %v716_v42, %v682_v0  ;;  %v735_v22 = vadd.f32 %v718_v56, %v683_v38  ;;  %v617_v50 = vrot.slane %v594_v39, 1  ;;  %v5439_v46 = vmul.f32 %v5197_v16, %v569_v59  ;;  %v564_v42 = vpop.permute.xlu0 %563 }
  0xfc   : > { %v5431_v30 = vsel %vm811_vm4, %v6279_v49, %v819_v23  ;;  %v5436_v45 = vsel %vm811_vm4, %v819_v23, %v6280_v41  ;;  %v669_v24 = vrot.slane %v646_v52, 2  ;;  %v5442_v54 = vmul.f32 %v5199_v17, %v569_v59 }
  0xfd   : > { %v5444_v56 = vadd.f32 %v768_v43, %v734_v2  ;;  %v5446_v3 = vadd.f32 %v770_v34, %v735_v22  ;;  %v5449_v60 = vmul.f32 %v5201_v18, %v569_v59  ;;  %v5452_v0 = vmul.f32 %v5203_v19, %v569_v59 }
  0xfe   : > { %v634_v38 = vadd.f32 %v617_v50, %v582_v44  ;;  %v5457_v52 = vmul.f32 %v5205_v20, %v569_v59  ;;  %v581_v22 = vmul.f32 %v5189_v13, %v564_v42  ;;  %v593_v34 = vmul.f32 %v5193_v14, %v564_v42 }
  0xff   : > { %v645_v41 = vmul.f32 %v5195_v15, %v564_v42  ;;  %v697_v61 = vmul.f32 %v5197_v16, %v564_v42  ;;  %v749_v59 = vmul.f32 %v5199_v17, %v564_v42  ;;  %v801_v49 = vmul.f32 %v5201_v18, %v564_v42 }
 0x100   : > { %v5463_v2 = vadd.f32 %v669_v24, %v634_v38  ;;  %v929_v44 = vrot.slane %v5457_v52, 7  ;;  %v615_v29 = vrot.slane %v593_v34, 1  ;;  %v853_v43 = vmul.f32 %v5203_v19, %v564_v42 }
 0x101   : > { %v667_v39 = vrot.slane %v645_v41, 2  ;;  %v719_v23 = vrot.slane %v697_v61, 3  ;;  %v905_v13 = vmul.f32 %v5205_v20, %v564_v42  ;;  %v835_v14 = vadd.f32 %v5349_v51, %v5360_v57 }
 0x102   : > { %v616_v15 = vsel %vm603_vm0, %v613_v4, %v615_v29  ;;  %v618_v16 = vsel %vm603_vm0, %v615_v29, %v617_v50  ;;  %v771_v38 = vrot.slane %v749_v59, 4  ;;  %v823_v34 = vrot.slane %v801_v49, 5 }
 0x103   : > { %v632_v17 = vadd.f32 %v616_v15, %v5343_v35  ;;  %v633_v18 = vadd.f32 %v618_v16, %v581_v22  ;;  %v6281_v19 = vrot.slane %v5358_v53, 2  ;;  %v670_v20 = vsel %vm655_vm1, %v667_v39, %v669_v24 }
 0x104   : > { %v6282_v42 = vrot.slane %v5366_v55, 3  ;;  %v6283_v1 = vrot.slane %v5439_v46, 3  ;;  %v6284_v4 = vrot.slane %v5370_v7, 4  ;;  %v6285_v35 = vrot.slane %v5442_v54, 4 }
 0x105   : > { %v668_v61 = vsel %vm655_vm1, %v6281_v19, %v667_v39  ;;  %v685_v49 = vadd.f32 %v670_v20, %v633_v18  ;;  %v6286_v24 = vrot.slane %v5373_v8, 5  ;;  %v6287_v39 = vrot.slane %v5449_v60, 5 }
 0x106   : > { %v720_v51 = vsel %vm707_vm2, %v6282_v42, %v719_v23  ;;  %v722_v57 = vsel %vm707_vm2, %v719_v23, %v6283_v1  ;;  %v772_v29 = vsel %vm759_vm3, %v6284_v4, %v771_v38  ;;  %v774_v53 = vsel %vm759_vm3, %v771_v38, %v6285_v35  ;;  %v5533_v4 = vld [vmem:[%s6213_s2] ss:$0 sm:$0xff] }
 0x107   : > { %v684_v50 = vadd.f32 %v668_v61, %v632_v17  ;;  %v824_v55 = vsel %vm811_vm4, %v6286_v24, %v823_v34  ;;  %v826_v22 = vsel %vm811_vm4, %v823_v34, %v6287_v39  ;;  %v875_v41 = vrot.slane %v853_v43, 6 }
 0x108   : > { %v927_v23 = vrot.slane %v905_v13, 7  ;;  %v836_v7 = vadd.f32 %v5354_v37, %v5362_v58  ;;  %v6288_v59 = vrot.slane %v5320_v40, 6  ;;  %v6289_v15 = vrot.slane %v5249_v47, 6 }
 0x109   : > { %v736_v38 = vadd.f32 %v720_v51, %v684_v50  ;;  %v737_v17 = vadd.f32 %v722_v57, %v685_v49  ;;  %v6290_v8 = vrot.slane %v5228_v31, 6  ;;  %v6292_v43 = vrot.slane %v5376_v21, 6 }
 0x10a   : > { %v866_v16 = vsel %vm863_vm5, %v6289_v15, %v6288_v59  ;;  %v6291_v18 = vmov %v6288_v59  ;;  %v6293_v37 = vrot.slane %v5452_v0, 6  ;;  %v6294_v47 = vrot.slane %v5380_v26, 7  ;;  %v974_v26 = vld [vmem:[#allocation2 + $0x20] sm:$0xff] }
 0x10b   : > { %v868_v19 = vsel %vm863_vm5, %v6291_v18, %v6290_v8  ;;  %v887_v34 = vadd.f32 %v866_v16, %v835_v14  ;;  %v876_v13 = vsel %vm863_vm5, %v6292_v43, %v875_v41  ;;  %v930_v20 = vsel %vm915_vm6, %v927_v23, %v929_v44 }
 0x10c   : > { %v878_v58 = vsel %vm863_vm5, %v875_v41, %v6293_v37  ;;  %v928_v61 = vsel %vm915_vm6, %v6294_v47, %v927_v23  ;;  %v788_v40 = vadd.f32 %v772_v29, %v736_v38  ;;  %v789_v42 = vadd.f32 %v774_v53, %v737_v17 }
 0x10d   : > { %v888_v51 = vadd.f32 %v868_v19, %v836_v7  ;;  %v6295_v14 = vrot.slane %v5340_v36, 7  ;;  %v6296_v1 = vrot.slane %v5252_v48, 7  ;;  %v6297_v35 = vrot.slane %v5231_v32, 7 }
 0x10e   : > { %v837_v53 = vadd.f32 %v5313_v25, %v5332_v33  ;;  %v6299_v24 = vrot.slane %v5277_v5, 6  ;;  %v6300_v48 = vmov %v6290_v8  ;;  %v840_v41 = vadd.f32 %v824_v55, %v788_v40 }
 0x10f   : > { %v918_v57 = vsel %vm915_vm6, %v6296_v1, %v6295_v14  ;;  %v6298_v50 = vmov %v6295_v14  ;;  %v841_v23 = vadd.f32 %v826_v22, %v789_v42  ;;  %v6301_v59 = vrot.slane %v5280_v6, 7 }
 0x110   : > { %v920_v49 = vsel %vm915_vm6, %v6298_v50, %v6297_v35  ;;  %v939_v29 = vadd.f32 %v918_v57, %v887_v34  ;;  %v870_v39 = vsel %vm863_vm5, %v6300_v48, %v6299_v24  ;;  %v6302_v15 = vmov %v6297_v35 }
 0x111   : > { %v940_v7 = vadd.f32 %v920_v49, %v888_v51  ;;  %v922_v36 = vsel %vm915_vm6, %v6302_v15, %v6301_v59  ;;  %v889_v38 = vadd.f32 %v870_v39, %v837_v53  ;;  %v838_v25 = vadd.f32 %v5431_v30, %v5444_v56  ;;  %v979_v53 = vld [vmem:[#allocation2 + $0x48] sm:$0xff] }
 0x112   : > { %v954_v16 = vadd.f32 %v5533_v4, %v939_v29  ;;  %v6303_v33 = vrot.slane %v5393_v27, 6  ;;  %v6304_v31 = vmov %v6299_v24  ;;  %v892_v22 = vadd.f32 %v876_v13, %v840_v41  ;;  %v981_v24 = vld [vmem:[#allocation2 + $0x58] sm:$0xff] }
 0x113   : > { %v893_v17 = vadd.f32 %v878_v58, %v841_v23  ;;  %v955_v8 = vadd.f32 %v5533_v4, %v940_v7  ;;  %v6305_v32 = vrot.slane %v5396_v28, 7  ;;  %v6306_v18 = vmov %v6301_v59  ;;  %v976_v28 = vld [vmem:[#allocation2 + $0x30] sm:$0xff] }
 0x114   : > { %v872_v55 = vsel %vm863_vm5, %v6304_v31, %v6303_v33  ;;  %v5566_v34 = vmax.f32 %v954_v16, 0.0  ;;  %v941_v43 = vadd.f32 %v922_v36, %v889_v38  ;;  %v839_v56 = vadd.f32 %v5436_v45, %v5446_v3  ;;  %v980_v31 = vld [vmem:[#allocation2 + $0x50] sm:$0xff] }
 0x115   : > { %v924_v19 = vsel %vm915_vm6, %v6306_v18, %v6305_v32  ;;  %v890_v30 = vadd.f32 %v872_v55, %v838_v25  ;;  %v5570_v5 = vmax.f32 %v955_v8, 0.0  ;;  %v6307_v13 = vrot.slane %v5376_v21, 6  ;;  %v985_v8 = vld [vmem:[#allocation2 + $0x78] sm:$0xff] }
 0x116   : > { %v6308_v37 = vmov %v6303_v33  ;;  %v6309_v6 = vmov %v6305_v32  ;;  %v944_v42 = vadd.f32 %v928_v61, %v892_v22  ;;  %v1042_v51 = vrot.slane %v5566_v34, 1  ;;  %v978_v33 = vld [vmem:[#allocation2 + $0x40] sm:$0xff] }
 0x117   : > { %v874_v58 = vsel %vm863_vm5, %v6308_v37, %v6307_v13  ;;  %v926_v40 = vsel %vm915_vm6, %v6309_v6, %v6294_v47  ;;  %v956_v14 = vadd.f32 %v5533_v4, %v941_v43  ;;  %v942_v45 = vadd.f32 %v924_v19, %v890_v30  ;;  %v984_v13 = vld [vmem:[#allocation2 + $0x70] sm:$0xff]  ;;  %v987_v6 = vld [vmem:[#allocation2 + $0x88] sm:$0xff] }
 0x118   : > { %v891_v3 = vadd.f32 %v874_v58, %v839_v56  ;;  %v1043_v1 = vrot.slane %v5570_v5, 1  ;;  %v959_v21 = vadd.f32 %v5533_v4, %v944_v42  ;;  %v945_v27 = vadd.f32 %v930_v20, %v893_v17  ;;  %v983_v17 = vld [vmem:[#allocation2 + $0x68] sm:$0xff]  ;;  %v982_v56 = vld [vmem:[#allocation2 + $0x60] sm:$0xff] }
 0x119   : > { %v1309_v57 = vrot.slane %v5566_v34, 2  ;;  %v5587_v35 = vmax.f32 %v956_v14, 0.0  ;;  %v957_v50 = vadd.f32 %v5533_v4, %v942_v45  ;;  %v1310_v49 = vrot.slane %v5570_v5, 2 }
 0x11a   : > { %v943_v61 = vadd.f32 %v926_v40, %v891_v3  ;;  %v1044_v29 = vsel %vm603_vm0, %v1042_v51, %v1043_v1  ;;  %v960_v48 = vadd.f32 %v5533_v4, %v945_v27  ;;  %v6310_v7 = vpack.c.bf16 %v5182_v10, %v5180_v9  ;;  %v989_v40 = vld [vmem:[#allocation2 + $0x98] sm:$0xff]  ;;  %v986_v27 = vld [vmem:[#allocation2 + $0x80] sm:$0xff] }
 0x11b   : > { %1127 = vmatmul.mubr.f32.vlgmr.msra.gmra.mrb[0].mxu0 %v1044_v29  ;;  %v1045_v20 = vrot.slane %v5587_v35, 1  ;;  %v5594_v39 = vmax.f32 %v957_v50, 0.0  ;;  %v5598_v23 = vsel %vm655_vm1, %v1309_v57, %v1310_v49  ;;  %v6311_v59 = vmov 0.0   ;;  %v988_v57 = vld [vmem:[#allocation2 + $0x90] sm:$0xff] }
 0x11c   : > { %v958_v41 = vadd.f32 %v5533_v4, %v943_v61  ;;  %4434 = vmatpush1.bf16.msra.mxu0 %v6310_v7  ;;  %1132 = vmatprep.mubr.f32.mxu0 %v6311_v59  ;;  %v4437_v15 = vpack.c.bf16 %v976_v28, %v974_v26  ;;  %v5604_v36 = vmax.f32 %v959_v21, 0.0  ;;  %v1312_v16 = vrot.slane %v5587_v35, 2  ;;  %v991_v61 = vld [vmem:[#allocation2 + $0xa8] sm:$0xff]  ;;  %v992_v7 = vld [vmem:[#allocation2 + $0xb0] sm:$0xff] }
 0x11d   : > { %v6312_v38 = vpack.c.bf16 %v5186_v12, %v5184_v11  ;;  %v4439_v25 = vpack.c.bf16 %v981_v24, %v979_v53  ;;  %v1314_v22 = vrot.slane %v5594_v39, 2  ;;  %v1046_v9 = vsel %vm603_vm0, %v1043_v1, %v1045_v20  ;;  %v990_v24 = vld [vmem:[#allocation2 + $0xa0] sm:$0xff] }
 0x11e   : > { %v5610_v55 = vmax.f32 %v958_v41, 0.0  ;;  %v1047_v10 = vrot.slane %v5594_v39, 1  ;;  %v5615_v32 = vmax.f32 %v960_v48, 0.0  ;;  %v5618_v18 = vsel %vm655_vm1, %v1310_v49, %v1312_v16  ;;  %v993_v49 = vld [vmem:[#allocation2 + $0xb8] sm:$0xff] }
 0x11f   : > { %4436 = vmatprep.subr.bf16.mxu0 %v6312_v38  ;;  %1133 = vmatmul.mubr.f32.gmra.mrb[2].mxu0 %v1046_v9  ;;  %v5621_v11 = vsel %vm655_vm1, %v1312_v16, %v1314_v22  ;;  %v4441_v19 = vpack.c.bf16 %v980_v31, %v978_v33  ;;  %v1318_v43 = vrot.slane %v5604_v36, 2  ;;  %v4443_v30 = vpack.c.bf16 %v985_v8, %v983_v17  ;;  %v997_v16 = vld [vmem:[#allocation2 + $0xd8] sm:$0xff] }
 0x120   : > { %v1316_v12 = vrot.slane %v5610_v55, 2  ;;  %4438 = vmatpush1.bf16.msra.mxu0 %v4437_v15  ;;  %1138 = vmatprep.mubr.f32.mxu0 %v6311_v59  ;;  %v1048_v58 = vsel %vm603_vm0, %v1045_v20, %v1047_v10  ;;  %v1049_v47 = vrot.slane %v5610_v55, 1  ;;  %v1320_v51 = vrot.slane %v5615_v32, 2  ;;  %v995_v15 = vld [vmem:[#allocation2 + $0xc8] sm:$0xff] }
 0x121   : > { %4440 = vmatprep.subr.bf16.mxu0 %v4439_v25  ;;  %v4445_v14 = vpack.c.bf16 %v984_v13, %v982_v56  ;;  %v1483_v3 = vrot.slane %v5566_v34, 3  ;;  %v1484_v1 = vrot.slane %v5570_v5, 3  ;;  %v4447_v21 = vpack.c.bf16 %v989_v40, %v987_v6  ;;  %v994_v6 = vld [vmem:[#allocation2 + $0xc0] sm:$0xff]  ;;  %v996_v40 = vld [vmem:[#allocation2 + $0xd0] sm:$0xff] }
 0x122   : > { %v5627_v37 = vsel %vm655_vm1, %v1314_v22, %v1316_v12  ;;  %v5632_v42 = vsel %vm655_vm1, %v1316_v12, %v1318_v43  ;;  %v5639_v45 = vsel %vm655_vm1, %v1318_v43, %v1320_v51  ;;  %v1486_v26 = vrot.slane %v5587_v35, 3 }
 0x123   : > { %1139 = vmatmul.mubr.f32.gmra.mrb[4].mxu0 %v1048_v58  ;;  %v1050_v28 = vsel %vm603_vm0, %v1047_v10, %v1049_v47  ;;  %v1051_v50 = vrot.slane %v5604_v36, 1  ;;  %v5647_v29 = vsel %vm707_vm2, %v1483_v3, %v1484_v1  ;;  %v1488_v53 = vrot.slane %v5594_v39, 3 }
 0x124   : > { %4442 = vmatpush1.bf16.msra.mxu0 %v4441_v19  ;;  %1144 = vmatprep.mubr.f32.mxu0 %v6311_v59  ;;  %v5651_v48 = vsel %vm707_vm2, %v1484_v1, %v1486_v26  ;;  %v1490_v20 = vrot.slane %v5610_v55, 3  ;;  %v4449_v41 = vpack.c.bf16 %v988_v57, %v986_v27  ;;  %v1492_v25 = vrot.slane %v5604_v36, 3  ;;  %v999_v27 = vld [vmem:[#allocation2 + $0xe8] sm:$0xff]  ;;  %v1001_v57 = vld [vmem:[#allocation2 + $0xf8] sm:$0xff] }
 0x125   : > { %4444 = vmatprep.subr.bf16.mxu0 %v4443_v30  ;;  %v5656_v38 = vsel %vm707_vm2, %v1486_v26, %v1488_v53  ;;  %v4451_v33 = vpack.c.bf16 %v993_v49, %v991_v61  ;;  %v1053_v31 = vrot.slane %v5615_v32, 1  ;;  %v1494_v9 = vrot.slane %v5615_v32, 3 }
 0x126   : > { %v5661_v22 = vsel %vm707_vm2, %v1488_v53, %v1490_v20  ;;  %v1052_v10 = vsel %vm603_vm0, %v1049_v47, %v1051_v50  ;;  %v5666_v17 = vsel %vm707_vm2, %v1490_v20, %v1492_v25  ;;  %v4453_v8 = vpack.c.bf16 %v992_v7, %v990_v24  ;;  %v1000_v7 = vld [vmem:[#allocation2 + $0xf0] sm:$0xff] }
 0x127   : > { %1145 = vmatmul.mubr.f32.gmra.mrb[6].mxu0 %v1050_v28  ;;  %v4455_v12 = vpack.c.bf16 %v997_v16, %v995_v15  ;;  %v5671_v19 = vsel %vm707_vm2, %v1492_v25, %v1494_v9  ;;  %v1658_v43 = vrot.slane %v5566_v34, 4  ;;  %v1659_v30 = vrot.slane %v5570_v5, 4  ;;  %v1278_v25 = vld [vmem:[#allocation2 + $0x208] sm:$0xff] }
 0x128   : > { %4446 = vmatpush1.bf16.msra.mxu0 %v4445_v14  ;;  %1150 = vmatprep.mubr.f32.mxu0 %v6311_v59  ;;  %v1661_v56 = vrot.slane %v5587_v35, 4  ;;  %v1663_v13 = vrot.slane %v5594_v39, 4  ;;  %v1665_v58 = vrot.slane %v5610_v55, 4  ;;  %v1054_v47 = vsel %vm603_vm0, %v1051_v50, %v1053_v31 }
 0x129   : > { %4448 = vmatprep.subr.bf16.mxu0 %v4447_v21  ;;  %v1667_v14 = vrot.slane %v5604_v36, 4  ;;  %v1669_v3 = vrot.slane %v5615_v32, 4  ;;  %v6313_v1 = vrot.slane %v5439_v46, 3  ;;  %v5686_v26 = vsel %vm759_vm3, %v1658_v43, %v1659_v30  ;;  %v1279_v43 = vld [vmem:[#allocation2 + $0x210] sm:$0xff] }
 0x12a   : > { %v5689_v28 = vsel %vm759_vm3, %v1659_v30, %v1661_v56  ;;  %v5692_v50 = vsel %vm759_vm3, %v1661_v56, %v1663_v13  ;;  %v5695_v61 = vsel %vm759_vm3, %v1663_v13, %v1665_v58  ;;  %v4457_v24 = vpack.c.bf16 %v996_v40, %v994_v6  ;;  %v1890_v56 = vld [vmem:[#allocation5 + $0x180] sm:$0xff]  ;;  %v1892_v6 = vld [vmem:[#allocation5 + $0x190] sm:$0xff] }
 0x12b   : > { %1151 = vmatmul.mubr.f32.gmra.mrb[8].mxu0 %v1052_v10  ;;  %v738_v21 = vadd.f32 %v6313_v1, %v5463_v2  ;;  %v5698_v49 = vsel %vm759_vm3, %v1665_v58, %v1667_v14  ;;  %v5703_v46 = vsel %vm759_vm3, %v1667_v14, %v1669_v3  ;;  %v6314_v2 = vrot.slane %v5442_v54, 4  ;;  %v1277_v10 = vld [vmem:[#allocation2 + $0x200] sm:$0xff]  ;;  %v1282_v14 = vld [vmem:[#allocation2 + $0x228] sm:$0xff] }
 0x12c   : > { %4450 = vmatpush1.bf16.msra.mxu0 %v4449_v41  ;;  %1156 = vmatprep.mubr.f32.mxu0 %v6311_v59  ;;  %v4459_v20 = vpack.c.bf16 %v1001_v57, %v999_v27  ;;  %v998_v41 = vld [vmem:[#allocation2 + $0xe0] sm:$0xff]  ;;  %v6315_v15 = vrot.slane %v5449_v60, 5  ;;  %v6316_v30 = vrot.slane %v5452_v0, 6  ;;  %v1893_v60 = vld [vmem:[#allocation5 + $0x198] sm:$0xff] }
 0x12d   : > { %4452 = vmatprep.subr.bf16.mxu0 %v4451_v33  ;;  %v790_v53 = vadd.f32 %v6314_v2, %v738_v21  ;;  %v1280_v33 = vld [vmem:[#allocation2 + $0x218] sm:$0xff]  ;;  %v1874_v13 = vld [vmem:[#allocation5 + $0x100] sm:$0xff]  ;;  %v4461_v58 = vpack.c.bf16 %v1000_v7, %v998_v41  ;;  %v4563_v0 = vpack.c.bf16 %v1893_v60, %v1892_v6  ;;  %v1876_v21 = vld [vmem:[#allocation5 + $0x110] sm:$0xff]  ;;  %v4465_v7 = vpack.c.bf16 %v1279_v43, %v1277_v10 }
 0x12e   : > { %v4463_v40 = vpack.c.bf16 %v1280_v33, %v1278_v25  ;;  %v1877_v27 = vld [vmem:[#allocation5 + $0x118] sm:$0xff]  ;;  %v1894_v2 = vld [vmem:[#allocation5 + $0x1a0] sm:$0xff]  ;;  %v1286_v25 = vld [vmem:[#allocation2 + $0x248] sm:$0xff] }
 0x12f   : > { %1157 = vmatmul.mubr.f32.gmra.mrb[10].mxu0 %v1054_v47  ;;  %v842_v16 = vadd.f32 %v6315_v15, %v790_v53  ;;  %v1875_v47 = vld [vmem:[#allocation5 + $0x108] sm:$0xff]  ;;  %v1284_v57 = vld [vmem:[#allocation2 + $0x238] sm:$0xff]  ;;  %v4565_v41 = vpack.c.bf16 %v1877_v27, %v1876_v21  ;;  %v1880_v43 = vld [vmem:[#allocation5 + $0x130] sm:$0xff] }
 0x130   : > { %4454 = vmatpush1.bf16.msra.mxu0 %v4453_v8  ;;  %1162 = vmatprep.mubr.f32.mxu0 %v6311_v59  ;;  %v1891_v8 = vld [vmem:[#allocation5 + $0x188] sm:$0xff]  ;;  %v4561_v1 = vpack.c.bf16 %v1875_v47, %v1874_v13  ;;  %v4467_v52 = vpack.c.bf16 %v1284_v57, %v1282_v14  ;;  %v1285_v47 = vld [vmem:[#allocation2 + $0x240] sm:$0xff]  ;;  %v1287_v6 = vld [vmem:[#allocation2 + $0x250] sm:$0xff] }
 0x131   : > { %4456 = vmatprep.subr.bf16.mxu0 %v4455_v12  ;;  %v894_v54 = vadd.f32 %v6316_v30, %v842_v16  ;;  %v4559_v12 = vpack.c.bf16 %v1891_v8, %v1890_v56  ;;  %v1895_v53 = vld [vmem:[#allocation5 + $0x1a8] sm:$0xff]  ;;  %v1283_v16 = vld [vmem:[#allocation2 + $0x230] sm:$0xff]  ;;  %v1897_v8 = vld [vmem:[#allocation5 + $0x1b8] sm:$0xff]  ;;  %v4473_v21 = vpack.c.bf16 %v1287_v6, %v1285_v47 }
 0x132   : > { %v1879_v15 = vld [vmem:[#allocation5 + $0x128] sm:$0xff]  ;;  %v4567_v30 = vpack.c.bf16 %v1895_v53, %v1894_v2  ;;  %v1896_v56 = vld [vmem:[#allocation5 + $0x1b0] sm:$0xff]  ;;  %v1292_v14 = vld [vmem:[#allocation2 + $0x278] sm:$0xff] }
 0x133   : > { %1163 = vmatmul.mubr.f32.gmra.mrb[12].mxu0 %v1053_v31  ;;  %v946_v31 = vadd.f32 %v929_v44, %v894_v54  ;;  %4560 = vmatprep.subr.bf16.mxu1 %v4559_v12  ;;  %v1281_v44 = vld [vmem:[#allocation2 + $0x220] sm:$0xff]  ;;  %v1288_v54 = vld [vmem:[#allocation2 + $0x258] sm:$0xff]  ;;  %v1290_v60 = vld [vmem:[#allocation2 + $0x268] sm:$0xff] }
 0x134   : > { %4458 = vmatpush1.bf16.msra.mxu0 %v4457_v24  ;;  %1233 = vmatprep.mubr.f32.mxu0 %v6311_v59  ;;  %v4469_v10 = vpack.c.bf16 %v1283_v16, %v1281_v44  ;;  %v4471_v12 = vpack.c.bf16 %v1288_v54, %v1286_v25  ;;  %v1882_v27 = vld [vmem:[#allocation5 + $0x140] sm:$0xff]  ;;  %v1883_v57 = vld [vmem:[#allocation5 + $0x148] sm:$0xff]  ;;  %v4475_v2 = vpack.c.bf16 %v1292_v14, %v1290_v60  ;;  %v1295_v44 = vld [vmem:[#allocation2 + $0x290] sm:$0xff] }
 0x135   : > { %4460 = vmatprep.subr.bf16.mxu0 %v4459_v20  ;;  %v961_v24 = vadd.f32 %v5533_v4, %v946_v31  ;;  %4562 = vmatpush3.bf16.msra.mxu1 %v4561_v1  ;;  %v1878_v20 = vld [vmem:[#allocation5 + $0x120] sm:$0xff]  ;;  %v1899_v1 = vld [vmem:[#allocation5 + $0x1c8] sm:$0xff]  ;;  %v1300_v25 = vld [vmem:[#allocation2 + $0x2b8] sm:$0xff] }
 0x136   : > { %4564 = vmatprep.subr.bf16.mxu1 %v4563_v0  ;;  %v4569_v13 = vpack.c.bf16 %v1879_v15, %v1878_v20  ;;  %v1898_v31 = vld [vmem:[#allocation5 + $0x1c0] sm:$0xff]  ;;  %v1298_v16 = vld [vmem:[#allocation2 + $0x2a8] sm:$0xff]  ;;  %v1299_v54 = vld [vmem:[#allocation2 + $0x2b0] sm:$0xff] }
 0x137   : > { %v969_v33 = vmax.f32 %v961_v24, 0.0  ;;  %v1289_v53 = vld [vmem:[#allocation2 + $0x260] sm:$0xff]  ;;  %v4575_v24 = vpack.c.bf16 %v1899_v1, %v1898_v31  ;;  %v1452_v60 = vld [vmem:[#allocation2 + $0x308] sm:$0xff] }
 0x138   : > { %4462 = vmatpush1.bf16.msra.mxu0 %v4461_v58  ;;  %v1881_v58 = vld [vmem:[#allocation5 + $0x138] sm:$0xff]  ;;  %v1305_v6 = vld [vmem:[#allocation2 + $0x2e0] sm:$0xff] }
 0x139   : > { %4464 = vmatprep.subr.bf16.mxu0 %v4463_v40  ;;  %v1671_v4 = vrot.slane %v969_v33, 4  ;;  %4566 = vmatpush3.bf16.msra.mxu1 %v4565_v41  ;;  %v4573_v0 = vpack.c.bf16 %v1881_v58, %v1880_v43  ;;  %v1294_v41 = vld [vmem:[#allocation2 + $0x288] sm:$0xff]  ;;  %v4483_v33 = vpack.c.bf16 %v1300_v25, %v1298_v16  ;;  %v1308_v58 = vld [vmem:[#allocation2 + $0x2f8] sm:$0xff]  ;;  %v1451_v1 = vld [vmem:[#allocation2 + $0x300] sm:$0xff] }
 0x13a   : > { %4568 = vmatprep.subr.bf16.mxu1 %v4567_v30  ;;  %v1297_v30 = vld [vmem:[#allocation2 + $0x2a0] sm:$0xff]  ;;  %v1306_v43 = vld [vmem:[#allocation2 + $0x2e8] sm:$0xff] }
 0x13b   : > { %1234 = vmatmul.mubr.f32.vlgmr.msra.gmra.mrb[0].mxu0 %v5566_v34  ;;  %v5721_v40 = vsel %vm759_vm3, %v1669_v3, %v1671_v4  ;;  %v4571_v34 = vpack.c.bf16 %v1897_v8, %v1896_v56  ;;  %v1291_v3 = vld [vmem:[#allocation2 + $0x270] sm:$0xff]  ;;  %v1302_v56 = vld [vmem:[#allocation2 + $0x2c8] sm:$0xff]  ;;  %v1304_v8 = vld [vmem:[#allocation2 + $0x2d8] sm:$0xff]  ;;  %v4485_v4 = vpack.c.bf16 %v1299_v54, %v1297_v30  ;;  %v4491_v47 = vpack.c.bf16 %v1308_v58, %v1306_v43 }
 0x13c   : > { %4466 = vmatpush1.bf16.msra.mxu0 %v4465_v7  ;;  %1239 = vmatprep.mubr.f32.mxu0 %v6311_v59  ;;  %v1296_v7 = vld [vmem:[#allocation2 + $0x298] sm:$0xff]  ;;  %v4477_v20 = vpack.c.bf16 %v1291_v3, %v1289_v53  ;;  %v1457_v53 = vld [vmem:[#allocation2 + $0x330] sm:$0xff]  ;;  %v1460_v3 = vld [vmem:[#allocation2 + $0x348] sm:$0xff] }
 0x13d   : > { %4468 = vmatprep.subr.bf16.mxu0 %v4467_v52  ;;  %4570 = vmatpush3.bf16.msra.mxu1 %v4569_v13  ;;  %v4479_v15 = vpack.c.bf16 %v1296_v7, %v1294_v41  ;;  %v1293_v52 = vld [vmem:[#allocation2 + $0x280] sm:$0xff]  ;;  %v4487_v13 = vpack.c.bf16 %v1304_v8, %v1302_v56  ;;  %v1472_v8 = vld [vmem:[#allocation2 + $0x3a8] sm:$0xff]  ;;  %v1478_v58 = vld [vmem:[#allocation2 + $0x3d8] sm:$0xff] }
 0x13e   : > { %4572 = vmatprep.subr.bf16.mxu1 %v4571_v34  ;;  %v1454_v34 = vld [vmem:[#allocation2 + $0x318] sm:$0xff]  ;;  %v1463_v25 = vld [vmem:[#allocation2 + $0x360] sm:$0xff]  ;;  %v1476_v43 = vld [vmem:[#allocation2 + $0x3c8] sm:$0xff] }
 0x13f   : > { %1240 = vmatmul.mubr.f32.gmra.mrb[2].mxu0 %v5570_v5  ;;  %v4577_v5 = vpack.c.bf16 %v1883_v57, %v1882_v27  ;;  %v4495_v31 = vpack.c.bf16 %v1454_v34, %v1452_v60  ;;  %v1467_v56 = vld [vmem:[#allocation2 + $0x380] sm:$0xff]  ;;  %v1482_v60 = vld [vmem:[#allocation2 + $0x3f8] sm:$0xff] }
 0x140   : > { %4470 = vmatpush1.bf16.msra.mxu0 %v4469_v10  ;;  %1245 = vmatprep.mubr.f32.mxu0 %v6311_v59  ;;  %v1303_v10 = vld [vmem:[#allocation2 + $0x2d0] sm:$0xff] }
 0x141   : > { %4472 = vmatprep.subr.bf16.mxu0 %v4471_v12  ;;  %4574 = vmatpush3.bf16.msra.mxu1 %v4573_v0  ;;  %v1456_v0 = vld [vmem:[#allocation2 + $0x328] sm:$0xff] }
 0x142   : > { %4576 = vmatprep.subr.bf16.mxu1 %v4575_v24  ;;  %v1462_v24 = vld [vmem:[#allocation2 + $0x358] sm:$0xff] }
 0x143   : > { %1246 = vmatmul.mubr.f32.gmra.mrb[4].mxu0 %v5587_v35  ;;  %v4481_v35 = vpack.c.bf16 %v1295_v44, %v1293_v52  ;;  %v4503_v7 = vpack.c.bf16 %v1462_v24, %v1460_v3  ;;  %v1466_v52 = vld [vmem:[#allocation2 + $0x378] sm:$0xff]  ;;  %v1629_v24 = vld [vmem:[#allocation2 + $0x420] sm:$0xff] }
 0x144   : > { %4474 = vmatpush1.bf16.msra.mxu0 %v4473_v21  ;;  %1251 = vmatprep.mubr.f32.mxu0 %v6311_v59  ;;  %v1458_v21 = vld [vmem:[#allocation2 + $0x338] sm:$0xff] }
 0x145   : > { %4476 = vmatprep.subr.bf16.mxu0 %v4475_v2  ;;  %4578 = vmatpush3.bf16.msra.mxu1 %v4577_v5  ;;  %v4499_v57 = vpack.c.bf16 %v1458_v21, %v1456_v0  ;;  %v1455_v2 = vld [vmem:[#allocation2 + $0x320] sm:$0xff] }
 0x146   : > { %v4501_v41 = vpack.c.bf16 %v1457_v53, %v1455_v2  ;;  %v1459_v5 = vld [vmem:[#allocation2 + $0x340] sm:$0xff]  ;;  %v1632_v2 = vld [vmem:[#allocation2 + $0x438] sm:$0xff] }
 0x147   : > { %1252 = vmatmul.mubr.f32.gmra.mrb[6].mxu0 %v5594_v39  ;;  %v1301_v39 = vld [vmem:[#allocation2 + $0x2c0] sm:$0xff] }
 0x148   : > { %4478 = vmatpush1.bf16.msra.mxu0 %v4477_v20  ;;  %1257 = vmatprep.mubr.f32.mxu0 %v6311_v59  ;;  %v4489_v12 = vpack.c.bf16 %v1303_v10, %v1301_v39  ;;  %v1461_v20 = vld [vmem:[#allocation2 + $0x350] sm:$0xff]  ;;  %v1471_v10 = vld [vmem:[#allocation2 + $0x3a0] sm:$0xff] }
 0x149   : > { %4480 = vmatprep.subr.bf16.mxu0 %v4479_v15  ;;  %v1464_v15 = vld [vmem:[#allocation2 + $0x368] sm:$0xff]  ;;  %v4505_v44 = vpack.c.bf16 %v1461_v20, %v1459_v5  ;;  %v1636_v5 = vld [vmem:[#allocation2 + $0x458] sm:$0xff] }
 0x14a   : > { %v4507_v16 = vpack.c.bf16 %v1466_v52, %v1464_v15  ;;  %v1633_v15 = vld [vmem:[#allocation2 + $0x440] sm:$0xff]  ;;  %v1635_v52 = vld [vmem:[#allocation2 + $0x450] sm:$0xff] }
 0x14b   : > { %1258 = vmatmul.mubr.f32.gmra.mrb[8].mxu0 %v5610_v55  ;;  %v1307_v55 = vld [vmem:[#allocation2 + $0x2f0] sm:$0xff] }
 0x14c   : > { %4482 = vmatpush1.bf16.msra.mxu0 %v4481_v35  ;;  %1263 = vmatprep.mubr.f32.mxu0 %v6311_v59  ;;  %v4493_v14 = vpack.c.bf16 %v1307_v55, %v1305_v6  ;;  %v1468_v35 = vld [vmem:[#allocation2 + $0x388] sm:$0xff]  ;;  %v1475_v6 = vld [vmem:[#allocation2 + $0x3c0] sm:$0xff] }
 0x14d   : > { %4484 = vmatprep.subr.bf16.mxu0 %v4483_v33  ;;  %v1470_v33 = vld [vmem:[#allocation2 + $0x398] sm:$0xff]  ;;  %v1480_v55 = vld [vmem:[#allocation2 + $0x3e8] sm:$0xff] }
 0x14e   : > { %v4511_v54 = vpack.c.bf16 %v1470_v33, %v1468_v35  ;;  %v1637_v35 = vld [vmem:[#allocation2 + $0x460] sm:$0xff]  ;;  %v1642_v33 = vld [vmem:[#allocation2 + $0x488] sm:$0xff] }
 0x14f   : > { %1264 = vmatmul.mubr.f32.gmra.mrb[10].mxu0 %v5604_v36  ;;  %v1453_v36 = vld [vmem:[#allocation2 + $0x310] sm:$0xff] }
 0x150   : > { %4486 = vmatpush1.bf16.msra.mxu0 %v4485_v4  ;;  %1269 = vmatprep.mubr.f32.mxu0 %v6311_v59  ;;  %v4497_v27 = vpack.c.bf16 %v1453_v36, %v1451_v1  ;;  %v1474_v4 = vld [vmem:[#allocation2 + $0x3b8] sm:$0xff]  ;;  %v1626_v1 = vld [vmem:[#allocation2 + $0x408] sm:$0xff] }
 0x151   : > { %4488 = vmatprep.subr.bf16.mxu0 %v4487_v13  ;;  %v4515_v39 = vpack.c.bf16 %v1474_v4, %v1472_v8  ;;  %v1628_v36 = vld [vmem:[#allocation2 + $0x418] sm:$0xff]  ;;  %v1646_v8 = vld [vmem:[#allocation2 + $0x4a8] sm:$0xff] }
 0x152   : > { %v4527_v21 = vpack.c.bf16 %v1628_v36, %v1626_v1  ;;  %v1648_v4 = vld [vmem:[#allocation2 + $0x4b8] sm:$0xff]  ;;  %v1887_v1 = vld [vmem:[#allocation5 + $0x168] sm:$0xff] }
 0x153   : > { %1270 = vmatmul.mubr.f32.gmra.mrb[12].mxu0 %v5615_v32  ;;  %v1900_v32 = vld [vmem:[#allocation5 + $0x1d0] sm:$0xff] }
 0x154   : > { %4490 = vmatpush1.bf16.msra.mxu0 %v4489_v12  ;;  %1393 = vmatprep.mubr.f32.mxu0 %v6311_v59 }
 0x155   : > { %4492 = vmatprep.subr.bf16.mxu0 %v4491_v47  ;;  %v4519_v47 = vpack.c.bf16 %v1478_v58, %v1476_v43  ;;  %v1652_v43 = vld [vmem:[#allocation2 + $0x4d8] sm:$0xff] }
 0x158   : > { %4494 = vmatpush1.bf16.msra.mxu0 %v4493_v14  ;;  %v4523_v14 = vpack.c.bf16 %v1482_v60, %v1480_v55 }
 0x159   : > { %4496 = vmatprep.subr.bf16.mxu0 %v4495_v31  ;;  %v1479_v31 = vld [vmem:[#allocation2 + $0x3e0] sm:$0xff] }
 0x15b   : > { %1394 = vmatmul.mubr.f32.vlgmr.msra.gmra.mrb[0].mxu0 %v5598_v23  ;;  %v1465_v23 = vld [vmem:[#allocation2 + $0x370] sm:$0xff] }
 0x15c   : > { %4498 = vmatpush1.bf16.msra.mxu0 %v4497_v27  ;;  %1399 = vmatprep.mubr.f32.mxu0 %v6311_v59  ;;  %v4509_v30 = vpack.c.bf16 %v1465_v23, %v1463_v25  ;;  %v1627_v27 = vld [vmem:[#allocation2 + $0x410] sm:$0xff]  ;;  %v4537_v25 = vpack.c.bf16 %v1635_v52, %v1633_v15 }
 0x15d   : > { %4500 = vmatprep.subr.bf16.mxu0 %v4499_v57  ;;  %v1630_v57 = vld [vmem:[#allocation2 + $0x428] sm:$0xff] }
 0x15e   : > { %v4531_v3 = vpack.c.bf16 %v1632_v2, %v1630_v57  ;;  %v1857_v57 = vld [vmem:[#allocation5 + $0x80] sm:$0xff]  ;;  %v1858_v2 = vld [vmem:[#allocation5 + $0x88] sm:$0xff] }
 0x15f   : > { %1400 = vmatmul.mubr.f32.gmra.mrb[2].mxu0 %v5618_v18  ;;  %v1469_v18 = vld [vmem:[#allocation2 + $0x390] sm:$0xff] }
 0x160   : > { %4502 = vmatpush1.bf16.msra.mxu0 %v4501_v41  ;;  %1405 = vmatprep.mubr.f32.mxu0 %v6311_v59  ;;  %v4513_v13 = vpack.c.bf16 %v1469_v18, %v1467_v56  ;;  %v1631_v41 = vld [vmem:[#allocation2 + $0x430] sm:$0xff]  ;;  %v1641_v18 = vld [vmem:[#allocation2 + $0x480] sm:$0xff] }
 0x161   : > { %4504 = vmatprep.subr.bf16.mxu0 %v4503_v7  ;;  %v1634_v7 = vld [vmem:[#allocation2 + $0x448] sm:$0xff] }
 0x162   : > { %v4535_v20 = vpack.c.bf16 %v1636_v5, %v1634_v7 }
 0x163   : > { %1406 = vmatmul.mubr.f32.gmra.mrb[4].mxu0 %v5621_v11  ;;  %v1473_v11 = vld [vmem:[#allocation2 + $0x3b0] sm:$0xff] }
 0x164   : > { %4506 = vmatpush1.bf16.msra.mxu0 %v4505_v44  ;;  %1411 = vmatprep.mubr.f32.mxu0 %v6311_v59  ;;  %v4517_v12 = vpack.c.bf16 %v1473_v11, %v1471_v10  ;;  %v1638_v44 = vld [vmem:[#allocation2 + $0x468] sm:$0xff]  ;;  %v1645_v10 = vld [vmem:[#allocation2 + $0x4a0] sm:$0xff] }
 0x165   : > { %4508 = vmatprep.subr.bf16.mxu0 %v4507_v16  ;;  %v1640_v16 = vld [vmem:[#allocation2 + $0x478] sm:$0xff]  ;;  %v1650_v11 = vld [vmem:[#allocation2 + $0x4c8] sm:$0xff] }
 0x166   : > { %v4539_v23 = vpack.c.bf16 %v1640_v16, %v1638_v44 }
 0x167   : > { %1412 = vmatmul.mubr.f32.gmra.mrb[6].mxu0 %v5627_v37  ;;  %v1477_v37 = vld [vmem:[#allocation2 + $0x3d0] sm:$0xff] }
 0x168   : > { %4510 = vmatpush1.bf16.msra.mxu0 %v4509_v30  ;;  %1417 = vmatprep.mubr.f32.mxu0 %v6311_v59  ;;  %v4521_v34 = vpack.c.bf16 %v1477_v37, %v1475_v6  ;;  %v1644_v30 = vld [vmem:[#allocation2 + $0x498] sm:$0xff]  ;;  %v1654_v6 = vld [vmem:[#allocation2 + $0x4e8] sm:$0xff] }
 0x169   : > { %4512 = vmatprep.subr.bf16.mxu0 %v4511_v54  ;;  %v4543_v56 = vpack.c.bf16 %v1644_v30, %v1642_v33  ;;  %v1656_v37 = vld [vmem:[#allocation2 + $0x4f8] sm:$0xff] }
 0x16a   : > { %v4555_v60 = vpack.c.bf16 %v1656_v37, %v1654_v6 }
 0x16b   : > { %1418 = vmatmul.mubr.f32.gmra.mrb[8].mxu0 %v5632_v42  ;;  %v1481_v42 = vld [vmem:[#allocation2 + $0x3f0] sm:$0xff] }
 0x16c   : > { %4514 = vmatpush1.bf16.msra.mxu0 %v4513_v13  ;;  %1423 = vmatprep.mubr.f32.mxu0 %v6311_v59  ;;  %v4525_v0 = vpack.c.bf16 %v1481_v42, %v1479_v31  ;;  %v1903_v31 = vld [vmem:[#allocation5 + $0x1e8] sm:$0xff]  ;;  %v1886_v42 = vld [vmem:[#allocation5 + $0x160] sm:$0xff] }
 0x16d   : > { %4516 = vmatprep.subr.bf16.mxu0 %v4515_v39  ;;  %v4547_v39 = vpack.c.bf16 %v1648_v4, %v1646_v8  ;;  %v4585_v36 = vpack.c.bf16 %v1887_v1, %v1886_v42 }
 0x16f   : > { %1424 = vmatmul.mubr.f32.gmra.mrb[10].mxu0 %v5639_v45  ;;  %v1625_v45 = vld [vmem:[#allocation2 + $0x400] sm:$0xff] }
 0x170   : > { %4518 = vmatpush1.bf16.msra.mxu0 %v4517_v12  ;;  %1429 = vmatprep.mubr.f32.mxu0 %v6311_v59  ;;  %v4529_v53 = vpack.c.bf16 %v1627_v27, %v1625_v45  ;;  %v4551_v12 = vpack.c.bf16 %v1652_v43, %v1650_v11  ;;  %v1889_v45 = vld [vmem:[#allocation5 + $0x178] sm:$0xff] }
 0x171   : > { %4520 = vmatprep.subr.bf16.mxu0 %v4519_v47  ;;  %v1649_v47 = vld [vmem:[#allocation2 + $0x4c0] sm:$0xff] }
 0x173   : > { %1430 = vmatmul.mubr.f32.gmra.mrb[12].mxu0 %v1320_v51  ;;  %v4533_v51 = vpack.c.bf16 %v1631_v41, %v1629_v24  ;;  %v6317_v41 = vsub.s32 1, %v5165_v62 }
 0x174   : > { %4522 = vmatpush1.bf16.msra.mxu0 %v4521_v34  ;;  %1567 = vmatprep.mubr.f32.mxu0 %v6311_v59  ;;  %v1653_v34 = vld [vmem:[#allocation2 + $0x4e0] sm:$0xff] }
 0x175   : > { %4524 = vmatprep.subr.bf16.mxu0 %v4523_v14 }
 0x178   : > { %4526 = vmatpush1.bf16.msra.mxu0 %v4525_v0  ;;  %v1905_v0 = vld [vmem:[#allocation5 + $0x1f8] sm:$0xff] }
 0x179   : > { %4528 = vmatprep.subr.bf16.mxu0 %v4527_v21  ;;  %v1888_v21 = vld [vmem:[#allocation5 + $0x170] sm:$0xff] }
 0x17a   : > { %v4589_v27 = vpack.c.bf16 %v1889_v45, %v1888_v21 }
 0x17b   : > { %1568 = vmatmul.mubr.f32.vlgmr.msra.gmra.mrb[0].mxu0 %v5647_v29  ;;  %v1639_v29 = vld [vmem:[#allocation2 + $0x470] sm:$0xff] }
 0x17c   : > { %4530 = vmatpush1.bf16.msra.mxu0 %v4529_v53  ;;  %1573 = vmatprep.mubr.f32.mxu0 %v6311_v59  ;;  %v4541_v54 = vpack.c.bf16 %v1639_v29, %v1637_v35  ;;  %v4591_v53 = vpack.c.bf16 %v1858_v2, %v1857_v57  ;;  %v1845_v2 = vld [vmem:[#allocation5 + $0x20] sm:$0xff] }
 0x17d   : > { %4532 = vmatprep.subr.bf16.mxu0 %v4531_v3  ;;  %v1801_v3 = vld [vmem:[%s6215_s4] sm:$0x3] }
 0x17e   : > { %v5783_v24 = vrot.slane %v1801_v3, %v5168_v63  ;;  %v5787_v7 = vrot.slane %v1801_v3, %v6317_v41 }
 0x17f   : > { %1574 = vmatmul.mubr.f32.gmra.mrb[2].mxu0 %v5651_v48  ;;  %v1643_v48 = vld [vmem:[#allocation2 + $0x490] sm:$0xff] }
 0x180   : > { %4534 = vmatpush1.bf16.msra.mxu0 %v4533_v51  ;;  %1579 = vmatprep.mubr.f32.mxu0 %v6311_v59  ;;  %v4545_v13 = vpack.c.bf16 %v1643_v48, %v1641_v18  ;;  %v1842_v18 = vld [vmem:[#allocation5 + $0x8] sm:$0xff] }
 0x181   : > { %4536 = vmatprep.subr.bf16.mxu0 %v4535_v20 }
 0x183   : > { %1580 = vmatmul.mubr.f32.gmra.mrb[4].mxu0 %v5656_v38  ;;  %v1647_v38 = vld [vmem:[#allocation2 + $0x4b0] sm:$0xff] }
 0x184   : > { %4538 = vmatpush1.bf16.msra.mxu0 %v4537_v25  ;;  %1585 = vmatprep.mubr.f32.mxu0 %v6311_v59  ;;  %v4549_v58 = vpack.c.bf16 %v1647_v38, %v1645_v10  ;;  %v1859_v10 = vld [vmem:[#allocation5 + $0x90] sm:$0xff]  ;;  %v1860_v38 = vld [vmem:[#allocation5 + $0x98] sm:$0xff] }
 0x185   : > { %4540 = vmatprep.subr.bf16.mxu0 %v4539_v23 }
 0x187   : > { %1586 = vmatmul.mubr.f32.gmra.mrb[6].mxu0 %v5661_v22  ;;  %v1651_v22 = vld [vmem:[#allocation2 + $0x4d0] sm:$0xff] }
 0x188   : > { %4542 = vmatpush1.bf16.msra.mxu0 %v4541_v54  ;;  %1591 = vmatprep.mubr.f32.mxu0 %v6311_v59  ;;  %v4553_v55 = vpack.c.bf16 %v1651_v22, %v1649_v47 }
 0x189   : > { %4544 = vmatprep.subr.bf16.mxu0 %v4543_v56  ;;  %v1841_v56 = vld [vmem:[#allocation5] sm:$0xff] }
 0x18a   : > { %v4593_v6 = vpack.c.bf16 %v1842_v18, %v1841_v56 }
 0x18b   : > { %1592 = vmatmul.mubr.f32.gmra.mrb[8].mxu0 %v5666_v17  ;;  %v1655_v17 = vld [vmem:[#allocation2 + $0x4f0] sm:$0xff] }
 0x18c   : > { %4546 = vmatpush1.bf16.msra.mxu0 %v4545_v13  ;;  %1597 = vmatprep.mubr.f32.mxu0 %v6311_v59  ;;  %v4557_v14 = vpack.c.bf16 %v1655_v17, %v1653_v34  ;;  %v4595_v17 = vpack.c.bf16 %v1860_v38, %v1859_v10 }
 0x18d   : > { %4548 = vmatprep.subr.bf16.mxu0 %v4547_v39 }
 0x18f   : > { %1598 = vmatmul.mubr.f32.gmra.mrb[10].mxu0 %v5671_v19  ;;  %v1884_v19 = vld [vmem:[#allocation5 + $0x150] sm:$0xff] }
 0x190   : > { %4550 = vmatpush1.bf16.msra.mxu0 %v4549_v58  ;;  %1603 = vmatprep.mubr.f32.mxu0 %v6311_v59 }
 0x191   : > { %4552 = vmatprep.subr.bf16.mxu0 %v4551_v12 }
 0x193   : > { %1604 = vmatmul.mubr.f32.gmra.mrb[12].mxu0 %v1494_v9  ;;  %v1901_v9 = vld [vmem:[#allocation5 + $0x1d8] sm:$0xff] }
 0x194   : > { %4554 = vmatpush1.bf16.msra.mxu0 %v4553_v55  ;;  %1744 = vmatprep.mubr.f32.mxu0 %v6311_v59 }
 0x195   : > { %4556 = vmatprep.subr.bf16.mxu0 %v4555_v60 }
 0x198   : > { %4558 = vmatpush1.bf16.msra.mxu0 %v4557_v14  ;;  %v1843_v14 = vld [vmem:[#allocation5 + $0x10] sm:$0xff] }
 0x199   : > { %4309 = vmatprep.subr.mxu0 %v6311_v59 }
 0x19b   : > { %1745 = vmatmul.mubr.f32.vlgmr.msra.gmra.mrb[0].mxu0 %v5686_v26  ;;  %v4579_v26 = vpack.c.bf16 %v1901_v9, %v1900_v32  ;;  %v1844_v32 = vld [vmem:[#allocation5 + $0x18] sm:$0xff] }
 0x19c   : > { %1750 = vmatprep.mubr.f32.mxu0 %v6311_v59 }
 0x19d   : > { %4580 = vmatprep.subr.bf16.mxu1 %v4579_v26 }
 0x19f   : > { %1751 = vmatmul.mubr.f32.gmra.mrb[2].mxu0 %v5689_v28  ;;  %v1885_v28 = vld [vmem:[#allocation5 + $0x158] sm:$0xff] }
 0x1a0   : > { %1756 = vmatprep.mubr.f32.mxu0 %v6311_v59 }
 0x1a3   : > { %1757 = vmatmul.mubr.f32.gmra.mrb[4].mxu0 %v5692_v50  ;;  %v4581_v50 = vpack.c.bf16 %v1885_v28, %v1884_v19 }
 0x1a4   : > { %1762 = vmatprep.mubr.f32.mxu0 %v6311_v59 }
 0x1a5   : > { %4582 = vmatpush3.bf16.msra.mxu1 %v4581_v50 }
 0x1a7   : > { %1763 = vmatmul.mubr.f32.gmra.mrb[6].mxu0 %v5695_v61  ;;  %v1902_v61 = vld [vmem:[#allocation5 + $0x1e0] sm:$0xff] }
 0x1a8   : > { %1768 = vmatprep.mubr.f32.mxu0 %v6311_v59 }
 0x1ab   : > { %1769 = vmatmul.mubr.f32.gmra.mrb[8].mxu0 %v5698_v49  ;;  %v4583_v49 = vpack.c.bf16 %v1903_v31, %v1902_v61  ;;  %v1861_v61 = vld [vmem:[#allocation5 + $0xa0] sm:$0xff]  ;;  %v1862_v31 = vld [vmem:[#allocation5 + $0xa8] sm:$0xff] }
 0x1ac   : > { %1774 = vmatprep.mubr.f32.mxu0 %v6311_v59  ;;  %v4599_v57 = vpack.c.bf16 %v1862_v31, %v1861_v61  ;;  %v1849_v31 = vld [vmem:[#allocation5 + $0x40] sm:$0xff] }
 0x1ad   : > { %4584 = vmatprep.subr.bf16.mxu1 %v4583_v49 }
 0x1ae   : > { %4586 = vmatpush3.bf16.msra.mxu1 %v4585_v36 }
 0x1af   : > { %1775 = vmatmul.mubr.f32.gmra.mrb[10].mxu0 %v5703_v46  ;;  %v1904_v46 = vld [vmem:[#allocation5 + $0x1f0] sm:$0xff] }
 0x1b0   : > { %1780 = vmatprep.mubr.f32.mxu0 %v6311_v59 }
 0x1b3   : > { %1781 = vmatmul.mubr.f32.gmra.mrb[12].mxu0 %v5721_v40  ;;  %v4587_v40 = vpack.c.bf16 %v1905_v0, %v1904_v46  ;;  %v4597_v0 = vpack.c.bf16 %v1844_v32, %v1843_v14 }
 0x1b4   : > { %4311 = vmatprep.mubr.msk.f32.mxu0 %vm6253_vm7, %v6311_v59 }
 0x1b5   : > { %4588 = vmatprep.subr.bf16.mxu1 %v4587_v40 }
 0x1b6   : > { %4590 = vmatpush3.bf16.msra.mxu1 %v4589_v27 }
 0x1b7   : > { %4592 = vmatprep.subr.bf16.mxu1 %v4591_v53  ;;  %v1846_v53 = vld [vmem:[#allocation5 + $0x28] sm:$0xff] }
 0x26e   : > { %v1746_v5 = vpop.f32.mrb[0].mxu0 }
 0x26f   : > { %v1813_v51 = vadd.f32 %v5783_v24, %v1746_v5  ;;  %v1748_v20 = vpop.f32.mrb[1].mxu0 }
 0x270   : > { %v1814_v15 = vadd.f32 %v5787_v7, %v1748_v20 }
 0x271   : > { %v5791_v52 = vmax.f32 %v1813_v51, 0.0 }
 0x272   : > { %v1752_v44 = vpop.f32.mrb[2].mxu0  ;;  %v5793_v16 = vmax.f32 %v1814_v15, 0.0  ;;  %v1863_v15 = vld [vmem:[#allocation5 + $0xb0] sm:$0xff] }
 0x273   : > { %v1815_v25 = vadd.f32 %v5783_v24, %v1752_v44  ;;  %v1754_v23 = vpop.f32.mrb[3].mxu0  ;;  %v1920_v62 = vrot.slane %v5791_v52, 1  ;;  %v2193_v33 = vrot.slane %v5791_v52, 2  ;;  %v1864_v44 = vld [vmem:[#allocation5 + $0xb8] sm:$0xff] }
 0x274   : > { %v1816_v35 = vadd.f32 %v5787_v7, %v1754_v23  ;;  %v2196_v48 = vrot.slane %v5793_v16, 2  ;;  %v1923_v58 = vrot.slane %v5793_v16, 1 }
 0x275   : > { %v5797_v29 = vmax.f32 %v1815_v25, 0.0 }
 0x276   : > { %v5801_v30 = vmax.f32 %v1816_v35, 0.0  ;;  %v1758_v54 = vpop.f32.mrb[4].mxu0 }
 0x277   : > { %v1921_v8 = vrot.slane %v5797_v29, 1  ;;  %v2194_v4 = vrot.slane %v5797_v29, 2  ;;  %v1817_v13 = vadd.f32 %v5783_v24, %v1758_v54  ;;  %v1760_v39 = vpop.f32.mrb[5].mxu0  ;;  %v4601_v54 = vpack.c.bf16 %v1846_v53, %v1845_v2 }
 0x278   : > { %v2197_v11 = vrot.slane %v5801_v30, 2  ;;  %v1818_v43 = vadd.f32 %v5787_v7, %v1760_v39  ;;  %v1924_v12 = vrot.slane %v5801_v30, 1  ;;  %v1848_v39 = vld [vmem:[#allocation5 + $0x38] sm:$0xff] }
 0x279   : > { %v5811_v47 = vmax.f32 %v1817_v13, 0.0  ;;  %v1922_v22 = vsel %vm603_vm0, %v1920_v62, %v1921_v8  ;;  %v5815_v37 = vsel %vm655_vm1, %v2193_v33, %v2194_v4  ;;  %v1847_v13 = vld [vmem:[#allocation5 + $0x30] sm:$0xff] }
 0x27a   : > { %v5817_v55 = vmax.f32 %v1818_v43, 0.0  ;;  %v1764_v60 = vpop.f32.mrb[6].mxu0  ;;  %v1925_v34 = vsel %vm603_vm0, %v1923_v58, %v1924_v12  ;;  %v5821_v9 = vsel %vm655_vm1, %v2196_v48, %v2197_v11  ;;  %v4605_v32 = vpack.c.bf16 %v1848_v39, %v1847_v13 }
 0x27b   : > { %v1926_v19 = vrot.slane %v5811_v47, 1  ;;  %v2199_v26 = vrot.slane %v5811_v47, 2  ;;  %v1819_v28 = vadd.f32 %v5783_v24, %v1764_v60  ;;  %v1766_v50 = vpop.f32.mrb[7].mxu0  ;;  %2024 = vmatprep.mubr.f32.mxu1 %v1925_v34 }
 0x27c   : > { %v1928_v42 = vrot.slane %v5817_v55, 1  ;;  %v2201_v49 = vrot.slane %v5817_v55, 2  ;;  %v1820_v1 = vadd.f32 %v5787_v7, %v1766_v50  ;;  %2025 = vmatmul.mubr.f32.vlgmr.msra.gmra.mrb[0].mxu1 %v1922_v22  ;;  %v1866_v22 = vld [vmem:[#allocation5 + $0xc8] sm:$0xff] }
 0x27d   : > { %v5829_v36 = vmax.f32 %v1819_v28, 0.0  ;;  %4594 = vmatpush3.bf16.msra.mxu1 %v4593_v6  ;;  %v1927_v46 = vsel %vm603_vm0, %v1921_v8, %v1926_v19  ;;  %v5833_v21 = vsel %vm655_vm1, %v2194_v4, %v2199_v26  ;;  %v4603_v4 = vpack.c.bf16 %v1864_v44, %v1863_v15 }
 0x27e   : > { %v5835_v40 = vmax.f32 %v1820_v1, 0.0  ;;  %v1770_v45 = vpop.f32.mrb[8].mxu0  ;;  %v1929_v27 = vsel %vm603_vm0, %v1924_v12, %v1928_v42  ;;  %4596 = vmatprep.subr.bf16.mxu1 %v4595_v17  ;;  %v5839_v3 = vsel %vm655_vm1, %v2197_v11, %v2201_v49  ;;  %v1865_v12 = vld [vmem:[#allocation5 + $0xc0] sm:$0xff] }
 0x27f   : > { %v1930_v41 = vrot.slane %v5829_v36, 1  ;;  %v2203_v5 = vrot.slane %v5829_v36, 2  ;;  %v1821_v51 = vadd.f32 %v5783_v24, %v1770_v45  ;;  %v1772_v20 = vpop.f32.mrb[9].mxu0  ;;  %2029 = vmatprep.mubr.f32.mxu1 %v1929_v27  ;;  %v4607_v61 = vpack.c.bf16 %v1866_v22, %v1865_v12  ;;  %v1867_v27 = vld [vmem:[#allocation5 + $0xd0] sm:$0xff]  ;;  %v1853_v12 = vld [vmem:[#allocation5 + $0x60] sm:$0xff]  ;;  %v1854_v22 = vld [vmem:[#allocation5 + $0x68] sm:$0xff] }
 0x280   : > { %v1932_v25 = vrot.slane %v5835_v40, 1  ;;  %v2205_v23 = vrot.slane %v5835_v40, 2  ;;  %v1822_v35 = vadd.f32 %v5787_v7, %v1772_v20  ;;  %2030 = vmatmul.mubr.f32.gmra.mrb[2].mxu1 %v1927_v46 }
 0x281   : > { %v5847_v62 = vmax.f32 %v1821_v51, 0.0  ;;  %4598 = vmatpush3.bf16.msra.mxu1 %v4597_v0  ;;  %v1931_v33 = vsel %vm603_vm0, %v1926_v19, %v1930_v41  ;;  %v5851_v56 = vsel %vm655_vm1, %v2199_v26, %v2203_v5 }
 0x282   : > { %v5853_v18 = vmax.f32 %v1822_v35, 0.0  ;;  %v1776_v48 = vpop.f32.mrb[10].mxu0  ;;  %v1933_v8 = vsel %vm603_vm0, %v1928_v42, %v1932_v25  ;;  %4600 = vmatprep.subr.bf16.mxu1 %v4599_v57  ;;  %v5857_v10 = vsel %vm655_vm1, %v2201_v49, %v2205_v23  ;;  %v1850_v42 = vld [vmem:[#allocation5 + $0x48] sm:$0xff]  ;;  %v1868_v57 = vld [vmem:[#allocation5 + $0xd8] sm:$0xff] }
 0x283   : > { %v1934_v38 = vrot.slane %v5847_v62, 1  ;;  %v2207_v11 = vrot.slane %v5847_v62, 2  ;;  %v1823_v43 = vadd.f32 %v5783_v24, %v1776_v48  ;;  %v1778_v58 = vpop.f32.mrb[11].mxu0  ;;  %2034 = vmatprep.mubr.f32.mxu1 %v1933_v8  ;;  %v4609_v20 = vpack.c.bf16 %v1850_v42, %v1849_v31  ;;  %v1852_v35 = vld [vmem:[#allocation5 + $0x58] sm:$0xff]  ;;  %v1869_v48 = vld [vmem:[#allocation5 + $0xe0] sm:$0xff]  ;;  %v1870_v8 = vld [vmem:[#allocation5 + $0xe8] sm:$0xff] }
 0x284   : > { %v1936_v6 = vrot.slane %v5853_v18, 1  ;;  %v2209_v60 = vrot.slane %v5853_v18, 2  ;;  %v1824_v34 = vadd.f32 %v5787_v7, %v1778_v58  ;;  %2035 = vmatmul.mubr.f32.gmra.mrb[4].mxu1 %v1931_v33  ;;  %v4615_v58 = vpack.c.bf16 %v1870_v8, %v1869_v48  ;;  %v2178_v31 = vld [vmem:[#allocation5 + $0x288] sm:$0xff] }
 0x285   : > { %v5865_v17 = vmax.f32 %v1823_v43, 0.0  ;;  %4602 = vmatpush3.bf16.msra.mxu1 %v4601_v54  ;;  %v1935_v14 = vsel %vm603_vm0, %v1930_v41, %v1934_v38  ;;  %v5869_v19 = vsel %vm655_vm1, %v2203_v5, %v2207_v11 }
 0x286   : > { %v5871_v26 = vmax.f32 %v1824_v34, 0.0  ;;  %v1782_v28 = vpop.f32.mrb[12].mxu0  ;;  %v1937_v50 = vsel %vm603_vm0, %v1932_v25, %v1936_v6  ;;  %4604 = vmatprep.subr.bf16.mxu1 %v4603_v4  ;;  %v5875_v49 = vsel %vm655_vm1, %v2205_v23, %v2209_v60  ;;  %v4611_v25 = vpack.c.bf16 %v1868_v57, %v1867_v27  ;;  %v1851_v23 = vld [vmem:[#allocation5 + $0x50] sm:$0xff]  ;;  %v1872_v34 = vld [vmem:[#allocation5 + $0xf8] sm:$0xff] }
 0x287   : > { %v1938_v1 = vrot.slane %v5865_v17, 1  ;;  %v2211_v46 = vrot.slane %v5865_v17, 2  ;;  %v1825_v0 = vadd.f32 %v5783_v24, %v1782_v28  ;;  %v1784_v45 = vpop.f32.mrb[13].mxu0  ;;  %2039 = vmatprep.mubr.f32.mxu1 %v1937_v50  ;;  %v1855_v28 = vld [vmem:[#allocation5 + $0x70] sm:$0xff]  ;;  %v1856_v50 = vld [vmem:[#allocation5 + $0x78] sm:$0xff] }
 0x288   : > { %v1940_v2 = vrot.slane %v5871_v26, 1  ;;  %v2213_v53 = vrot.slane %v5871_v26, 2  ;;  %v1826_v41 = vadd.f32 %v5787_v7, %v1784_v45  ;;  %2040 = vmatmul.mubr.f32.gmra.mrb[6].mxu1 %v1935_v14  ;;  %v4617_v14 = vpack.c.bf16 %v1854_v22, %v1853_v12  ;;  %v2179_v45 = vld [vmem:[#allocation5 + $0x290] sm:$0xff]  ;;  %v2180_v27 = vld [vmem:[#allocation5 + $0x298] sm:$0xff] }
 0x289   : > { %v5883_v5 = vmax.f32 %v1825_v0, 0.0  ;;  %4606 = vmatpush3.bf16.msra.mxu1 %v4605_v32  ;;  %v1939_v51 = vsel %vm603_vm0, %v1934_v38, %v1938_v1  ;;  %v5887_v15 = vsel %vm655_vm1, %v2207_v11, %v2211_v46  ;;  %v4613_v38 = vpack.c.bf16 %v1852_v35, %v1851_v23  ;;  %v2162_v0 = vld [vmem:[#allocation5 + $0x208] sm:$0xff]  ;;  %v2183_v35 = vld [vmem:[#allocation5 + $0x2b0] sm:$0xff] }
 0x28a   : > { %v5889_v24 = vmax.f32 %v1826_v41, 0.0  ;;  %v1941_v44 = vsel %vm603_vm0, %v1936_v6, %v1940_v2  ;;  %4608 = vmatprep.subr.bf16.mxu1 %v4607_v61  ;;  %v5893_v7 = vsel %vm655_vm1, %v2209_v60, %v2213_v53  ;;  %v1871_v60 = vld [vmem:[#allocation5 + $0xf0] sm:$0xff]  ;;  %v2177_v61 = vld [vmem:[#allocation5 + $0x280] sm:$0xff]  ;;  %v4621_v42 = vpack.c.bf16 %v1856_v50, %v1855_v28  ;;  %v2164_v41 = vld [vmem:[#allocation5 + $0x218] sm:$0xff] }
 0x28b   : > { %v1942_v33 = vrot.slane %v5883_v5, 1  ;;  %v2215_v54 = vrot.slane %v5883_v5, 2  ;;  %2044 = vmatprep.mubr.f32.mxu1 %v1941_v44  ;;  %v4619_v32 = vpack.c.bf16 %v1872_v34, %v1871_v60  ;;  %v2166_v23 = vld [vmem:[#allocation5 + $0x228] sm:$0xff]  ;;  %v2187_v12 = vld [vmem:[#allocation5 + $0x2d0] sm:$0xff]  ;;  %v2173_v50 = vld [vmem:[#allocation5 + $0x260] sm:$0xff] }
 0x28c   : > { %v1944_v4 = vrot.slane %v5889_v24, 1  ;;  %v2217_v13 = vrot.slane %v5889_v24, 2  ;;  %2045 = vmatmul.mubr.f32.gmra.mrb[8].mxu1 %v1939_v51  ;;  %v2181_v51 = vld [vmem:[#allocation5 + $0x2a0] sm:$0xff]  ;;  %v2171_v34 = vld [vmem:[#allocation5 + $0x250] sm:$0xff] }
 0x28d   : > { %4610 = vmatpush3.bf16.msra.mxu1 %v4609_v20  ;;  %v1943_v39 = vsel %vm603_vm0, %v1938_v1, %v1942_v33  ;;  %v5903_v11 = vsel %vm655_vm1, %v2211_v46, %v2215_v54  ;;  %v4623_v1 = vpack.c.bf16 %v2178_v31, %v2177_v61  ;;  %v2161_v46 = vld [vmem:[#allocation5 + $0x200] sm:$0xff]  ;;  %v2182_v20 = vld [vmem:[#allocation5 + $0x2a8] sm:$0xff]  ;;  %v2191_v61 = vld [vmem:[#allocation5 + $0x2f0] sm:$0xff] }
 0x28e   : > { %v1945_v43 = vsel %vm603_vm0, %v1940_v2, %v1944_v4  ;;  %4612 = vmatprep.subr.bf16.mxu1 %v4611_v25  ;;  %v5909_v6 = vsel %vm655_vm1, %v2213_v53, %v2217_v13  ;;  %v4625_v57 = vpack.c.bf16 %v2162_v0, %v2161_v46  ;;  %v4627_v2 = vpack.c.bf16 %v2180_v27, %v2179_v45  ;;  %v2163_v53 = vld [vmem:[#allocation5 + $0x210] sm:$0xff]  ;;  %v2165_v25 = vld [vmem:[#allocation5 + $0x220] sm:$0xff] }
 0x28f   : > { %2049 = vmatprep.mubr.f32.mxu1 %v1945_v43  ;;  %v4631_v44 = vpack.c.bf16 %v2182_v20, %v2181_v51  ;;  %v4633_v48 = vpack.c.bf16 %v2166_v23, %v2165_v25 }
 0x290   : > { %2050 = vmatmul.mubr.f32.gmra.mrb[10].mxu1 %v1943_v39  ;;  %v2185_v39 = vld [vmem:[#allocation5 + $0x2c0] sm:$0xff] }
 0x291   : > { %4614 = vmatpush3.bf16.msra.mxu1 %v4613_v38  ;;  %2054 = vmatprep.mubr.f32.mxu1 %v1944_v4  ;;  %v2167_v4 = vld [vmem:[#allocation5 + $0x230] sm:$0xff] }
 0x292   : > { %4616 = vmatprep.subr.bf16.mxu1 %v4615_v58  ;;  %v2169_v58 = vld [vmem:[#allocation5 + $0x240] sm:$0xff] }
 0x294   : > { %2055 = vmatmul.mubr.f32.gmra.mrb[12].mxu1 %v1942_v33  ;;  %v2184_v33 = vld [vmem:[#allocation5 + $0x2b8] sm:$0xff] }
 0x295   : > { %4618 = vmatpush3.bf16.msra.mxu1 %v4617_v14  ;;  %2124 = vmatprep.mubr.f32.mxu1 %v5793_v16  ;;  %v4629_v16 = vpack.c.bf16 %v2164_v41, %v2163_v53  ;;  %v4635_v8 = vpack.c.bf16 %v2184_v33, %v2183_v35  ;;  %v2189_v14 = vld [vmem:[#allocation5 + $0x2e0] sm:$0xff] }
 0x296   : > { %4620 = vmatprep.subr.bf16.mxu1 %v4619_v32 }
 0x299   : > { %4622 = vmatpush3.bf16.msra.mxu1 %v4621_v42 }
 0x29a   : > { %4624 = vmatprep.subr.bf16.mxu1 %v4623_v1  ;;  %v2175_v1 = vld [vmem:[#allocation5 + $0x270] sm:$0xff] }
 0x29c   : > { %2125 = vmatmul.mubr.f32.vlgmr.msra.gmra.mrb[14].mxu1 %v5791_v52  ;;  %v2168_v52 = vld [vmem:[#allocation5 + $0x238] sm:$0xff] }
 0x29d   : > { %2129 = vmatprep.mubr.f32.mxu1 %v5801_v30  ;;  %4626 = vmatpush3.bf16.msra.mxu1 %v4625_v57  ;;  %v2186_v30 = vld [vmem:[#allocation5 + $0x2c8] sm:$0xff]  ;;  %v4637_v38 = vpack.c.bf16 %v2168_v52, %v2167_v4 }
 0x29e   : > { %4628 = vmatprep.subr.bf16.mxu1 %v4627_v2  ;;  %v4639_v43 = vpack.c.bf16 %v2186_v30, %v2185_v39 }
 0x2a0   : > { %2130 = vmatmul.mubr.f32.gmra.mrb[16].mxu1 %v5797_v29  ;;  %v2170_v29 = vld [vmem:[#allocation5 + $0x248] sm:$0xff] }
 0x2a1   : > { %2134 = vmatprep.mubr.f32.mxu1 %v5817_v55  ;;  %4630 = vmatpush3.bf16.msra.mxu1 %v4629_v16  ;;  %v2188_v55 = vld [vmem:[#allocation5 + $0x2d8] sm:$0xff]  ;;  %v4641_v22 = vpack.c.bf16 %v2170_v29, %v2169_v58 }
 0x2a2   : > { %4632 = vmatprep.subr.bf16.mxu1 %v4631_v44  ;;  %v4643_v60 = vpack.c.bf16 %v2188_v55, %v2187_v12 }
 0x2a4   : > { %2135 = vmatmul.mubr.f32.gmra.mrb[18].mxu1 %v5811_v47  ;;  %v2172_v47 = vld [vmem:[#allocation5 + $0x258] sm:$0xff] }
 0x2a5   : > { %2139 = vmatprep.mubr.f32.mxu1 %v5835_v40  ;;  %4634 = vmatpush3.bf16.msra.mxu1 %v4633_v48  ;;  %v2190_v40 = vld [vmem:[#allocation5 + $0x2e8] sm:$0xff]  ;;  %v4645_v32 = vpack.c.bf16 %v2172_v47, %v2171_v34 }
 0x2a6   : > { %4636 = vmatprep.subr.bf16.mxu1 %v4635_v8  ;;  %v4647_v28 = vpack.c.bf16 %v2190_v40, %v2189_v14 }
 0x2a8   : > { %2140 = vmatmul.mubr.f32.gmra.mrb[20].mxu1 %v5829_v36  ;;  %v2174_v36 = vld [vmem:[#allocation5 + $0x268] sm:$0xff] }
 0x2a9   : > { %2144 = vmatprep.mubr.f32.mxu1 %v5853_v18  ;;  %4638 = vmatpush3.bf16.msra.mxu1 %v4637_v38  ;;  %v2192_v18 = vld [vmem:[#allocation5 + $0x2f8] sm:$0xff]  ;;  %v4649_v31 = vpack.c.bf16 %v2174_v36, %v2173_v50 }
 0x2aa   : > { %4640 = vmatprep.subr.bf16.mxu1 %v4639_v43  ;;  %v4651_v42 = vpack.c.bf16 %v2192_v18, %v2191_v61  ;;  %v4091_v18 = vld [vmem:[%s6217_s6] ss:$0 sm:$0xff] }
 0x2ac   : > { %2145 = vmatmul.mubr.f32.gmra.mrb[22].mxu1 %v5847_v62  ;;  %v2176_v62 = vld [vmem:[#allocation5 + $0x278] sm:$0xff] }
 0x2ad   : > { %2149 = vmatprep.mubr.f32.mxu1 %v5871_v26  ;;  %4642 = vmatpush3.bf16.msra.mxu1 %v4641_v22  ;;  %v4653_v26 = vpack.c.bf16 %v2176_v62, %v2175_v1 }
 0x2ae   : > { %4644 = vmatprep.subr.bf16.mxu1 %v4643_v60 }
 0x2b0   : > { %2150 = vmatmul.mubr.f32.gmra.mrb[24].mxu1 %v5865_v17 }
 0x2b1   : > { %2154 = vmatprep.mubr.f32.mxu1 %v5889_v24  ;;  %4646 = vmatpush3.bf16.msra.mxu1 %v4645_v32 }
 0x2b2   : > { %4648 = vmatprep.subr.bf16.mxu1 %v4647_v28 }
 0x2b4   : > { %2155 = vmatmul.mubr.f32.gmra.mrb[26].mxu1 %v5883_v5 }
 0x2b5   : > { %4650 = vmatpush3.bf16.msra.mxu1 %v4649_v31  ;;  %2297 = vmatprep.mubr.f32.mxu1 %v5821_v9 }
 0x2b6   : > { %4652 = vmatprep.subr.bf16.mxu1 %v4651_v42 }
 0x2b9   : > { %4654 = vmatpush3.bf16.msra.mxu1 %v4653_v26 }
 0x2ba   : > { %4314 = vmatprep.subr.mxu1 %v6311_v59 }
 0x2bc   : > { %2298 = vmatmul.mubr.f32.vlgmr.msra.gmra.mrb[28].mxu1 %v5815_v37  ;;  %v2384_v37 = vld [vmem:[%s6220_s9] sm:$0x1f] }
 0x2bd   : > { %2302 = vmatprep.mubr.f32.mxu1 %v5839_v3 }
 0x2c0   : > { %2303 = vmatmul.mubr.f32.gmra.mrb[30].mxu1 %v5833_v21 }
 0x2c1   : > { %2307 = vmatprep.mubr.f32.mxu1 %v5857_v10 }
 0x2c2   : > { %4315 = vmatpush3.xpose.msra.mxu1 %v2384_v37 }
 0x2c3   : > { %4319 = vmatprep.subr.mxu1 %v6311_v59 }
 0x2c4   : > { %2308 = vmatmul.mubr.f32.gmra.mrb[32].mxu1 %v5851_v56 }
 0x2c5   : > { %2312 = vmatprep.mubr.f32.mxu1 %v5875_v49 }
 0x2c8   : > { %2313 = vmatmul.mubr.f32.gmra.mrb[34].mxu1 %v5869_v19 }
 0x2c9   : > { %2317 = vmatprep.mubr.f32.mxu1 %v5893_v7 }
 0x2cc   : > { %2318 = vmatmul.mubr.f32.gmra.mrb[36].mxu1 %v5887_v15 }
 0x2cd   : > { %2322 = vmatprep.mubr.f32.mxu1 %v5909_v6  ;;  %v2385_v6 = vld [vmem:[%s6221_s10] sm:$0x1f] }
 0x2ce   : > { %4310 = vmatpush3.xpose.msra.mxu0 %v2385_v6 }
 0x2d0   : > { %2323 = vmatmul.mubr.f32.gmra.mrb[38].mxu1 %v5903_v11 }
 0x2d1   : > { %2327 = vmatprep.mubr.f32.mxu1 %v2217_v13 }
 0x2d4   : > { %2328 = vmatmul.mubr.f32.gmra.mrb[40].mxu1 %v2215_v54 }
 0x2d5   : > { %4316 = vmatprep.mubr.msk.f32.mxu1 %vm6253_vm7, %v6311_v59 }
 0x34f   : > { %v4146_v9 = vpop.f32.mrb[0].mxu1 }
 0x350   : > { %v4147_v21 = vpop.f32.mrb[1].mxu1 }
 0x351   : > { %v4148_v3 = vadd.f32 %v4147_v21, %v4146_v9 }
 0x353   : > { %v4149_v56 = vpop.f32.mrb[2].mxu1 }
 0x354   : > { %v4150_v10 = vpop.f32.mrb[3].mxu1 }
 0x355   : > { %v4151_v17 = vadd.f32 %v4150_v10, %v4149_v56 }
 0x357   : > { %v4152_v19 = vpop.f32.mrb[4].mxu1 }
 0x358   : > { %v4153_v49 = vpop.f32.mrb[5].mxu1 }
 0x359   : > { %v4154_v5 = vadd.f32 %v4153_v49, %v4152_v19 }
 0x35b   : > { %v4155_v15 = vpop.f32.mrb[6].mxu1 }
 0x35c   : > { %v4156_v24 = vpop.f32.mrb[7].mxu1 }
 0x35d   : > { %v4157_v7 = vadd.f32 %v4156_v24, %v4155_v15 }
 0x35f   : > { %v4158_v54 = vpop.f32.mrb[8].mxu1 }
 0x360   : > { %v4159_v13 = vpop.f32.mrb[9].mxu1 }
 0x361   : > { %v4160_v11 = vadd.f32 %v4159_v13, %v4158_v54 }
 0x363   : > { %v4161_v46 = vpop.f32.mrb[10].mxu1 }
 0x364   : > { %v4162_v0 = vpop.f32.mrb[11].mxu1 }
 0x365   : > { %v4163_v45 = vadd.f32 %v4162_v0, %v4161_v46 }
 0x367   : > { %v4164_v27 = vpop.f32.mrb[12].mxu1 }
 0x368   : > { %v4165_v57 = vpop.f32.mrb[13].mxu1 }
 0x369   : > { %v4166_v2 = vadd.f32 %v4165_v57, %v4164_v27 }
 0x36f   : > { %v4199_v53 = vpop.f32.mrb[14].mxu1 }
 0x370   : > { %v4200_v41 = vpop.f32.mrb[15].mxu1 }
 0x371   : > { %v4201_v51 = vadd.f32 %v4200_v41, %v4199_v53 }
 0x373   : > { %v2127_v20 = vadd.f32 %v4201_v51, %v4148_v3  ;;  %v4202_v16 = vpop.f32.mrb[16].mxu1 }
 0x374   : > { %v4203_v44 = vpop.f32.mrb[17].mxu1 }
 0x375   : > { %v4204_v25 = vadd.f32 %v4203_v44, %v4202_v16 }
 0x377   : > { %v2132_v23 = vadd.f32 %v4204_v25, %v4151_v17  ;;  %v4205_v35 = vpop.f32.mrb[18].mxu1 }
 0x378   : > { %v4206_v33 = vpop.f32.mrb[19].mxu1 }
 0x379   : > { %v4207_v48 = vadd.f32 %v4206_v33, %v4205_v35 }
 0x37b   : > { %v2137_v8 = vadd.f32 %v4207_v48, %v4154_v5  ;;  %v4208_v4 = vpop.f32.mrb[20].mxu1 }
 0x37c   : > { %v4209_v52 = vpop.f32.mrb[21].mxu1 }
 0x37d   : > { %v4210_v39 = vadd.f32 %v4209_v52, %v4208_v4 }
 0x37f   : > { %v2142_v30 = vadd.f32 %v4210_v39, %v4157_v7  ;;  %v4211_v38 = vpop.f32.mrb[22].mxu1 }
 0x380   : > { %v4212_v43 = vpop.f32.mrb[23].mxu1 }
 0x381   : > { %v4213_v58 = vadd.f32 %v4212_v43, %v4211_v38 }
 0x383   : > { %v2147_v29 = vadd.f32 %v4213_v58, %v4160_v11  ;;  %v4214_v12 = vpop.f32.mrb[24].mxu1 }
 0x384   : > { %v4215_v55 = vpop.f32.mrb[25].mxu1 }
 0x385   : > { %v4216_v22 = vadd.f32 %v4215_v55, %v4214_v12 }
 0x387   : > { %v2152_v60 = vadd.f32 %v4216_v22, %v4163_v45  ;;  %v4217_v34 = vpop.f32.mrb[26].mxu1  ;;  %v2376_v22 = vld [vmem:[%s6218_s7] sm:$0xff] }
 0x388   : > { %v4218_v47 = vpop.f32.mrb[27].mxu1 }
 0x389   : > { %v4219_v14 = vadd.f32 %v4218_v47, %v4217_v34  ;;  %v2377_v34 = vld [vmem:[%s6218_s7 + $0x8] sm:$0xf] }
 0x38b   : > { %v2157_v40 = vadd.f32 %v4219_v14, %v4166_v2  ;;  %v2378_v14 = vld [vmem:[%s6219_s8] sm:$0xff] }
 0x38f   : > { %v4252_v32 = vpop.f32.mrb[28].mxu1 }
 0x390   : > { %v4253_v28 = vpop.f32.mrb[29].mxu1 }
 0x391   : > { %v4254_v50 = vadd.f32 %v4253_v28, %v4252_v32  ;;  %v6318_v32 = vmov 0  }
 0x393   : > { %v2333_v36 = vadd.f32 %v4254_v50, %v2127_v20  ;;  %v4255_v61 = vpop.f32.mrb[30].mxu1 }
 0x394   : > { %v4256_v31 = vpop.f32.mrb[31].mxu1 }
 0x395   : > { %v4257_v42 = vadd.f32 %v4256_v31, %v4255_v61  ;;  %v2347_v1 = vadd.f32 %v4091_v18, %v2333_v36  ;;  %v2416_v31 = vrot.slane %v2378_v14, 7 }
 0x397   : > { %v2334_v62 = vadd.f32 %v4257_v42, %v2132_v23  ;;  %v4258_v26 = vpop.f32.mrb[32].mxu1  ;;  %v2354_v3 = vmax.f32 %v2347_v1, 0.0 }
 0x398   : > { %v4259_v37 = vpop.f32.mrb[33].mxu1 }
 0x399   : > { %v2348_v9 = vadd.f32 %v4091_v18, %v2334_v62  ;;  %v4260_v21 = vadd.f32 %v4259_v37, %v4258_v26 }
 0x39b   : > { %v2355_v56 = vmax.f32 %v2348_v9, 0.0  ;;  %v2335_v10 = vadd.f32 %v4260_v21, %v2137_v8  ;;  %v4261_v17 = vpop.f32.mrb[34].mxu1 }
 0x39c   : > { %v4262_v19 = vpop.f32.mrb[35].mxu1 }
 0x39d   : > { %v2361_v49 = vadd.f32 %v2355_v56, %v2354_v3  ;;  %v2349_v5 = vadd.f32 %v4091_v18, %v2335_v10  ;;  %v4263_v15 = vadd.f32 %v4262_v19, %v4261_v17 }
 0x39f   : > { %v2356_v24 = vmax.f32 %v2349_v5, 0.0  ;;  %v2336_v7 = vadd.f32 %v4263_v15, %v2142_v30  ;;  %v4264_v54 = vpop.f32.mrb[36].mxu1  ;;  %v2381_v5 = vld [vmem:[%s6219_s8 + $0x18] sm:$0xf] }
 0x3a0   : > { %v4265_v13 = vpop.f32.mrb[37].mxu1 }
 0x3a1   : > { %v2362_v11 = vadd.f32 %v2361_v49, %v2356_v24  ;;  %v2350_v6 = vadd.f32 %v4091_v18, %v2336_v7  ;;  %v4266_v46 = vadd.f32 %v4265_v13, %v4264_v54  ;;  %v2380_v49 = vld [vmem:[%s6219_s8 + $0x10] sm:$0xff] }
 0x3a3   : > { %v2357_v0 = vmax.f32 %v2350_v6, 0.0  ;;  %v2337_v45 = vadd.f32 %v4266_v46, %v2147_v29  ;;  %v4267_v27 = vpop.f32.mrb[38].mxu1  ;;  %v2447_v46 = vrot.slane %v2380_v49, 6 }
 0x3a4   : > { %v4268_v57 = vpop.f32.mrb[39].mxu1 }
 0x3a5   : > { %v2363_v2 = vadd.f32 %v2362_v11, %v2357_v0  ;;  %v2351_v53 = vadd.f32 %v4091_v18, %v2337_v45  ;;  %v4269_v41 = vadd.f32 %v4268_v57, %v4267_v27  ;;  %v2448_v0 = vrot.slane %v2381_v5, 6 }
 0x3a7   : > { %v2358_v51 = vmax.f32 %v2351_v53, 0.0  ;;  %v2338_v20 = vadd.f32 %v4269_v41, %v2152_v60  ;;  %v4270_v16 = vpop.f32.mrb[40].mxu1 }
 0x3a8   : > { %v4271_v44 = vpop.f32.mrb[41].mxu1 }
 0x3a9   : > { %v2364_v25 = vadd.f32 %v2363_v2, %v2358_v51  ;;  %v2352_v23 = vadd.f32 %v4091_v18, %v2338_v20  ;;  %v4272_v35 = vadd.f32 %v4271_v44, %v4270_v16  ;;  %v2449_v16 = vsel %vm863_vm5, %v2447_v46, %v2448_v0 }
 0x3ab   : > { %v2359_v33 = vmax.f32 %v2352_v23, 0.0  ;;  %v2339_v48 = vadd.f32 %v4272_v35, %v2157_v40  ;;  %v2379_v40 = vld [vmem:[%s6219_s8 + $0x8] sm:$0xf]  ;;  %v2382_v35 = vld [vmem:[%s6219_s8 + $0x20] sm:$0xff] }
 0x3ac   : > { %v2417_v42 = vrot.slane %v2379_v40, 7 }
 0x3ad   : > { %v2365_v8 = vadd.f32 %v2364_v25, %v2359_v33  ;;  %v2353_v4 = vadd.f32 %v4091_v18, %v2339_v48  ;;  %v2383_v33 = vld [vmem:[%s6219_s8 + $0x28] sm:$0xf] }
 0x3ae   : > { %v2418_v9 = vsel %vm915_vm6, %v2416_v31, %v2417_v42 }
 0x3af   : > { %v2360_v52 = vmax.f32 %v2353_v4, 0.0 }
 0x3b1   : > { %v2366_v39 = vsel %vm811_vm4, %v2360_v52, 0.0 }
 0x3b2   : > { %v2367_v30 = vadd.f32 %v2366_v39, %v2365_v8 }
 0x3b4   : > { %v2368_v38 = vrot.slane %v2367_v30, 4 }
 0x3b6   : > { %v2369_v43 = vadd.f32 %v2368_v38, %v2367_v30 }
 0x3b8   : > { %v2370_v58 = vrot.slane %v2369_v43, 2 }
 0x3ba   : > { %v2371_v29 = vadd.f32 %v2370_v58, %v2369_v43  ;;  %v2477_v43 = vrot.slane %v2382_v35, 5  ;;  %v2478_v58 = vrot.slane %v2383_v33, 5 }
 0x3bc   : > { %v2372_v12 = vrot.slane %v2371_v29, 1 }
 0x3be   : > { %v2373_v55 = vadd.f32 %v2372_v12, %v2371_v29 }
 0x3c0   : > { %v5960_v60 = vmul.f32 0.019607844, %v2373_v55 }
 0x3c2   : > { %v2501_v47 = vsub.f32 0.0, %v5960_v60  ;;  %vm2395_vm8 = vcmp.lt.f32.partialorder %v5960_v60, %v2376_v22  ;;  %vm2396_vm9 = vcmp.lt.f32.partialorder %v5960_v60, %v2377_v34  ;;  %vm2394_vm10 = vcmp.ge.f32.partialorder %v5960_v60, %v2377_v34 }
 0x3c3   : > { %v2397_v28 = vsel %vm2395_vm8, 1, %v6318_v32  ;;  %v2398_v36 = vsel %vm2396_vm9, 1, %v6318_v32  ;;  %v2412_v62 = vsub.f32 %v2376_v22, %v5960_v60  ;;  %vm2393_vm12 = vcmp.ge.f32.partialorder %v5960_v60, %v2376_v22 }
 0x3c4   : > { %v2502_v50 = vmul.f32 1.442695, %v2501_v47  ;;  %v2399_v61 = vrot.slane %v2397_v28, 1  ;;  %v2400_v18 = vrot.slane %v2398_v36, 1  ;;  %v2413_v26 = vsub.f32 %v2377_v34, %v5960_v60 }
 0x3c5   : > { %v2409_v3 = vsub.f32 %v5960_v60, %v2377_v34  ;;  %v2408_v10 = vsub.f32 %v5960_v60, %v2376_v22  ;;  %v2421_v17 = vmul.f32 %v2416_v31, %v2412_v62  ;;  %v2452_v25 = vmul.f32 %v2447_v46, %v2412_v62  ;;  %v3169_v46 = vld [vmem:[%s6225_s14] sm:$0x7] }
 0x3c6   : > { %4811 = vpow2.f32 %v2502_v50  ;;  %v2401_v1 = vsel %vm603_vm0, %v2399_v61, %v2400_v18  ;;  %vm2403_vm11 = vcmp.ne.s32.totalorder %v2400_v18, 0  ;;  %v2422_v15 = vmul.f32 %v2418_v9, %v2413_v26  ;;  %v2386_v50 = vld [vmem:[%s6221_s10 + $0x8] sm:$0x1f] }
 0x3c7   : > { %vm2402_vm13 = vcmp.ne.s32.totalorder %v2401_v1, 0  ;;  %vm2405_vm14 = vmand %vm2394_vm10, %vm2403_vm11  ;;  %v2411_v54 = vmul.f32 %v2409_v3, %v2379_v40  ;;  %v2410_v11 = vmul.f32 %v2408_v10, %v2378_v14  ;;  %v2453_v48 = vmul.f32 %v2449_v16, %v2413_v26  ;;  %v3163_v16 = vld [vmem:[%s6223_s12 + $0x8] sm:$0xf] }
 0x3c8   : > { %vm2404_vm15 = vmand %vm2393_vm12, %vm2402_vm13  ;;  %v2407_v37 = vsel %vm2405_vm14, 1.0, %v6311_v59  ;;  %v2444_v52 = vmul.f32 %v2409_v3, %v2381_v5  ;;  %v2443_v30 = vmul.f32 %v2408_v10, %v2380_v49  ;;  %v2479_v40 = vsel %vm811_vm4, %v2477_v43, %v2478_v58  ;;  %v2389_v5 = vld [vmem:[%s6221_s10 + $0x20] sm:$0x1f] }
 0x3c9   : > { %v2406_v21 = vsel %vm2404_vm15, 1.0, %v6311_v59  ;;  %v2428_v56 = vrot.slane %v2407_v37, 7  ;;  %v2424_v27 = vmul.f32 %v2411_v54, %v2407_v37  ;;  %v2482_v61 = vmul.f32 %v2477_v43, %v2412_v62  ;;  %v2391_v54 = vld [vmem:[%s6221_s10 + $0x30] sm:$0x1f] }
 0x3ca   : > { %v2427_v19 = vrot.slane %v2406_v21, 7  ;;  %v2423_v53 = vmul.f32 %v2410_v11, %v2406_v21  ;;  %v2483_v31 = vmul.f32 %v2479_v40, %v2413_v26  ;;  %v2387_v26 = vld [vmem:[%s6221_s10 + $0x10] sm:$0x1f]  ;;  %v2392_v11 = vld [vmem:[%s6221_s10 + $0x38] sm:$0x1f]  ;;  %vm3296_vm8 = vcmask 39936  }
 0x3cc   : > { %v2429_v24 = vsel %vm915_vm6, %v2427_v19, %v2428_v56  ;;  %v2432_v7 = vmul.f32 %v2427_v19, %v2421_v17  ;;  %v2388_v19 = vld [vmem:[%s6221_s10 + $0x18] sm:$0x1f] }
 0x3cd   : > { %v2433_v13 = vmul.f32 %v2429_v24, %v2422_v15  ;;  %v2390_v24 = vld [vmem:[%s6221_s10 + $0x28] sm:$0x1f] }
 0x3ce   : > { %v2436_v6 = vrot.slane %v2432_v7, 2 }
 0x3cf   : > { %v2437_v57 = vrot.slane %v2433_v13, 2 }
 0x3d0   : > { %v4812_v45 = vpop.eup %4811 }
 0x3d1   : > { %v2504_v2 = vadd.f32 1.0, %v4812_v45  ;;  %v2438_v41 = vsel %vm655_vm1, %v2436_v6, %v2437_v57  ;;  %v2442_v51 = vadd.f32 %v2437_v57, %v2424_v27 }
 0x3d2   : > { %v2441_v20 = vadd.f32 %v2438_v41, %v2423_v53  ;;  %v3160_v53 = vld [vmem:[%s6222_s11] sm:$0xff]  ;;  %v3161_v41 = vld [vmem:[%s6222_s11 + $0x8] sm:$0xf] }
 0x3d3   : > { %4813 = vrcp.f32 %v2504_v2  ;;  %v2459_v44 = vrot.slane %v2442_v51, 6  ;;  %v2455_v29 = vmul.f32 %v2444_v52, %v2442_v51 }
 0x3d4   : > { %v2458_v23 = vrot.slane %v2441_v20, 6  ;;  %v2454_v55 = vmul.f32 %v2443_v30, %v2441_v20  ;;  %v3162_v20 = vld [vmem:[%s6223_s12] sm:$0xff] }
 0x3d5   : > { %v3204_v33 = vrot.slane %v3162_v20, 7 }
 0x3d6   : > { %v2460_v8 = vsel %vm863_vm5, %v2458_v23, %v2459_v44  ;;  %v2463_v4 = vmul.f32 %v2458_v23, %v2452_v25 }
 0x3d7   : > { %v2464_v39 = vmul.f32 %v2460_v8, %v2453_v48  ;;  %v3205_v48 = vrot.slane %v3163_v16, 7 }
 0x3d8   : > { %v2467_v38 = vrot.slane %v2463_v4, 3 }
 0x3d9   : > { %v2468_v12 = vrot.slane %v2464_v39, 3  ;;  %v3206_v39 = vsel %vm915_vm6, %v3204_v33, %v3205_v48 }
 0x3db   : > { %v2469_v22 = vsel %vm707_vm2, %v2467_v38, %v2468_v12  ;;  %v2473_v34 = vadd.f32 %v2468_v12, %v2455_v29 }
 0x3dc   : > { %v2472_v14 = vadd.f32 %v2469_v22, %v2454_v55  ;;  %v3165_v55 = vld [vmem:[%s6223_s12 + $0x18] sm:$0xf] }
 0x3dd   : > { %v4814_v47 = vpop.eup %4813  ;;  %v2488_v36 = vrot.slane %v2473_v34, 5  ;;  %v3164_v34 = vld [vmem:[%s6223_s12 + $0x10] sm:$0xff] }
 0x3de   : > { %v2507_v28 = vmul.f32 %v4814_v47, %v5960_v60  ;;  %v2487_v18 = vrot.slane %v2472_v14, 5  ;;  %v2474_v60 = vmul.f32 %v2408_v10, %v2382_v35 }
 0x3e0   : > { %4317 = vmatmul.mubr.f32.vlgmr.msra.gmra.mrb[42].mxu1 %v2507_v28  ;;  %v2489_v42 = vsel %vm811_vm4, %v2487_v18, %v2488_v36  ;;  %v2492_v1 = vmul.f32 %v2487_v18, %v2482_v61  ;;  %v2484_v3 = vmul.f32 %v2474_v60, %v2472_v14  ;;  %v3236_v18 = vrot.slane %v3165_v55, 6 }
 0x3e1   : > { %4320 = vmatpush3.xpose.msra.mxu1 %v2386_v50  ;;  %4321 = vmatprep.mubr.msk.f32.mxu1 %vm6253_vm7, %v6311_v59  ;;  %v2493_v37 = vmul.f32 %v2489_v42, %v2483_v31  ;;  %v3235_v31 = vrot.slane %v3164_v34, 6 }
 0x3e2   : > { %4324 = vmatprep.subr.mxu1 %v6311_v59  ;;  %v2496_v9 = vrot.slane %v2492_v1, 4 }
 0x3e3   : > { %v2497_v21 = vrot.slane %v2493_v37, 4 }
 0x3e5   : > { %v2498_v56 = vsel %vm759_vm3, %v2496_v9, %v2497_v21 }
 0x3e6   : > { %v2500_v62 = vadd.f32 %v2498_v56, %v2484_v3  ;;  %v3237_v3 = vsel %vm863_vm5, %v3235_v31, %v3236_v18 }
 0x3e8   : > { %4312 = vmatmul.mubr.f32.vlgmr.msra.gmra.mrb[14].mxu0 %v2500_v62  ;;  %v2649_v17 = vrot.slane %v2500_v62, 1  ;;  %v2722_v10 = vrot.slane %v2500_v62, 2  ;;  %v2795_v49 = vrot.slane %v2500_v62, 3  ;;  %v2868_v15 = vrot.slane %v2500_v62, 4 }
 0x3e9   : > { %v2941_v7 = vrot.slane %v2500_v62, 5  ;;  %v3014_v13 = vrot.slane %v2500_v62, 6  ;;  %v3087_v6 = vrot.slane %v2500_v62, 7 }
 0x3ea   : > { %4322 = vmatmul.mubr.f32.vlgmr.msra.gmra.mrb[42].mxu1 %v2649_v17 }
 0x3eb   : > { %4325 = vmatpush3.xpose.msra.mxu1 %v2387_v26  ;;  %4326 = vmatprep.mubr.msk.f32.mxu1 %vm6253_vm7, %v6311_v59  ;;  %v3166_v26 = vld [vmem:[%s6223_s12 + $0x20] sm:$0xff] }
 0x3ec   : > { %4329 = vmatprep.subr.mxu1 %v6311_v59 }
 0x3f2   : > { %4327 = vmatmul.mubr.f32.vlgmr.msra.gmra.mrb[42].mxu1 %v2722_v10  ;;  %v3167_v10 = vld [vmem:[%s6223_s12 + $0x28] sm:$0xf] }
 0x3f3   : > { %4330 = vmatpush3.xpose.msra.mxu1 %v2388_v19  ;;  %4331 = vmatprep.mubr.msk.f32.mxu1 %vm6253_vm7, %v6311_v59 }
 0x3f4   : > { %4334 = vmatprep.subr.mxu1 %v6311_v59 }
 0x3fa   : > { %4332 = vmatmul.mubr.f32.vlgmr.msra.gmra.mrb[42].mxu1 %v2795_v49 }
 0x3fb   : > { %4335 = vmatpush3.xpose.msra.mxu1 %v2389_v5  ;;  %4336 = vmatprep.mubr.msk.f32.mxu1 %vm6253_vm7, %v6311_v59 }
 0x3fc   : > { %4339 = vmatprep.subr.mxu1 %v6311_v59 }
 0x402   : > { %4337 = vmatmul.mubr.f32.vlgmr.msra.gmra.mrb[42].mxu1 %v2868_v15 }
 0x403   : > { %4340 = vmatpush3.xpose.msra.mxu1 %v2390_v24  ;;  %4341 = vmatprep.mubr.msk.f32.mxu1 %vm6253_vm7, %v6311_v59 }
 0x404   : > { %4344 = vmatprep.subr.mxu1 %v6311_v59 }
 0x40a   : > { %4342 = vmatmul.mubr.f32.vlgmr.msra.gmra.mrb[42].mxu1 %v2941_v7 }
 0x40b   : > { %4345 = vmatpush3.xpose.msra.mxu1 %v2391_v54  ;;  %4346 = vmatprep.mubr.msk.f32.mxu1 %vm6253_vm7, %v6311_v59 }
 0x40c   : > { %4349 = vmatprep.subr.mxu1 %v6311_v59 }
 0x412   : > { %4347 = vmatmul.mubr.f32.vlgmr.msra.gmra.mrb[42].mxu1 %v3014_v13  ;;  %v3265_v13 = vrot.slane %v3166_v26, 5 }
 0x413   : > { %4350 = vmatpush3.xpose.msra.mxu1 %v2392_v11  ;;  %4351 = vmatprep.mubr.msk.f32.mxu1 %vm6253_vm7, %v6311_v59  ;;  %v3266_v11 = vrot.slane %v3167_v10, 5 }
 0x414   : > { %4354 = vmatprep.subr.mxu1 %v6311_v59 }
 0x41a   : > { %4352 = vmatmul.mubr.f32.vlgmr.msra.gmra.mrb[42].mxu1 %v3087_v6 }
 0x41b   : > { %4356 = vmatprep.mubr.msk.f32.mxu1 %vm6253_vm7, %v6311_v59  ;;  %4355 = vmatpush3.xpose.msk.msra.mxu1 %vm3296_vm8, %v3169_v46 }
 0x41c   : > { %4359 = vmatprep.subr.mxu1 %v6311_v59 }
 0x4bb   : > { %v2574_v0 = vpop.f32.mrb[14].mxu0 }
 0x4bc   : > { %v4313_v45 = vpop.f32.mrb[15].mxu0 }
 0x4ed   : > { %v3155_v27 = vpop.f32.mrb[42].mxu1 }
 0x4ee   : > { %v6056_v57 = vadd.f32 %v3155_v27, %v2574_v0  ;;  %v4353_v2 = vpop.f32.mrb[43].mxu1 }
 0x4f0   : > { %v3180_v51 = vrot.slane %v6056_v57, %v5168_v63 }
 0x4f2   : > { %vm3183_vm9 = vcmp.lt.f32.partialorder %v3180_v51, %v3160_v53  ;;  %vm3184_vm10 = vcmp.lt.f32.partialorder %v3180_v51, %v3161_v41  ;;  %vm3182_vm11 = vcmp.ge.f32.partialorder %v3180_v51, %v3161_v41  ;;  %v3200_v8 = vsub.f32 %v3160_v53, %v3180_v51 }
 0x4f3   : > { %v3185_v44 = vsel %vm3183_vm9, 1, %v6318_v32  ;;  %v3186_v25 = vsel %vm3184_vm10, 1, %v6318_v32  ;;  %vm3181_vm13 = vcmp.ge.f32.partialorder %v3180_v51, %v3160_v53  ;;  %v3201_v4 = vsub.f32 %v3161_v41, %v3180_v51 }
 0x4f4   : > { %v3187_v23 = vrot.slane %v3185_v44, 1  ;;  %v3188_v35 = vrot.slane %v3186_v25, 1  ;;  %v3289_v32 = vsub.f32 0.0, %v6056_v57  ;;  %v3197_v38 = vsub.f32 %v3180_v51, %v3161_v41 }
 0x4f5   : > { %v3196_v58 = vsub.f32 %v3180_v51, %v3160_v53  ;;  %v3209_v29 = vmul.f32 %v3204_v33, %v3200_v8  ;;  %v3210_v22 = vmul.f32 %v3206_v39, %v3201_v4  ;;  %v3240_v62 = vmul.f32 %v3235_v31, %v3200_v8 }
 0x4f6   : > { %v3189_v63 = vsel %vm603_vm0, %v3187_v23, %v3188_v35  ;;  %vm3191_vm12 = vcmp.ne.s32.totalorder %v3188_v35, 0  ;;  %v3290_v40 = vmul.f32 1.442695, %v3289_v32  ;;  %v3199_v28 = vmul.f32 %v3197_v38, %v3163_v16 }
 0x4f7   : > { %vm3190_vm14 = vcmp.ne.s32.totalorder %v3189_v63, 0  ;;  %vm3193_vm15 = vmand %vm3182_vm11, %vm3191_vm12  ;;  %v3198_v36 = vmul.f32 %v3196_v58, %v3162_v20  ;;  %v3241_v19 = vmul.f32 %v3237_v3, %v3201_v4  ;;  %v3232_v15 = vmul.f32 %v3197_v38, %v3165_v55  ;;  %v3168_v38 = vld [vmem:[%s6224_s13] sm:$0x7] }
 0x4f8   : > { %vm3192_vm7 = vmand %vm3181_vm13, %vm3190_vm14  ;;  %v3195_v52 = vsel %vm3193_vm15, 1.0, %v6311_v59  ;;  %4815 = vpow2.f32 %v3290_v40  ;;  %v3231_v7 = vmul.f32 %v3196_v58, %v3164_v34  ;;  %v3267_v41 = vsel %vm811_vm4, %v3265_v13, %v3266_v11  ;;  %v3175_v40 = vld [vmem:[%s6225_s14 + $0x18] sm:$0x7] }
 0x4f9   : > { %v3194_v30 = vsel %vm3192_vm7, 1.0, %v6311_v59  ;;  %v3216_v43 = vrot.slane %v3195_v52, 7  ;;  %v3212_v42 = vmul.f32 %v3199_v28, %v3195_v52  ;;  %v3270_v16 = vmul.f32 %v3265_v13, %v3200_v8 }
 0x4fa   : > { %v3215_v12 = vrot.slane %v3194_v30, 7  ;;  %v3211_v37 = vmul.f32 %v3198_v36, %v3194_v30  ;;  %v3271_v25 = vmul.f32 %v3267_v41, %v3201_v4  ;;  %v3262_v48 = vmul.f32 %v3196_v58, %v3166_v26 }
 0x4fb   : > { %vm6319_vm0 = vmmov 0  }
 0x4fc   : > { %v3217_v47 = vsel %vm915_vm6, %v3215_v12, %v3216_v43  ;;  %v3220_v14 = vmul.f32 %v3215_v12, %v3209_v29  ;;  %v3170_v43 = vld [vmem:[%s6225_s14 + $0x4] sm:$0x7]  ;;  %v3171_v29 = vld [vmem:[%s6225_s14 + $0x8] sm:$0x7]  ;;  %v3172_v12 = vld [vmem:[%s6225_s14 + $0xc] sm:$0x7] }
 0x4fd   : > { %v3221_v50 = vmul.f32 %v3217_v47, %v3210_v22  ;;  %v3173_v22 = vld [vmem:[%s6225_s14 + $0x10] sm:$0x7]  ;;  %v3174_v47 = vld [vmem:[%s6225_s14 + $0x14] sm:$0x7] }
 0x4fe   : > { %v3224_v61 = vrot.slane %v3220_v14, 2 }
 0x4ff   : > { %v3225_v1 = vrot.slane %v3221_v50, 2  ;;  %v3176_v50 = vld [vmem:[%s6225_s14 + $0x1c] sm:$0x7] }
 0x501   : > { %v3230_v60 = vadd.f32 %v3225_v1, %v3212_v42  ;;  %v3226_v9 = vsel %vm655_vm1, %v3224_v61, %v3225_v1  ;;  %vm3988_vm1 = vcmask 16384  }
 0x502   : > { %v3229_v21 = vadd.f32 %v3226_v9, %v3211_v37  ;;  %v4816_v0 = vpop.eup %4815 }
 0x503   : > { %v3247_v56 = vrot.slane %v3230_v60, 6  ;;  %v3243_v6 = vmul.f32 %v3232_v15, %v3230_v60  ;;  %v3292_v51 = vadd.f32 1.0, %v4816_v0 }
 0x504   : > { %v3246_v17 = vrot.slane %v3229_v21, 6  ;;  %v3242_v45 = vmul.f32 %v3231_v7, %v3229_v21 }
 0x505   : > { %4817 = vrcp.f32 %v3292_v51 }
 0x506   : > { %v3248_v49 = vsel %vm863_vm5, %v3246_v17, %v3247_v56  ;;  %v3251_v5 = vmul.f32 %v3246_v17, %v3240_v62 }
 0x507   : > { %v3252_v24 = vmul.f32 %v3248_v49, %v3241_v19 }
 0x508   : > { %v3255_v54 = vrot.slane %v3251_v5, 3 }
 0x509   : > { %v3256_v46 = vrot.slane %v3252_v24, 3 }
 0x50b   : > { %v3257_v27 = vsel %vm707_vm2, %v3255_v54, %v3256_v46  ;;  %v3261_v2 = vadd.f32 %v3256_v46, %v3243_v6 }
 0x50c   : > { %v3260_v53 = vadd.f32 %v3257_v27, %v3242_v45 }
 0x50d   : > { %v3276_v20 = vrot.slane %v3261_v2, 5 }
 0x50e   : > { %v3275_v44 = vrot.slane %v3260_v53, 5  ;;  %v3272_v39 = vmul.f32 %v3262_v48, %v3260_v53 }
 0x50f   : > { %v4818_v8 = vpop.eup %4817 }
 0x510   : > { %v3277_v23 = vsel %vm811_vm4, %v3275_v44, %v3276_v20  ;;  %v3280_v35 = vmul.f32 %v3275_v44, %v3270_v16  ;;  %v3295_v4 = vmul.f32 %v4818_v8, %v6056_v57 }
 0x511   : > { %v3281_v33 = vmul.f32 %v3277_v23, %v3271_v25 }
 0x512   : > { %v3284_v63 = vrot.slane %v3280_v35, 4 }
 0x513   : > { %v3285_v52 = vrot.slane %v3281_v33, 4 }
 0x515   : > { %v3286_v32 = vsel %vm759_vm3, %v3284_v63, %v3285_v52 }
 0x516   : > { %v3288_v30 = vadd.f32 %v3286_v32, %v3272_v39 }
 0x518   : > { %4357 = vmatmul.mubr.msk.f32.vlgmr.msra.gmra.mrb[44].mxu1 %vm3296_vm8, %v3288_v30  ;;  %v3449_v58 = vrot.slane %v3288_v30, 1  ;;  %v3526_v57 = vrot.slane %v3288_v30, 2  ;;  %v3603_v55 = vrot.slane %v3288_v30, 3  ;;  %v3680_v34 = vrot.slane %v3288_v30, 4 }
 0x519   : > { %4360 = vmatpush3.xpose.msk.msra.mxu1 %vm3296_vm8, %v3168_v38  ;;  %4361 = vmatprep.mubr.msk.f32.mxu1 %vm6319_vm0, %v6311_v59  ;;  %v3757_v14 = vrot.slane %v3288_v30, 5  ;;  %v3834_v28 = vrot.slane %v3288_v30, 6  ;;  %v3911_v36 = vrot.slane %v3288_v30, 7 }
 0x51a   : > { %4364 = vmatprep.subr.mxu1 %v6311_v59 }
 0x520   : > { %4362 = vmatmul.mubr.msk.f32.vlgmr.msra.gmra.mrb[44].mxu1 %vm3296_vm8, %v3295_v4 }
 0x521   : > { %4365 = vmatpush3.xpose.msk.msra.mxu1 %vm3296_vm8, %v3170_v43  ;;  %4366 = vmatprep.mubr.msk.f32.mxu1 %vm6319_vm0, %v6311_v59 }
 0x522   : > { %4369 = vmatprep.subr.mxu1 %v6311_v59 }
 0x528   : > { %4367 = vmatmul.mubr.msk.f32.vlgmr.msra.gmra.mrb[44].mxu1 %vm3296_vm8, %v3449_v58 }
 0x529   : > { %4370 = vmatpush3.xpose.msk.msra.mxu1 %vm3296_vm8, %v3171_v29  ;;  %4371 = vmatprep.mubr.msk.f32.mxu1 %vm6319_vm0, %v6311_v59 }
 0x52a   : > { %4374 = vmatprep.subr.mxu1 %v6311_v59 }
 0x530   : > { %4372 = vmatmul.mubr.msk.f32.vlgmr.msra.gmra.mrb[44].mxu1 %vm3296_vm8, %v3526_v57 }
 0x531   : > { %4375 = vmatpush3.xpose.msk.msra.mxu1 %vm3296_vm8, %v3172_v12  ;;  %4376 = vmatprep.mubr.msk.f32.mxu1 %vm6319_vm0, %v6311_v59 }
 0x532   : > { %4379 = vmatprep.subr.mxu1 %v6311_v59 }
 0x538   : > { %4377 = vmatmul.mubr.msk.f32.vlgmr.msra.gmra.mrb[44].mxu1 %vm3296_vm8, %v3603_v55 }
 0x539   : > { %4380 = vmatpush3.xpose.msk.msra.mxu1 %vm3296_vm8, %v3173_v22  ;;  %4381 = vmatprep.mubr.msk.f32.mxu1 %vm6319_vm0, %v6311_v59 }
 0x53a   : > { %4384 = vmatprep.subr.mxu1 %v6311_v59 }
 0x540   : > { %4382 = vmatmul.mubr.msk.f32.vlgmr.msra.gmra.mrb[44].mxu1 %vm3296_vm8, %v3680_v34 }
 0x541   : > { %4385 = vmatpush3.xpose.msk.msra.mxu1 %vm3296_vm8, %v3174_v47  ;;  %4386 = vmatprep.mubr.msk.f32.mxu1 %vm6319_vm0, %v6311_v59 }
 0x542   : > { %4389 = vmatprep.subr.mxu1 %v6311_v59 }
 0x548   : > { %4387 = vmatmul.mubr.msk.f32.vlgmr.msra.gmra.mrb[44].mxu1 %vm3296_vm8, %v3757_v14 }
 0x549   : > { %4390 = vmatpush3.xpose.msk.msra.mxu1 %vm3296_vm8, %v3175_v40  ;;  %4391 = vmatprep.mubr.msk.f32.mxu1 %vm6319_vm0, %v6311_v59 }
 0x54a   : > { %4394 = vmatprep.subr.mxu1 %v6311_v59 }
 0x550   : > { %4392 = vmatmul.mubr.msk.f32.vlgmr.msra.gmra.mrb[44].mxu1 %vm3296_vm8, %v3834_v28 }
 0x551   : > { %4395 = vmatpush3.xpose.msk.msra.mxu1 %vm3296_vm8, %v3176_v50  ;;  %4396 = vmatprep.mubr.msk.f32.mxu1 %vm6319_vm0, %v6311_v59 }
 0x558   : > { %4397 = vmatmul.mubr.msk.f32.vlgmr.msra.gmra.mrb[44].mxu1 %vm3296_vm8, %v3911_v36 }
 0x62b   : > { %v3983_v59 = vpop.f32.mrb[44].mxu1 }
 0x62c   : > { %3989 = vst.msk [vmem:[%s516_s17] sm:$0x1] %vm3988_vm1, %v3983_v59  ;;  %v4398_v61 = vpop.f32.mrb[45].mxu1 }
 0x62d   : > { %4888 = shalt.err (!%p4885_p11)
}
 0x62e   : > { %s4889_s24 = scalar_lea.hbm %s6169_s23, 16  ;;  %s4893_s17 = scalar_lea.hbm %s6323_s30, 32 }
 0x62f   : > { %p4890_p13 = scmp.ne.s32.totalorder %s6169_s23, %s4889_s24  ;;  %p4894_p6 = scmp.lt.u32.totalorder %s6169_s23, %s6323_s30 }
 0x630   : > { %p4895_p9 = scmp.lt.u32.totalorder %s4893_s17, %s4889_s24  ;;  %p4897_p12 = scmp.lt.u32.totalorder %s4889_s24, %s6169_s23 }
 0x631   : > { %p4891_p0 = pnand %p4890_p13, %p6324_p1 }
 0x632   : > { %p4896_p10 = por %p4895_p9, %p4894_p6 }
 0x633   : > { %p4892_p5 = pneg %p4891_p0 }
 0x634   : > { %p4898_p2 = por %p4897_p12, %p4896_p10 }
 0x636   : > { %p4899_p3 = pnand %p4898_p2, %p4892_p5 }
 0x638   : > { %4902 = shalt.err (!%p4899_p3)
}
 0x639   : > { %4750 = dma.vmem_to_hbm [thread:$0]  (%p6324_p1), %s6171_s15, 16, %s6169_s23, %s3991_s27  }
 0x63a PF: > { %s6325_s20 = sld [smem:[#allocation14_spill]]  ;;  %s6326_s18 = sld [smem:[#allocation11_spill]] }
 0x63b   : > { %s6327_s22 = sld [smem:[#allocation18_spill]] }
 0x640   : > { %p4767_p4 = scmp.ge.s32.totalorder %s6325_s20, 2  ;;  %s4015_s26 = sand.u32 1, %s6326_s18  }
 0x641   : > { %p6328_p7 = scmp.ne.s32.totalorder %s6327_s22, 0  ;;  %s4016_s21 = scalar_lea.sflag [#allocation4], %s4015_s26 }
 0x643   : > { %p4760_p8 = pnand %p4767_p4, %p6328_p7 }
 0x645   : > { %4928 = dma.done.wait (!%p4760_p8), %s4016_s21, 16  }
 0x646   : > { %4930 = vsyncadd (!%p4760_p8), %s4016_s21, 4294967280  ;;  %s6329_s21 = sld [smem:[#allocation15_spill]]  ;;  %s6330_s18 = sld [smem:[#allocation12_spill]] }
 0x647   : > { %s6331_s19 = sld [smem:[#allocation13_spill]]  ;;  %s6332_s20 = sld [smem:[#allocation16_spill]] }
 0x64c   : > { %p27_p11 = scmp.ge.s32.totalorder %s6329_s21, 4  }
 0x64e   :  { %29 = sbr.rel (!%p27_p11) target bundleno = 7 (0x7), region = 130 }
 0x655   :  { %4020 = vsyncpa [#allocation3], 1 }
 0x656   :  { %4022 = vsyncpa [#allocation3 + $0x1], 1 }
 0x657   :  { %4023 = vsyncpa [#allocation6], 1 }
 0x658   :  { %4024 = vsyncpa [#allocation4], 1 }
 0x659   :  { %4026 = vsyncpa [#allocation4 + $0x1], 1 }

</bundles_post_ra>
